<compile_context>
chip_gen: v7x
topology: tpu7x:2x2x1
jax: 0.10.0
libtpu: 0.0.40
codegen_flags: <defaults>
</compile_context>

<pallas_src>
import functools
import math

import jax
import jax.numpy as jnp
from jax import lax
from jax.experimental import pallas as pl
from jax.experimental.pallas import tpu as pltpu


def _round_up(x, m):
    return (x + m - 1) // m * m


# ----------------------------------------------------------------------------
# Pallas kernel: RWKV7 chunked attention recurrence (forward)
# ----------------------------------------------------------------------------
def _rwkv7_attn_kernel(r_ref, w_ref, k_ref, v_ref, a_ref, b_ref, y_ref,
                       state_ref, *, chunk, heads, head_size):
    # refs are (T_blk, G*N) for the current (batch, head-group, time-block);
    # state_ref is a (G, N, N) f32 scratch carried across the time-block axis.
    CT = chunk
    G = heads
    N = head_size
    T_blk = r_ref.shape[0]
    nchunks = T_blk // CT
    n_doublings = max(0, int(math.ceil(math.log2(CT))) - 1)

    row = lax.broadcasted_iota(jnp.int32, (CT, CT), 0)
    col = lax.broadcasted_iota(jnp.int32, (CT, CT), 1)
    mask_lower = (row > col).astype(jnp.float32)    # strictly lower triangular
    mask_incl = (row >= col).astype(jnp.float32)    # lower incl. diagonal
    eye = (row == col).astype(jnp.float32)

    # s0 = 0 at the first time-block of each (batch, head-group), like
    # RUN_CUDA_RWKV7g; the scratch then persists across the time grid axis.
    @pl.when(pl.program_id(2) == 0)
    def _():
        state_ref[...] = jnp.zeros_like(state_ref)

    f32 = jnp.float32
    bf16 = jnp.bfloat16

    def _dot(a, b):
        return jnp.dot(a, b, preferred_element_type=f32)

    def _dot_nt(a, b):          # a @ b.T   (contract last dims, no transpose)
        return lax.dot_general(a, b, (((1,), (1,)), ((), ())),
                               preferred_element_type=f32)

    def _dot_tn(a, b):          # a.T @ b   (contract time dim 0, no transpose)
        return lax.dot_general(a, b, (((0,), (0,)), ((), ())),
                               preferred_element_type=f32)

    def chunk_body(c, carry):
        start = pl.multiple_of(c * CT, CT)
        sl = pl.ds(start, CT)
        sw = w_ref[sl, :].astype(f32)
        sq = r_ref[sl, :].astype(f32)
        sk = k_ref[sl, :].astype(f32)
        sv = v_ref[sl, :].astype(f32)
        sa = a_ref[sl, :].astype(f32)
        sb = b_ref[sl, :].astype(f32)

        # decay: w = exp(-exp(sw)), log(w) = -exp(sw); inclusive cumulative
        # sum over time via a triangular matmul (full-lane VPU/EUP work).
        neg_ew = -jnp.exp(sw)
        logp = _dot(mask_incl, neg_ew)               # log(incl_pref)
        incl = jnp.exp(logp)
        non_incl = jnp.exp(logp - neg_ew)            # incl_pref / w
        inv_incl = jnp.exp(-logp)                    # 1 / incl_pref
        fw = incl[CT - 1:CT, :]                      # (1, G*N) product of all w

        wq = sq * incl
        wa = sa * non_incl
        kwi = sk * inv_incl
        bwi = sb * inv_incl
        kwi_f = kwi * fw
        bwi_f = bwi * fw

        ys = []
        for g in range(G):                           # per-head (block-diagonal) matmuls
            cs = slice(g * N, (g + 1) * N)
            wq_g = wq[:, cs].astype(bf16)
            wa_g = wa[:, cs].astype(bf16)
            kwi_g = kwi[:, cs].astype(bf16)
            bwi_g = bwi[:, cs].astype(bf16)
            kwif_g = kwi_f[:, cs].astype(bf16)
            bwif_g = bwi_f[:, cs].astype(bf16)
            sv_g = sv[:, cs].astype(bf16)
            state = state_ref[g, :, :]               # (N_value, N_key) f32
            st_g = state.astype(bf16)

            ab = _dot_nt(wa_g, bwi_g) * mask_lower   # (CT, CT) f32
            ak = _dot_nt(wa_g, kwi_g) * mask_lower

            # (I - ab)^-1: ab is strictly lower triangular -> nilpotent, so the
            # log-depth doubling  S <- S + ab^(2^j) @ S  is exact (tri_minv).
            inv = eye + ab
            p = ab
            for _ in range(n_doublings):
                p = _dot(p, p)
                inv = inv + _dot(p, inv)

            ab_u = _dot(ak.astype(bf16), sv_g) + _dot_nt(wa_g, st_g)
            u = _dot(inv, ab_u)                      # (CT, N) f32
            u_b = u.astype(bf16)

            qk = _dot_nt(wq_g, kwi_g) * mask_incl
            qb = _dot_nt(wq_g, bwi_g) * mask_incl
            yy = (_dot(qk.astype(bf16), sv_g)
                  + _dot(qb.astype(bf16), u_b)
                  + _dot_nt(wq_g, st_g))
            ys.append(yy)

            # state update without explicit transposes (contract over time).
            state_ref[g, :, :] = (state * fw[:, cs]
                                  + _dot_tn(sv_g, kwif_g)
                                  + _dot_tn(u_b, bwif_g))

        y_ref[sl, :] = jnp.concatenate(ys, axis=-1).astype(y_ref.dtype)
        return carry

    lax.fori_loop(0, nchunks, chunk_body, 0,
                  unroll=(2 if nchunks >= 2 else 1))


def rwkv7_attention(r, w, k, v, a, b, *, head_size):
    """r, w, k, v, a, b: (B, T, H*N) float32 -> y: (B, T, H*N) bfloat16."""
    B, T, C = r.shape
    N = head_size
    H = C // N
    CT = 16  # chunk size; inv_incl = exp(-logp) stays safely bounded at 16.

    # Heads per grid step: make the kernel's channel (lane) dim a multiple of
    # 128 whenever possible, with NO transpose of the (B, T, C) inputs.
    if N % 128 == 0:
        G = 1
    elif 128 % N == 0 and H % (128 // N) == 0:
        G = 128 // N
    else:
        G = H                                   # whole-C block (full array dim)
    GN = G * N
    HG = H // G

    # Pad T to a multiple of the chunk (instead of chunk=T), then pick a
    # time-block that divides it; the time axis is a pipelined "arbitrary"
    # grid axis with the recurrent state carried in VMEM scratch across it.
    T_pad = _round_up(T, CT)
    T_blk = min(T_pad, 512)
    while T_pad % T_blk:
        T_blk -= CT
    NT = T_pad // T_blk

    def prep(x):
        x = x.astype(jnp.bfloat16)              # halve HBM DMA bytes
        if T_pad != T:
            x = jnp.pad(x, ((0, 0), (0, T_pad - T), (0, 0)))
        return x

    ins = [prep(u) for u in (r, w, k, v, a, b)]

    blk = pl.BlockSpec((None, T_blk, GN), lambda bi, hi, ti: (bi, ti, hi))
    kernel = functools.partial(_rwkv7_attn_kernel, chunk=CT, heads=G,
                               head_size=N)

    flops = 2 * B * H * (T_pad // CT) * (
        4 * CT * CT * N + 9 * CT * N * N + 12 * CT * CT * CT)
    cost = pl.CostEstimate(flops=int(flops),
                           transcendentals=int(4 * B * T_pad * C),
                           bytes_accessed=int(7 * B * T_pad * C * 2))

    y = pl.pallas_call(
        kernel,
        out_shape=jax.ShapeDtypeStruct((B, T_pad, C), jnp.bfloat16),
        grid=(B, HG, NT),
        in_specs=[blk] * 6,
        out_specs=blk,
        scratch_shapes=[pltpu.VMEM((G, N, N), jnp.float32)],
        compiler_params=pltpu.CompilerParams(
            dimension_semantics=("parallel", "parallel", "arbitrary")),
        cost_estimate=cost,
    )(*ins)
    if T_pad != T:
        y = y[:, :T, :]
    return y


# ----------------------------------------------------------------------------
# Pallas kernels: tiled bf16 matmuls (f32 accumulation) for the projections
# ----------------------------------------------------------------------------
def _matmul_kernel(x_ref, w_ref, o_ref, acc_ref):
    @pl.when(pl.program_id(2) == 0)
    def _():
        acc_ref[...] = jnp.zeros_like(acc_ref)

    acc_ref[...] += jnp.dot(x_ref[...], w_ref[...],
                            preferred_element_type=jnp.float32)

    @pl.when(pl.program_id(2) == pl.num_programs(2) - 1)
    def _():
        o_ref[...] = acc_ref[...].astype(o_ref.dtype)


def _fused_rkv_kernel(x_ref, xx_ref, cr_ref, ck_ref, cv_ref,
                      wr_ref, wk_ref, wv_ref,
                      r_ref, k_ref, v_ref,
                      accr, acck, accv):
    """(x + xx * c_i) @ W_i for i in {r, k, v} in a single pipelined pass."""
    @pl.when(pl.program_id(2) == 0)
    def _():
        accr[...] = jnp.zeros_like(accr)
        acck[...] = jnp.zeros_like(acck)
        accv[...] = jnp.zeros_like(accv)

    xb = x_ref[...].astype(jnp.float32)
    xxb = xx_ref[...].astype(jnp.float32)

    def mixdot(c_ref, w_ref):
        mixed = (xb + xxb * c_ref[...]).astype(jnp.bfloat16)
        return jnp.dot(mixed, w_ref[...], preferred_element_type=jnp.float32)

    accr[...] += mixdot(cr_ref, wr_ref)
    acck[...] += mixdot(ck_ref, wk_ref)
    accv[...] += mixdot(cv_ref, wv_ref)

    @pl.when(pl.program_id(2) == pl.num_programs(2) - 1)
    def _():
        r_ref[...] = accr[...].astype(r_ref.dtype)
        k_ref[...] = acck[...].astype(k_ref.dtype)
        v_ref[...] = accv[...].astype(v_ref.dtype)


def _pick_tile(dim, pref, mult):
    """Pick (tile, padded_dim) with tile % mult == 0 and padded_dim % tile == 0."""
    if dim <= pref:
        t = _round_up(dim, mult)
        return t, t
    padded = _round_up(dim, mult)
    t = pref
    while padded % t:
        t -= mult
    return t, padded


def pallas_matmul(x, w, *, out_dtype=jnp.float32):
    """(M, K) @ (K, N) -> (M, N): bf16 operands, f32 VMEM accumulator."""
    M, K = x.shape
    _, Nn = w.shape
    tm, Mp = _pick_tile(M, 256, 8)
    tn, Np = _pick_tile(Nn, 256, 128)
    tk, Kp = _pick_tile(K, 512, 128)   # modest tiles: fits v7x's 64 MiB VMEM too

    xb = x.astype(jnp.bfloat16)
    wb = w.astype(jnp.bfloat16)
    if (Mp, Kp) != (M, K):
        xb = jnp.pad(xb, ((0, Mp - M), (0, Kp - K)))
    if (Kp, Np) != (K, Nn):
        wb = jnp.pad(wb, ((0, Kp - K), (0, Np - Nn)))

    out = pl.pallas_call(
        _matmul_kernel,
        out_shape=jax.ShapeDtypeStruct((Mp, Np), out_dtype),
        grid=(Mp // tm, Np // tn, Kp // tk),
        in_specs=[pl.BlockSpec((tm, tk), lambda i, j, kk: (i, kk)),
                  pl.BlockSpec((tk, tn), lambda i, j, kk: (kk, j))],
        out_specs=pl.BlockSpec((tm, tn), lambda i, j, kk: (i, j)),
        scratch_shapes=[pltpu.VMEM((tm, tn), jnp.float32)],
        compiler_params=pltpu.CompilerParams(
            dimension_semantics=("parallel", "parallel", "arbitrary")),
    )(xb, wb)
    if (Mp, Np) != (M, Nn):
        out = out[:M, :Nn]
    return out


def fused_rkv_projection(x, xx, coefs, weights):
    """Fuse token-shift mix + the r/k/v CxC projections into one pallas_call.

    x, xx: (B, T, C); coefs: three (1, 1, C); weights: three (C, C).
    Returns three (B, T, C) float32 arrays.  xr/xk/xv never touch HBM.
    """
    B, T, C = x.shape
    M = B * T
    tm, Mp = _pick_tile(M, 256, 8)
    tn, Np = _pick_tile(C, 256, 128)
    tk, Kp = _pick_tile(C, 512, 128)

    xb = x.reshape(M, C).astype(jnp.bfloat16)
    xxb = xx.reshape(M, C).astype(jnp.bfloat16)
    if (Mp, Kp) != (M, C):
        xb = jnp.pad(xb, ((0, Mp - M), (0, Kp - C)))
        xxb = jnp.pad(xxb, ((0, Mp - M), (0, Kp - C)))

    cs = []
    for c in coefs:
        c2 = c.reshape(1, C).astype(jnp.float32)
        if Kp != C:
            c2 = jnp.pad(c2, ((0, 0), (0, Kp - C)))
        cs.append(c2)

    ws = []
    for w in weights:
        wb = w.astype(jnp.bfloat16)
        if (Kp, Np) != (C, C):
            wb = jnp.pad(wb, ((0, Kp - C), (0, Np - C)))
        ws.append(wb)

    x_spec = pl.BlockSpec((tm, tk), lambda i, j, kk: (i, kk))
    c_spec = pl.BlockSpec((1, tk), lambda i, j, kk: (0, kk))
    w_spec = pl.BlockSpec((tk, tn), lambda i, j, kk: (kk, j))
    o_spec = pl.BlockSpec((tm, tn), lambda i, j, kk: (i, j))

    outs = pl.pallas_call(
        _fused_rkv_kernel,
        out_shape=[jax.ShapeDtypeStruct((Mp, Np), jnp.float32)] * 3,
        grid=(Mp // tm, Np // tn, Kp // tk),
        in_specs=[x_spec, x_spec, c_spec, c_spec, c_spec,
                  w_spec, w_spec, w_spec],
        out_specs=[o_spec] * 3,
        scratch_shapes=[pltpu.VMEM((tm, tn), jnp.float32)] * 3,
        compiler_params=pltpu.CompilerParams(
            dimension_semantics=("parallel", "parallel", "arbitrary")),
    )(xb, xxb, *cs, *ws)

    return [o[:M, :C].reshape(B, T, C) for o in outs]


# ----------------------------------------------------------------------------
# Parameter init (deterministic, shapes match the PyTorch __init__)
# ----------------------------------------------------------------------------
def init_params(key, C, H, N, layer_id, n_layer):
    ratio_0_to_1 = layer_id / (n_layer - 1)
    ratio_1_to_almost0 = 1.0 - layer_id / n_layer

    D_DECAY = max(32, int(round(1.8 * C ** 0.5 / 32) * 32))
    D_AAA = max(32, int(round(1.8 * C ** 0.5 / 32) * 32))
    D_MV = max(32, int(round(1.3 * C ** 0.5 / 32) * 32))
    D_GATE = max(32, int(round(0.6 * C ** 0.8 / 32) * 32))

    ddd = (jnp.arange(C, dtype=jnp.float32) / C).reshape(1, 1, C)
    n_idx = jnp.arange(C, dtype=jnp.float32)
    decay_speed = -7.0 + 5.0 * (n_idx / (C - 1)) ** (0.85 + 1.0 * ratio_0_to_1 ** 0.5)

    keys = jax.random.split(key, 12)

    def rnd(k, shape, scale):
        return jax.random.normal(k, shape, dtype=jnp.float32) * scale

    # NOTE: linear weights stored as (in, out); forward does x @ W.
    return {
        "x_r": 1.0 - ddd ** (0.2 * ratio_1_to_almost0),
        "x_w": 1.0 - ddd ** (0.9 * ratio_1_to_almost0),
        "x_k": 1.0 - (ddd ** (0.9 * ratio_1_to_almost0) + 0.4 * ratio_0_to_1),
        "x_v": 1.0 - (ddd ** (0.4 * ratio_1_to_almost0) + 0.6 * ratio_0_to_1),
        "x_a": 1.0 - ddd ** (0.9 * ratio_1_to_almost0),
        "x_g": 1.0 - ddd ** (0.2 * ratio_1_to_almost0),
        "w0": decay_speed.reshape(1, 1, C) + 0.5,
        "w1": rnd(keys[0], (C, D_DECAY), 0.02),
        "w2": rnd(keys[1], (D_DECAY, C), 0.1),
        "a0": jnp.zeros((1, 1, C), jnp.float32),
        "a1": rnd(keys[2], (C, D_AAA), 0.02),
        "a2": rnd(keys[3], (D_AAA, C), 0.1),
        "v0": jnp.ones((1, 1, C), jnp.float32),
        "v1": rnd(keys[4], (C, D_MV), 0.02),
        "v2": rnd(keys[5], (D_MV, C), 0.1),
        "g1": rnd(keys[6], (C, D_GATE), 0.02),
        "g2": rnd(keys[7], (D_GATE, C), 0.1),
        "k_k": jnp.full((1, 1, C), 0.85, jnp.float32),
        "k_a": jnp.ones((1, 1, C), jnp.float32),
        "r_k": jnp.zeros((H, N), jnp.float32),
        "receptance_w": rnd(keys[8], (C, C), 1.0 / math.sqrt(C)),
        "key_w": rnd(keys[9], (C, C), 1.0 / math.sqrt(C)),
        "value_w": rnd(keys[10], (C, C), 1.0 / math.sqrt(C)),
        "output_w": rnd(keys[11], (C, C), 1.0 / math.sqrt(C)),
        "ln_x_w": jnp.ones((C,), jnp.float32),
        "ln_x_b": jnp.zeros((C,), jnp.float32),
        "output_offset": jnp.ones((C,), jnp.float32),
    }


# ----------------------------------------------------------------------------
# Forward pass (semantics of RWKV_Tmix_x070.forward)
# ----------------------------------------------------------------------------
def rwkv_tmix_x070_forward(params, x, v_first, attention_mask, *,
                           head_size, layer_id):
    B, T, C = x.shape
    N = head_size
    H = C // N

    # time_shift: ZeroPad2d((0,0,1,-1)) -> shift time by +1, zeros at t=0
    xx = jnp.pad(x, ((0, 0), (1, 0), (0, 0)))[:, :-1, :] - x
    xw = x + xx * params["x_w"]
    xv = x + xx * params["x_v"]
    xa = x + xx * params["x_a"]
    xg = x + xx * params["x_g"]

    # Fused token-shift mix + r/k/v projections: xr/xk/xv never hit HBM.
    r, k, v = fused_rkv_projection(
        x, xx,
        (params["x_r"], params["x_k"], params["x_v"]),
        (params["receptance_w"], params["key_w"], params["value_w"]))

    # Tiny LoRA projections stay in plain XLA (fused, no HBM round-trip worth a
    # separate custom call).
    w = -jax.nn.softplus(-(params["w0"]
                           + jnp.tanh(xw @ params["w1"]) @ params["w2"])) - 0.5

    if layer_id == 0:
        v_first = v
    else:
        v = v + (v_first - v) * jax.nn.sigmoid(
            params["v0"] + (xv @ params["v1"]) @ params["v2"])

    a = jax.nn.sigmoid(params["a0"] + (xa @ params["a1"]) @ params["a2"])
    g = jax.nn.sigmoid(xg @ params["g1"]) @ params["g2"]

    kk = k * params["k_k"]
    kk4 = kk.reshape(B, T, H, N)
    norm = jnp.sqrt(jnp.sum(kk4 * kk4, axis=-1, keepdims=True))
    kk = (kk4 / jnp.maximum(norm, 1e-12)).reshape(B, T, C)
    k = k * (1.0 + (a - 1.0) * params["k_a"])

    # RUN_CUDA_RWKV7g: mask r, k, v, a(=-kk), b(=kk*a); w is not masked.
    mask = attention_mask.reshape(B, T, 1).astype(x.dtype)
    y = rwkv7_attention(r * mask, w, k * mask, v * mask,
                        (-kk) * mask, (kk * a) * mask, head_size=N)
    y = y.astype(jnp.float32)

    # GroupNorm(H, C, eps=1e-6) over (B*T, C)
    # TODO(synk): fuse GroupNorm + r*k*r_k residual + *g gate into the attention
    # kernel's final-chunk epilogue to remove extra (B,T,C) HBM passes.
    yg = y.reshape(B * T, H, N)
    mean = jnp.mean(yg, axis=-1, keepdims=True)
    var = jnp.mean((yg - mean) ** 2, axis=-1, keepdims=True)
    yn = ((yg - mean) / jnp.sqrt(var + 1e-6)).reshape(B * T, C)
    yn = yn * params["ln_x_w"] + params["ln_x_b"]
    xo = yn.reshape(B, T, C)

    rk = jnp.sum(r.reshape(B, T, H, N) * k.reshape(B, T, H, N) * params["r_k"],
                 axis=-1, keepdims=True)
    xo = xo + (rk * v.reshape(B, T, H, N)).reshape(B, T, C)

    out = pallas_matmul((xo * g).reshape(B * T, C),
                        params["output_w"]).reshape(B, T, C)
    out = out * params["output_offset"]
    return out, v_first


# ----------------------------------------------------------------------------
if __name__ == "__main__":
    B, T = 2, 32
    C = 128           # n_embd == dim_att
    head_size = 64    # head_size_a -> H = 2 heads, packed 2 per kernel block
    H = C // head_size
    layer_id = 1
    n_layer = 4

    key = jax.random.PRNGKey(0)
    k_p, k_x, k_v = jax.random.split(key, 3)
    params = init_params(k_p, C, H, head_size, layer_id, n_layer)
    x = jax.random.normal(k_x, (B, T, C), dtype=jnp.float32) * 0.5
    v_first = jax.random.normal(k_v, (B, T, C), dtype=jnp.float32) * 0.5
    attention_mask = jnp.ones((B, T), dtype=jnp.float32)

    fwd = jax.jit(functools.partial(rwkv_tmix_x070_forward,
                                    head_size=head_size, layer_id=layer_id))
    out, v_first_out = fwd(params, x, v_first, attention_mask)
    jax.block_until_ready((out, v_first_out))
    assert out.shape == (B, T, C) and v_first_out.shape == (B, T, C)
    assert bool(jnp.all(jnp.isfinite(out)))
    print("KERNEL_OK")
</pallas_src>

<mosaic_0001>
module attributes {stable_mosaic.version = 11 : i64} {
  func.func @_fused_rkv_kernel(%arg0: i32, %arg1: i32, %arg2: i32, %arg3: memref<64x128xbf16, #tpu.memory_space<vmem>>, %arg4: memref<64x128xbf16, #tpu.memory_space<vmem>>, %arg5: memref<1x128xf32, #tpu.memory_space<vmem>>, %arg6: memref<1x128xf32, #tpu.memory_space<vmem>>, %arg7: memref<1x128xf32, #tpu.memory_space<vmem>>, %arg8: memref<128x128xbf16, #tpu.memory_space<vmem>>, %arg9: memref<128x128xbf16, #tpu.memory_space<vmem>>, %arg10: memref<128x128xbf16, #tpu.memory_space<vmem>>, %arg11: memref<64x128xf32, #tpu.memory_space<vmem>>, %arg12: memref<64x128xf32, #tpu.memory_space<vmem>>, %arg13: memref<64x128xf32, #tpu.memory_space<vmem>>, %arg14: memref<64x128xf32, #tpu.memory_space<vmem>>, %arg15: memref<64x128xf32, #tpu.memory_space<vmem>>, %arg16: memref<64x128xf32, #tpu.memory_space<vmem>>) attributes {dimension_semantics = [#tpu.dimension_semantics<parallel>, #tpu.dimension_semantics<parallel>, #tpu.dimension_semantics<arbitrary>], iteration_bounds = array<i64: 1, 1, 1>, scalar_prefetch = 0 : i64, scratch_operands = 3 : i64, tpu.core_type = #tpu.core_type<tc>, window_params = [{transform_indices = @transform_0, window_bounds = array<i64: 64, 128>}, {transform_indices = @transform_1, window_bounds = array<i64: 64, 128>}, {transform_indices = @transform_2, window_bounds = array<i64: 1, 128>}, {transform_indices = @transform_3, window_bounds = array<i64: 1, 128>}, {transform_indices = @transform_4, window_bounds = array<i64: 1, 128>}, {transform_indices = @transform_5, window_bounds = array<i64: 128, 128>}, {transform_indices = @transform_6, window_bounds = array<i64: 128, 128>}, {transform_indices = @transform_7, window_bounds = array<i64: 128, 128>}, {transform_indices = @transform_8, window_bounds = array<i64: 64, 128>}, {transform_indices = @transform_9, window_bounds = array<i64: 64, 128>}, {transform_indices = @transform_10, window_bounds = array<i64: 64, 128>}]} {
    %c0_i32 = arith.constant 0 : i32
    %0 = arith.cmpi eq, %arg2, %c0_i32 : i32
    %1 = arith.extui %0 : i1 to i32
    %c0_i32_0 = arith.constant 0 : i32
    %2 = arith.cmpi ne, %1, %c0_i32_0 : i32
    scf.if %2 {
      %cst_32 = arith.constant 0.000000e+00 : f32
      %40 = vector.broadcast %cst_32 : f32 to vector<64x128xf32>
      %c0_33 = arith.constant 0 : index
      %c0_34 = arith.constant 0 : index
      %41 = vector.load %arg14[%c0_33, %c0_34] : memref<64x128xf32, #tpu.memory_space<vmem>>, vector<64x128xf32>
      tpu.vector_store %arg14[%c0_33, %c0_34], %40 {strides = array<i32>} : memref<64x128xf32, #tpu.memory_space<vmem>>, vector<64x128xf32>,
      %cst_35 = arith.constant 0.000000e+00 : f32
      %42 = vector.broadcast %cst_35 : f32 to vector<64x128xf32>
      %c0_36 = arith.constant 0 : index
      %c0_37 = arith.constant 0 : index
      %43 = vector.load %arg15[%c0_36, %c0_37] : memref<64x128xf32, #tpu.memory_space<vmem>>, vector<64x128xf32>
      tpu.vector_store %arg15[%c0_36, %c0_37], %42 {strides = array<i32>} : memref<64x128xf32, #tpu.memory_space<vmem>>, vector<64x128xf32>,
      %cst_38 = arith.constant 0.000000e+00 : f32
      %44 = vector.broadcast %cst_38 : f32 to vector<64x128xf32>
      %c0_39 = arith.constant 0 : index
      %c0_40 = arith.constant 0 : index
      %45 = vector.load %arg16[%c0_39, %c0_40] : memref<64x128xf32, #tpu.memory_space<vmem>>, vector<64x128xf32>
      tpu.vector_store %arg16[%c0_39, %c0_40], %44 {strides = array<i32>} : memref<64x128xf32, #tpu.memory_space<vmem>>, vector<64x128xf32>,
    } else {
    }
    %c0 = arith.constant 0 : index
    %c0_1 = arith.constant 0 : index
    %3 = vector.load %arg3[%c0, %c0_1] : memref<64x128xbf16, #tpu.memory_space<vmem>>, vector<64x128xbf16>
    %4 = arith.extf %3 : vector<64x128xbf16> to vector<64x128xf32>
    %c0_2 = arith.constant 0 : index
    %c0_3 = arith.constant 0 : index
    %5 = vector.load %arg4[%c0_2, %c0_3] : memref<64x128xbf16, #tpu.memory_space<vmem>>, vector<64x128xbf16>
    %6 = arith.extf %5 : vector<64x128xbf16> to vector<64x128xf32>
    %c0_4 = arith.constant 0 : index
    %c0_5 = arith.constant 0 : index
    %7 = vector.load %arg14[%c0_4, %c0_5] : memref<64x128xf32, #tpu.memory_space<vmem>>, vector<64x128xf32>
    %c0_6 = arith.constant 0 : index
    %c0_7 = arith.constant 0 : index
    %8 = vector.load %arg5[%c0_6, %c0_7] : memref<1x128xf32, #tpu.memory_space<vmem>>, vector<1x128xf32>
    %9 = vector.broadcast %8 : vector<1x128xf32> to vector<64x128xf32>
    %10 = arith.mulf %6, %9 : vector<64x128xf32>
    %11 = arith.addf %4, %10 : vector<64x128xf32>
    %12 = arith.truncf %11 : vector<64x128xf32> to vector<64x128xbf16>
    %c0_8 = arith.constant 0 : index
    %c0_9 = arith.constant 0 : index
    %13 = vector.load %arg8[%c0_8, %c0_9] : memref<128x128xbf16, #tpu.memory_space<vmem>>, vector<128x128xbf16>
    %cst = arith.constant dense<0.000000e+00> : vector<64x128xf32>
    %14 = tpu.matmul %12, %13, %cst {dimension_numbers = #tpu.dot_dimension_numbers<[1], [0], [0], [1], [0, 0, 1, 1], [], []>} : vector<64x128xbf16>, vector<128x128xbf16>, vector<64x128xf32> -> vector<64x128xf32>
    %15 = arith.addf %7, %14 : vector<64x128xf32>
    %c0_10 = arith.constant 0 : index
    %c0_11 = arith.constant 0 : index
    %16 = vector.load %arg14[%c0_10, %c0_11] : memref<64x128xf32, #tpu.memory_space<vmem>>, vector<64x128xf32>
    tpu.vector_store %arg14[%c0_10, %c0_11], %15 {strides = array<i32>} : memref<64x128xf32, #tpu.memory_space<vmem>>, vector<64x128xf32>,
    %c0_12 = arith.constant 0 : index
    %c0_13 = arith.constant 0 : index
    %17 = vector.load %arg15[%c0_12, %c0_13] : memref<64x128xf32, #tpu.memory_space<vmem>>, vector<64x128xf32>
    %c0_14 = arith.constant 0 : index
    %c0_15 = arith.constant 0 : index
    %18 = vector.load %arg6[%c0_14, %c0_15] : memref<1x128xf32, #tpu.memory_space<vmem>>, vector<1x128xf32>
    %19 = vector.broadcast %18 : vector<1x128xf32> to vector<64x128xf32>
    %20 = arith.mulf %6, %19 : vector<64x128xf32>
    %21 = arith.addf %4, %20 : vector<64x128xf32>
    %22 = arith.truncf %21 : vector<64x128xf32> to vector<64x128xbf16>
    %c0_16 = arith.constant 0 : index
    %c0_17 = arith.constant 0 : index
    %23 = vector.load %arg9[%c0_16, %c0_17] : memref<128x128xbf16, #tpu.memory_space<vmem>>, vector<128x128xbf16>
    %cst_18 = arith.constant dense<0.000000e+00> : vector<64x128xf32>
    %24 = tpu.matmul %22, %23, %cst_18 {dimension_numbers = #tpu.dot_dimension_numbers<[1], [0], [0], [1], [0, 0, 1, 1], [], []>} : vector<64x128xbf16>, vector<128x128xbf16>, vector<64x128xf32> -> vector<64x128xf32>
    %25 = arith.addf %17, %24 : vector<64x128xf32>
    %c0_19 = arith.constant 0 : index
    %c0_20 = arith.constant 0 : index
    %26 = vector.load %arg15[%c0_19, %c0_20] : memref<64x128xf32, #tpu.memory_space<vmem>>, vector<64x128xf32>
    tpu.vector_store %arg15[%c0_19, %c0_20], %25 {strides = array<i32>} : memref<64x128xf32, #tpu.memory_space<vmem>>, vector<64x128xf32>,
    %c0_21 = arith.constant 0 : index
    %c0_22 = arith.constant 0 : index
    %27 = vector.load %arg16[%c0_21, %c0_22] : memref<64x128xf32, #tpu.memory_space<vmem>>, vector<64x128xf32>
    %c0_23 = arith.constant 0 : index
    %c0_24 = arith.constant 0 : index
    %28 = vector.load %arg7[%c0_23, %c0_24] : memref<1x128xf32, #tpu.memory_space<vmem>>, vector<1x128xf32>
    %29 = vector.broadcast %28 : vector<1x128xf32> to vector<64x128xf32>
    %30 = arith.mulf %6, %29 : vector<64x128xf32>
    %31 = arith.addf %4, %30 : vector<64x128xf32>
    %32 = arith.truncf %31 : vector<64x128xf32> to vector<64x128xbf16>
    %c0_25 = arith.constant 0 : index
    %c0_26 = arith.constant 0 : index
    %33 = vector.load %arg10[%c0_25, %c0_26] : memref<128x128xbf16, #tpu.memory_space<vmem>>, vector<128x128xbf16>
    %cst_27 = arith.constant dense<0.000000e+00> : vector<64x128xf32>
    %34 = tpu.matmul %32, %33, %cst_27 {dimension_numbers = #tpu.dot_dimension_numbers<[1], [0], [0], [1], [0, 0, 1, 1], [], []>} : vector<64x128xbf16>, vector<128x128xbf16>, vector<64x128xf32> -> vector<64x128xf32>
    %35 = arith.addf %27, %34 : vector<64x128xf32>
    %c0_28 = arith.constant 0 : index
    %c0_29 = arith.constant 0 : index
    %36 = vector.load %arg16[%c0_28, %c0_29] : memref<64x128xf32, #tpu.memory_space<vmem>>, vector<64x128xf32>
    tpu.vector_store %arg16[%c0_28, %c0_29], %35 {strides = array<i32>} : memref<64x128xf32, #tpu.memory_space<vmem>>, vector<64x128xf32>,
    %c0_i32_30 = arith.constant 0 : i32
    %37 = arith.cmpi eq, %arg2, %c0_i32_30 : i32
    %38 = arith.extui %37 : i1 to i32
    %c0_i32_31 = arith.constant 0 : i32
    %39 = arith.cmpi ne, %38, %c0_i32_31 : i32
    scf.if %39 {
      %c0_32 = arith.constant 0 : index
      %c0_33 = arith.constant 0 : index
      %40 = vector.load %arg14[%c0_32, %c0_33] : memref<64x128xf32, #tpu.memory_space<vmem>>, vector<64x128xf32>
      %c0_34 = arith.constant 0 : index
      %c0_35 = arith.constant 0 : index
      %41 = vector.load %arg11[%c0_34, %c0_35] : memref<64x128xf32, #tpu.memory_space<vmem>>, vector<64x128xf32>
      tpu.vector_store %arg11[%c0_34, %c0_35], %40 {strides = array<i32>} : memref<64x128xf32, #tpu.memory_space<vmem>>, vector<64x128xf32>,
      %c0_36 = arith.constant 0 : index
      %c0_37 = arith.constant 0 : index
      %42 = vector.load %arg15[%c0_36, %c0_37] : memref<64x128xf32, #tpu.memory_space<vmem>>, vector<64x128xf32>
      %c0_38 = arith.constant 0 : index
      %c0_39 = arith.constant 0 : index
      %43 = vector.load %arg12[%c0_38, %c0_39] : memref<64x128xf32, #tpu.memory_space<vmem>>, vector<64x128xf32>
      tpu.vector_store %arg12[%c0_38, %c0_39], %42 {strides = array<i32>} : memref<64x128xf32, #tpu.memory_space<vmem>>, vector<64x128xf32>,
      %c0_40 = arith.constant 0 : index
      %c0_41 = arith.constant 0 : index
      %44 = vector.load %arg16[%c0_40, %c0_41] : memref<64x128xf32, #tpu.memory_space<vmem>>, vector<64x128xf32>
      %c0_42 = arith.constant 0 : index
      %c0_43 = arith.constant 0 : index
      %45 = vector.load %arg13[%c0_42, %c0_43] : memref<64x128xf32, #tpu.memory_space<vmem>>, vector<64x128xf32>
      tpu.vector_store %arg13[%c0_42, %c0_43], %44 {strides = array<i32>} : memref<64x128xf32, #tpu.memory_space<vmem>>, vector<64x128xf32>,
    } else {
    }
    return
  }
  func.func @transform_0(%arg0: i32, %arg1: i32, %arg2: i32) -> (i32, i32) {
    %c0_i32 = arith.constant 0 : i32
    return %arg0, %arg2 : i32, i32
  }
  func.func @transform_1(%arg0: i32, %arg1: i32, %arg2: i32) -> (i32, i32) {
    %c0_i32 = arith.constant 0 : i32
    return %arg0, %arg2 : i32, i32
  }
  func.func @transform_2(%arg0: i32, %arg1: i32, %arg2: i32) -> (i32, i32) {
    %c0_i32 = arith.constant 0 : i32
    %c0_i32_0 = arith.constant 0 : i32
    return %c0_i32, %arg2 : i32, i32
  }
  func.func @transform_3(%arg0: i32, %arg1: i32, %arg2: i32) -> (i32, i32) {
    %c0_i32 = arith.constant 0 : i32
    %c0_i32_0 = arith.constant 0 : i32
    return %c0_i32, %arg2 : i32, i32
  }
  func.func @transform_4(%arg0: i32, %arg1: i32, %arg2: i32) -> (i32, i32) {
    %c0_i32 = arith.constant 0 : i32
    %c0_i32_0 = arith.constant 0 : i32
    return %c0_i32, %arg2 : i32, i32
  }
  func.func @transform_5(%arg0: i32, %arg1: i32, %arg2: i32) -> (i32, i32) {
    %c0_i32 = arith.constant 0 : i32
    return %arg2, %arg1 : i32, i32
  }
  func.func @transform_6(%arg0: i32, %arg1: i32, %arg2: i32) -> (i32, i32) {
    %c0_i32 = arith.constant 0 : i32
    return %arg2, %arg1 : i32, i32
  }
  func.func @transform_7(%arg0: i32, %arg1: i32, %arg2: i32) -> (i32, i32) {
    %c0_i32 = arith.constant 0 : i32
    return %arg2, %arg1 : i32, i32
  }
  func.func @transform_8(%arg0: i32, %arg1: i32, %arg2: i32) -> (i32, i32) {
    %c0_i32 = arith.constant 0 : i32
    return %arg0, %arg1 : i32, i32
  }
  func.func @transform_9(%arg0: i32, %arg1: i32, %arg2: i32) -> (i32, i32) {
    %c0_i32 = arith.constant 0 : i32
    return %arg0, %arg1 : i32, i32
  }
  func.func @transform_10(%arg0: i32, %arg1: i32, %arg2: i32) -> (i32, i32) {
    %c0_i32 = arith.constant 0 : i32
    return %arg0, %arg1 : i32, i32
  }
}

module attributes {stable_mosaic.version = 11 : i64} {
  func.func @_rwkv7_attn_kernel(%arg0: i32, %arg1: i32, %arg2: i32, %arg3: memref<1x32x128xbf16, #tpu.memory_space<vmem>>, %arg4: memref<1x32x128xbf16, #tpu.memory_space<vmem>>, %arg5: memref<1x32x128xbf16, #tpu.memory_space<vmem>>, %arg6: memref<1x32x128xbf16, #tpu.memory_space<vmem>>, %arg7: memref<1x32x128xbf16, #tpu.memory_space<vmem>>, %arg8: memref<1x32x128xbf16, #tpu.memory_space<vmem>>, %arg9: memref<1x32x128xbf16, #tpu.memory_space<vmem>>, %arg10: memref<2x64x64xf32, #tpu.memory_space<vmem>>) attributes {dimension_semantics = [#tpu.dimension_semantics<parallel>, #tpu.dimension_semantics<parallel>, #tpu.dimension_semantics<arbitrary>], iteration_bounds = array<i64: 2, 1, 1>, scalar_prefetch = 0 : i64, scratch_operands = 1 : i64, tpu.core_type = #tpu.core_type<tc>, window_params = [{transform_indices = @transform_0, window_bounds = array<i64: 1, 32, 128>}, {transform_indices = @transform_1, window_bounds = array<i64: 1, 32, 128>}, {transform_indices = @transform_2, window_bounds = array<i64: 1, 32, 128>}, {transform_indices = @transform_3, window_bounds = array<i64: 1, 32, 128>}, {transform_indices = @transform_4, window_bounds = array<i64: 1, 32, 128>}, {transform_indices = @transform_5, window_bounds = array<i64: 1, 32, 128>}, {transform_indices = @transform_6, window_bounds = array<i64: 1, 32, 128>}]} {
    %0 = tpu.iota {dimensions = array<i32: 0>} : vector<16x16xi32>
    %1 = tpu.iota {dimensions = array<i32: 1>} : vector<16x16xi32>
    %2 = arith.cmpi sgt, %0, %1 : vector<16x16xi32>
    %3 = arith.extui %2 : vector<16x16xi1> to vector<16x16xi32>
    %4 = arith.sitofp %3 : vector<16x16xi32> to vector<16x16xf32>
    %5 = arith.cmpi sge, %0, %1 : vector<16x16xi32>
    %6 = arith.extui %5 : vector<16x16xi1> to vector<16x16xi32>
    %7 = arith.sitofp %6 : vector<16x16xi32> to vector<16x16xf32>
    %8 = arith.cmpi eq, %0, %1 : vector<16x16xi32>
    %9 = arith.extui %8 : vector<16x16xi1> to vector<16x16xi32>
    %10 = arith.sitofp %9 : vector<16x16xi32> to vector<16x16xf32>
    %c0_i32 = arith.constant 0 : i32
    %11 = arith.cmpi eq, %arg2, %c0_i32 : i32
    %12 = arith.extui %11 : i1 to i32
    %c0_i32_0 = arith.constant 0 : i32
    %13 = arith.cmpi ne, %12, %c0_i32_0 : i32
    scf.if %13 {
      %cst_130 = arith.constant 0.000000e+00 : f32
      %348 = vector.broadcast %cst_130 : f32 to vector<2x64x64xf32>
      %c0_131 = arith.constant 0 : index
      %c0_132 = arith.constant 0 : index
      %c0_133 = arith.constant 0 : index
      %349 = vector.load %arg10[%c0_131, %c0_132, %c0_133] : memref<2x64x64xf32, #tpu.memory_space<vmem>>, vector<2x64x64xf32>
      tpu.vector_store %arg10[%c0_131, %c0_132, %c0_133], %348 {strides = array<i32>} : memref<2x64x64xf32, #tpu.memory_space<vmem>>, vector<2x64x64xf32>,
    } else {
    }
    %c0_i32_1 = arith.constant 0 : i32
    %c16_i32 = arith.constant 16 : i32
    %14 = arith.muli %c0_i32_1, %c16_i32 : i32
    %15 = tpu.assume_multiple %14, 16 : i32
    %c0 = arith.constant 0 : index
    %16 = arith.index_cast %15 : i32 to index
    %c0_2 = arith.constant 0 : index
    %17 = vector.load %arg4[%c0, %16, %c0_2] : memref<1x32x128xbf16, #tpu.memory_space<vmem>>, vector<1x16x128xbf16>
    %18 = vector.shape_cast %17 : vector<1x16x128xbf16> to vector<16x128xbf16>
    %19 = arith.extf %18 : vector<16x128xbf16> to vector<16x128xf32>
    %c0_3 = arith.constant 0 : index
    %20 = arith.index_cast %15 : i32 to index
    %c0_4 = arith.constant 0 : index
    %21 = vector.load %arg3[%c0_3, %20, %c0_4] : memref<1x32x128xbf16, #tpu.memory_space<vmem>>, vector<1x16x128xbf16>
    %22 = vector.shape_cast %21 : vector<1x16x128xbf16> to vector<16x128xbf16>
    %23 = arith.extf %22 : vector<16x128xbf16> to vector<16x128xf32>
    %c0_5 = arith.constant 0 : index
    %24 = arith.index_cast %15 : i32 to index
    %c0_6 = arith.constant 0 : index
    %25 = vector.load %arg5[%c0_5, %24, %c0_6] : memref<1x32x128xbf16, #tpu.memory_space<vmem>>, vector<1x16x128xbf16>
    %26 = vector.shape_cast %25 : vector<1x16x128xbf16> to vector<16x128xbf16>
    %27 = arith.extf %26 : vector<16x128xbf16> to vector<16x128xf32>
    %c0_7 = arith.constant 0 : index
    %28 = arith.index_cast %15 : i32 to index
    %c0_8 = arith.constant 0 : index
    %29 = vector.load %arg6[%c0_7, %28, %c0_8] : memref<1x32x128xbf16, #tpu.memory_space<vmem>>, vector<1x16x128xbf16>
    %30 = vector.shape_cast %29 : vector<1x16x128xbf16> to vector<16x128xbf16>
    %31 = arith.extf %30 : vector<16x128xbf16> to vector<16x128xf32>
    %c0_9 = arith.constant 0 : index
    %32 = arith.index_cast %15 : i32 to index
    %c0_10 = arith.constant 0 : index
    %33 = vector.load %arg7[%c0_9, %32, %c0_10] : memref<1x32x128xbf16, #tpu.memory_space<vmem>>, vector<1x16x128xbf16>
    %34 = vector.shape_cast %33 : vector<1x16x128xbf16> to vector<16x128xbf16>
    %35 = arith.extf %34 : vector<16x128xbf16> to vector<16x128xf32>
    %c0_11 = arith.constant 0 : index
    %36 = arith.index_cast %15 : i32 to index
    %c0_12 = arith.constant 0 : index
    %37 = vector.load %arg8[%c0_11, %36, %c0_12] : memref<1x32x128xbf16, #tpu.memory_space<vmem>>, vector<1x16x128xbf16>
    %38 = vector.shape_cast %37 : vector<1x16x128xbf16> to vector<16x128xbf16>
    %39 = arith.extf %38 : vector<16x128xbf16> to vector<16x128xf32>
    %40 = math.exp %19 : vector<16x128xf32>
    %cst = arith.constant 0.000000e+00 : f32
    %41 = vector.broadcast %cst : f32 to vector<16x128xf32>
    %42 = arith.subf %41, %40 : vector<16x128xf32>
    %cst_13 = arith.constant dense<0.000000e+00> : vector<16x128xf32>
    %43 = tpu.matmul %7, %42, %cst_13 {dimension_numbers = #tpu.dot_dimension_numbers<[1], [0], [0], [1], [0, 0, 1, 1], [], []>} : vector<16x16xf32>, vector<16x128xf32>, vector<16x128xf32> -> vector<16x128xf32>
    %44 = math.exp %43 : vector<16x128xf32>
    %45 = arith.subf %43, %42 : vector<16x128xf32>
    %46 = math.exp %45 : vector<16x128xf32>
    %cst_14 = arith.constant 0.000000e+00 : f32
    %47 = vector.broadcast %cst_14 : f32 to vector<16x128xf32>
    %48 = arith.subf %47, %43 : vector<16x128xf32>
    %49 = math.exp %48 : vector<16x128xf32>
    %50 = vector.extract_strided_slice %44 {offsets = [15, 0], sizes = [1, 128], strides = [1, 1]} : vector<16x128xf32> to vector<1x128xf32>
    %51 = arith.mulf %23, %44 : vector<16x128xf32>
    %52 = arith.mulf %35, %46 : vector<16x128xf32>
    %53 = arith.mulf %27, %49 : vector<16x128xf32>
    %54 = arith.mulf %39, %49 : vector<16x128xf32>
    %55 = vector.broadcast %50 : vector<1x128xf32> to vector<16x128xf32>
    %56 = arith.mulf %53, %55 : vector<16x128xf32>
    %57 = vector.broadcast %50 : vector<1x128xf32> to vector<16x128xf32>
    %58 = arith.mulf %54, %57 : vector<16x128xf32>
    %59 = vector.extract_strided_slice %51 {offsets = [0, 0], sizes = [16, 64], strides = [1, 1]} : vector<16x128xf32> to vector<16x64xf32>
    %60 = arith.truncf %59 : vector<16x64xf32> to vector<16x64xbf16>
    %61 = vector.extract_strided_slice %52 {offsets = [0, 0], sizes = [16, 64], strides = [1, 1]} : vector<16x128xf32> to vector<16x64xf32>
    %62 = arith.truncf %61 : vector<16x64xf32> to vector<16x64xbf16>
    %63 = vector.extract_strided_slice %53 {offsets = [0, 0], sizes = [16, 64], strides = [1, 1]} : vector<16x128xf32> to vector<16x64xf32>
    %64 = arith.truncf %63 : vector<16x64xf32> to vector<16x64xbf16>
    %65 = vector.extract_strided_slice %54 {offsets = [0, 0], sizes = [16, 64], strides = [1, 1]} : vector<16x128xf32> to vector<16x64xf32>
    %66 = arith.truncf %65 : vector<16x64xf32> to vector<16x64xbf16>
    %67 = vector.extract_strided_slice %56 {offsets = [0, 0], sizes = [16, 64], strides = [1, 1]} : vector<16x128xf32> to vector<16x64xf32>
    %68 = arith.truncf %67 : vector<16x64xf32> to vector<16x64xbf16>
    %69 = vector.extract_strided_slice %58 {offsets = [0, 0], sizes = [16, 64], strides = [1, 1]} : vector<16x128xf32> to vector<16x64xf32>
    %70 = arith.truncf %69 : vector<16x64xf32> to vector<16x64xbf16>
    %71 = vector.extract_strided_slice %31 {offsets = [0, 0], sizes = [16, 64], strides = [1, 1]} : vector<16x128xf32> to vector<16x64xf32>
    %72 = arith.truncf %71 : vector<16x64xf32> to vector<16x64xbf16>
    %c0_15 = arith.constant 0 : index
    %c0_16 = arith.constant 0 : index
    %c0_17 = arith.constant 0 : index
    %73 = vector.load %arg10[%c0_15, %c0_16, %c0_17] : memref<2x64x64xf32, #tpu.memory_space<vmem>>, vector<1x64x64xf32>
    %74 = vector.shape_cast %73 : vector<1x64x64xf32> to vector<64x64xf32>
    %75 = arith.truncf %74 : vector<64x64xf32> to vector<64x64xbf16>
    %cst_18 = arith.constant dense<0.000000e+00> : vector<16x16xf32>
    %76 = tpu.matmul %62, %66, %cst_18 {dimension_numbers = #tpu.dot_dimension_numbers<[1], [1], [0], [0], [0, 0, 1, 0], [], []>} : vector<16x64xbf16>, vector<16x64xbf16>, vector<16x16xf32> -> vector<16x16xf32>
    %77 = arith.mulf %76, %4 : vector<16x16xf32>
    %cst_19 = arith.constant dense<0.000000e+00> : vector<16x16xf32>
    %78 = tpu.matmul %62, %64, %cst_19 {dimension_numbers = #tpu.dot_dimension_numbers<[1], [1], [0], [0], [0, 0, 1, 0], [], []>} : vector<16x64xbf16>, vector<16x64xbf16>, vector<16x16xf32> -> vector<16x16xf32>
    %79 = arith.mulf %78, %4 : vector<16x16xf32>
    %80 = arith.addf %10, %77 : vector<16x16xf32>
    %cst_20 = arith.constant dense<0.000000e+00> : vector<16x16xf32>
    %81 = tpu.matmul %77, %77, %cst_20 {dimension_numbers = #tpu.dot_dimension_numbers<[1], [0], [0], [1], [0, 0, 1, 1], [], []>} : vector<16x16xf32>, vector<16x16xf32>, vector<16x16xf32> -> vector<16x16xf32>
    %cst_21 = arith.constant dense<0.000000e+00> : vector<16x16xf32>
    %82 = tpu.matmul %81, %80, %cst_21 {dimension_numbers = #tpu.dot_dimension_numbers<[1], [0], [0], [1], [0, 0, 1, 1], [], []>} : vector<16x16xf32>, vector<16x16xf32>, vector<16x16xf32> -> vector<16x16xf32>
    %83 = arith.addf %80, %82 : vector<16x16xf32>
    %cst_22 = arith.constant dense<0.000000e+00> : vector<16x16xf32>
    %84 = tpu.matmul %81, %81, %cst_22 {dimension_numbers = #tpu.dot_dimension_numbers<[1], [0], [0], [1], [0, 0, 1, 1], [], []>} : vector<16x16xf32>, vector<16x16xf32>, vector<16x16xf32> -> vector<16x16xf32>
    %cst_23 = arith.constant dense<0.000000e+00> : vector<16x16xf32>
    %85 = tpu.matmul %84, %83, %cst_23 {dimension_numbers = #tpu.dot_dimension_numbers<[1], [0], [0], [1], [0, 0, 1, 1], [], []>} : vector<16x16xf32>, vector<16x16xf32>, vector<16x16xf32> -> vector<16x16xf32>
    %86 = arith.addf %83, %85 : vector<16x16xf32>
    %cst_24 = arith.constant dense<0.000000e+00> : vector<16x16xf32>
    %87 = tpu.matmul %84, %84, %cst_24 {dimension_numbers = #tpu.dot_dimension_numbers<[1], [0], [0], [1], [0, 0, 1, 1], [], []>} : vector<16x16xf32>, vector<16x16xf32>, vector<16x16xf32> -> vector<16x16xf32>
    %cst_25 = arith.constant dense<0.000000e+00> : vector<16x16xf32>
    %88 = tpu.matmul %87, %86, %cst_25 {dimension_numbers = #tpu.dot_dimension_numbers<[1], [0], [0], [1], [0, 0, 1, 1], [], []>} : vector<16x16xf32>, vector<16x16xf32>, vector<16x16xf32> -> vector<16x16xf32>
    %89 = arith.addf %86, %88 : vector<16x16xf32>
    %90 = arith.truncf %79 : vector<16x16xf32> to vector<16x16xbf16>
    %cst_26 = arith.constant dense<0.000000e+00> : vector<16x64xf32>
    %91 = tpu.matmul %90, %72, %cst_26 {dimension_numbers = #tpu.dot_dimension_numbers<[1], [0], [0], [1], [0, 0, 1, 1], [], []>} : vector<16x16xbf16>, vector<16x64xbf16>, vector<16x64xf32> -> vector<16x64xf32>
    %cst_27 = arith.constant dense<0.000000e+00> : vector<16x64xf32>
    %92 = tpu.matmul %62, %75, %cst_27 {dimension_numbers = #tpu.dot_dimension_numbers<[1], [1], [0], [0], [0, 0, 1, 0], [], []>} : vector<16x64xbf16>, vector<64x64xbf16>, vector<16x64xf32> -> vector<16x64xf32>
    %93 = arith.addf %91, %92 : vector<16x64xf32>
    %cst_28 = arith.constant dense<0.000000e+00> : vector<16x64xf32>
    %94 = tpu.matmul %89, %93, %cst_28 {dimension_numbers = #tpu.dot_dimension_numbers<[1], [0], [0], [1], [0, 0, 1, 1], [], []>} : vector<16x16xf32>, vector<16x64xf32>, vector<16x64xf32> -> vector<16x64xf32>
    %95 = arith.truncf %94 : vector<16x64xf32> to vector<16x64xbf16>
    %cst_29 = arith.constant dense<0.000000e+00> : vector<16x16xf32>
    %96 = tpu.matmul %60, %64, %cst_29 {dimension_numbers = #tpu.dot_dimension_numbers<[1], [1], [0], [0], [0, 0, 1, 0], [], []>} : vector<16x64xbf16>, vector<16x64xbf16>, vector<16x16xf32> -> vector<16x16xf32>
    %97 = arith.mulf %96, %7 : vector<16x16xf32>
    %cst_30 = arith.constant dense<0.000000e+00> : vector<16x16xf32>
    %98 = tpu.matmul %60, %66, %cst_30 {dimension_numbers = #tpu.dot_dimension_numbers<[1], [1], [0], [0], [0, 0, 1, 0], [], []>} : vector<16x64xbf16>, vector<16x64xbf16>, vector<16x16xf32> -> vector<16x16xf32>
    %99 = arith.mulf %98, %7 : vector<16x16xf32>
    %100 = arith.truncf %97 : vector<16x16xf32> to vector<16x16xbf16>
    %cst_31 = arith.constant dense<0.000000e+00> : vector<16x64xf32>
    %101 = tpu.matmul %100, %72, %cst_31 {dimension_numbers = #tpu.dot_dimension_numbers<[1], [0], [0], [1], [0, 0, 1, 1], [], []>} : vector<16x16xbf16>, vector<16x64xbf16>, vector<16x64xf32> -> vector<16x64xf32>
    %102 = arith.truncf %99 : vector<16x16xf32> to vector<16x16xbf16>
    %cst_32 = arith.constant dense<0.000000e+00> : vector<16x64xf32>
    %103 = tpu.matmul %102, %95, %cst_32 {dimension_numbers = #tpu.dot_dimension_numbers<[1], [0], [0], [1], [0, 0, 1, 1], [], []>} : vector<16x16xbf16>, vector<16x64xbf16>, vector<16x64xf32> -> vector<16x64xf32>
    %104 = arith.addf %101, %103 : vector<16x64xf32>
    %cst_33 = arith.constant dense<0.000000e+00> : vector<16x64xf32>
    %105 = tpu.matmul %60, %75, %cst_33 {dimension_numbers = #tpu.dot_dimension_numbers<[1], [1], [0], [0], [0, 0, 1, 0], [], []>} : vector<16x64xbf16>, vector<64x64xbf16>, vector<16x64xf32> -> vector<16x64xf32>
    %106 = arith.addf %104, %105 : vector<16x64xf32>
    %107 = vector.extract_strided_slice %50 {offsets = [0, 0], sizes = [1, 64], strides = [1, 1]} : vector<1x128xf32> to vector<1x64xf32>
    %108 = vector.broadcast %107 : vector<1x64xf32> to vector<64x64xf32>
    %109 = arith.mulf %74, %108 : vector<64x64xf32>
    %cst_34 = arith.constant dense<0.000000e+00> : vector<64x64xf32>
    %110 = tpu.matmul %72, %68, %cst_34 {dimension_numbers = #tpu.dot_dimension_numbers<[0], [0], [1], [1], [0, 1, 1, 1], [], []>} : vector<16x64xbf16>, vector<16x64xbf16>, vector<64x64xf32> -> vector<64x64xf32>
    %111 = arith.addf %109, %110 : vector<64x64xf32>
    %cst_35 = arith.constant dense<0.000000e+00> : vector<64x64xf32>
    %112 = tpu.matmul %95, %70, %cst_35 {dimension_numbers = #tpu.dot_dimension_numbers<[0], [0], [1], [1], [0, 1, 1, 1], [], []>} : vector<16x64xbf16>, vector<16x64xbf16>, vector<64x64xf32> -> vector<64x64xf32>
    %113 = arith.addf %111, %112 : vector<64x64xf32>
    %c0_36 = arith.constant 0 : index
    %c0_37 = arith.constant 0 : index
    %c0_38 = arith.constant 0 : index
    %114 = vector.load %arg10[%c0_36, %c0_37, %c0_38] : memref<2x64x64xf32, #tpu.memory_space<vmem>>, vector<1x64x64xf32>
    %115 = vector.shape_cast %114 : vector<1x64x64xf32> to vector<64x64xf32>
    %116 = vector.shape_cast %113 : vector<64x64xf32> to vector<1x64x64xf32>
    tpu.vector_store %arg10[%c0_36, %c0_37, %c0_38], %116 {strides = array<i32>} : memref<2x64x64xf32, #tpu.memory_space<vmem>>, vector<1x64x64xf32>,
    %117 = vector.extract_strided_slice %51 {offsets = [0, 64], sizes = [16, 64], strides = [1, 1]} : vector<16x128xf32> to vector<16x64xf32>
    %118 = arith.truncf %117 : vector<16x64xf32> to vector<16x64xbf16>
    %119 = vector.extract_strided_slice %52 {offsets = [0, 64], sizes = [16, 64], strides = [1, 1]} : vector<16x128xf32> to vector<16x64xf32>
    %120 = arith.truncf %119 : vector<16x64xf32> to vector<16x64xbf16>
    %121 = vector.extract_strided_slice %53 {offsets = [0, 64], sizes = [16, 64], strides = [1, 1]} : vector<16x128xf32> to vector<16x64xf32>
    %122 = arith.truncf %121 : vector<16x64xf32> to vector<16x64xbf16>
    %123 = vector.extract_strided_slice %54 {offsets = [0, 64], sizes = [16, 64], strides = [1, 1]} : vector<16x128xf32> to vector<16x64xf32>
    %124 = arith.truncf %123 : vector<16x64xf32> to vector<16x64xbf16>
    %125 = vector.extract_strided_slice %56 {offsets = [0, 64], sizes = [16, 64], strides = [1, 1]} : vector<16x128xf32> to vector<16x64xf32>
    %126 = arith.truncf %125 : vector<16x64xf32> to vector<16x64xbf16>
    %127 = vector.extract_strided_slice %58 {offsets = [0, 64], sizes = [16, 64], strides = [1, 1]} : vector<16x128xf32> to vector<16x64xf32>
    %128 = arith.truncf %127 : vector<16x64xf32> to vector<16x64xbf16>
    %129 = vector.extract_strided_slice %31 {offsets = [0, 64], sizes = [16, 64], strides = [1, 1]} : vector<16x128xf32> to vector<16x64xf32>
    %130 = arith.truncf %129 : vector<16x64xf32> to vector<16x64xbf16>
    %c1 = arith.constant 1 : index
    %c0_39 = arith.constant 0 : index
    %c0_40 = arith.constant 0 : index
    %131 = vector.load %arg10[%c1, %c0_39, %c0_40] : memref<2x64x64xf32, #tpu.memory_space<vmem>>, vector<1x64x64xf32>
    %132 = vector.shape_cast %131 : vector<1x64x64xf32> to vector<64x64xf32>
    %133 = arith.truncf %132 : vector<64x64xf32> to vector<64x64xbf16>
    %cst_41 = arith.constant dense<0.000000e+00> : vector<16x16xf32>
    %134 = tpu.matmul %120, %124, %cst_41 {dimension_numbers = #tpu.dot_dimension_numbers<[1], [1], [0], [0], [0, 0, 1, 0], [], []>} : vector<16x64xbf16>, vector<16x64xbf16>, vector<16x16xf32> -> vector<16x16xf32>
    %135 = arith.mulf %134, %4 : vector<16x16xf32>
    %cst_42 = arith.constant dense<0.000000e+00> : vector<16x16xf32>
    %136 = tpu.matmul %120, %122, %cst_42 {dimension_numbers = #tpu.dot_dimension_numbers<[1], [1], [0], [0], [0, 0, 1, 0], [], []>} : vector<16x64xbf16>, vector<16x64xbf16>, vector<16x16xf32> -> vector<16x16xf32>
    %137 = arith.mulf %136, %4 : vector<16x16xf32>
    %138 = arith.addf %10, %135 : vector<16x16xf32>
    %cst_43 = arith.constant dense<0.000000e+00> : vector<16x16xf32>
    %139 = tpu.matmul %135, %135, %cst_43 {dimension_numbers = #tpu.dot_dimension_numbers<[1], [0], [0], [1], [0, 0, 1, 1], [], []>} : vector<16x16xf32>, vector<16x16xf32>, vector<16x16xf32> -> vector<16x16xf32>
    %cst_44 = arith.constant dense<0.000000e+00> : vector<16x16xf32>
    %140 = tpu.matmul %139, %138, %cst_44 {dimension_numbers = #tpu.dot_dimension_numbers<[1], [0], [0], [1], [0, 0, 1, 1], [], []>} : vector<16x16xf32>, vector<16x16xf32>, vector<16x16xf32> -> vector<16x16xf32>
    %141 = arith.addf %138, %140 : vector<16x16xf32>
    %cst_45 = arith.constant dense<0.000000e+00> : vector<16x16xf32>
    %142 = tpu.matmul %139, %139, %cst_45 {dimension_numbers = #tpu.dot_dimension_numbers<[1], [0], [0], [1], [0, 0, 1, 1], [], []>} : vector<16x16xf32>, vector<16x16xf32>, vector<16x16xf32> -> vector<16x16xf32>
    %cst_46 = arith.constant dense<0.000000e+00> : vector<16x16xf32>
    %143 = tpu.matmul %142, %141, %cst_46 {dimension_numbers = #tpu.dot_dimension_numbers<[1], [0], [0], [1], [0, 0, 1, 1], [], []>} : vector<16x16xf32>, vector<16x16xf32>, vector<16x16xf32> -> vector<16x16xf32>
    %144 = arith.addf %141, %143 : vector<16x16xf32>
    %cst_47 = arith.constant dense<0.000000e+00> : vector<16x16xf32>
    %145 = tpu.matmul %142, %142, %cst_47 {dimension_numbers = #tpu.dot_dimension_numbers<[1], [0], [0], [1], [0, 0, 1, 1], [], []>} : vector<16x16xf32>, vector<16x16xf32>, vector<16x16xf32> -> vector<16x16xf32>
    %cst_48 = arith.constant dense<0.000000e+00> : vector<16x16xf32>
    %146 = tpu.matmul %145, %144, %cst_48 {dimension_numbers = #tpu.dot_dimension_numbers<[1], [0], [0], [1], [0, 0, 1, 1], [], []>} : vector<16x16xf32>, vector<16x16xf32>, vector<16x16xf32> -> vector<16x16xf32>
    %147 = arith.addf %144, %146 : vector<16x16xf32>
    %148 = arith.truncf %137 : vector<16x16xf32> to vector<16x16xbf16>
    %cst_49 = arith.constant dense<0.000000e+00> : vector<16x64xf32>
    %149 = tpu.matmul %148, %130, %cst_49 {dimension_numbers = #tpu.dot_dimension_numbers<[1], [0], [0], [1], [0, 0, 1, 1], [], []>} : vector<16x16xbf16>, vector<16x64xbf16>, vector<16x64xf32> -> vector<16x64xf32>
    %cst_50 = arith.constant dense<0.000000e+00> : vector<16x64xf32>
    %150 = tpu.matmul %120, %133, %cst_50 {dimension_numbers = #tpu.dot_dimension_numbers<[1], [1], [0], [0], [0, 0, 1, 0], [], []>} : vector<16x64xbf16>, vector<64x64xbf16>, vector<16x64xf32> -> vector<16x64xf32>
    %151 = arith.addf %149, %150 : vector<16x64xf32>
    %cst_51 = arith.constant dense<0.000000e+00> : vector<16x64xf32>
    %152 = tpu.matmul %147, %151, %cst_51 {dimension_numbers = #tpu.dot_dimension_numbers<[1], [0], [0], [1], [0, 0, 1, 1], [], []>} : vector<16x16xf32>, vector<16x64xf32>, vector<16x64xf32> -> vector<16x64xf32>
    %153 = arith.truncf %152 : vector<16x64xf32> to vector<16x64xbf16>
    %cst_52 = arith.constant dense<0.000000e+00> : vector<16x16xf32>
    %154 = tpu.matmul %118, %122, %cst_52 {dimension_numbers = #tpu.dot_dimension_numbers<[1], [1], [0], [0], [0, 0, 1, 0], [], []>} : vector<16x64xbf16>, vector<16x64xbf16>, vector<16x16xf32> -> vector<16x16xf32>
    %155 = arith.mulf %154, %7 : vector<16x16xf32>
    %cst_53 = arith.constant dense<0.000000e+00> : vector<16x16xf32>
    %156 = tpu.matmul %118, %124, %cst_53 {dimension_numbers = #tpu.dot_dimension_numbers<[1], [1], [0], [0], [0, 0, 1, 0], [], []>} : vector<16x64xbf16>, vector<16x64xbf16>, vector<16x16xf32> -> vector<16x16xf32>
    %157 = arith.mulf %156, %7 : vector<16x16xf32>
    %158 = arith.truncf %155 : vector<16x16xf32> to vector<16x16xbf16>
    %cst_54 = arith.constant dense<0.000000e+00> : vector<16x64xf32>
    %159 = tpu.matmul %158, %130, %cst_54 {dimension_numbers = #tpu.dot_dimension_numbers<[1], [0], [0], [1], [0, 0, 1, 1], [], []>} : vector<16x16xbf16>, vector<16x64xbf16>, vector<16x64xf32> -> vector<16x64xf32>
    %160 = arith.truncf %157 : vector<16x16xf32> to vector<16x16xbf16>
    %cst_55 = arith.constant dense<0.000000e+00> : vector<16x64xf32>
    %161 = tpu.matmul %160, %153, %cst_55 {dimension_numbers = #tpu.dot_dimension_numbers<[1], [0], [0], [1], [0, 0, 1, 1], [], []>} : vector<16x16xbf16>, vector<16x64xbf16>, vector<16x64xf32> -> vector<16x64xf32>
    %162 = arith.addf %159, %161 : vector<16x64xf32>
    %cst_56 = arith.constant dense<0.000000e+00> : vector<16x64xf32>
    %163 = tpu.matmul %118, %133, %cst_56 {dimension_numbers = #tpu.dot_dimension_numbers<[1], [1], [0], [0], [0, 0, 1, 0], [], []>} : vector<16x64xbf16>, vector<64x64xbf16>, vector<16x64xf32> -> vector<16x64xf32>
    %164 = arith.addf %162, %163 : vector<16x64xf32>
    %165 = vector.extract_strided_slice %50 {offsets = [0, 64], sizes = [1, 64], strides = [1, 1]} : vector<1x128xf32> to vector<1x64xf32>
    %166 = vector.broadcast %165 : vector<1x64xf32> to vector<64x64xf32>
    %167 = arith.mulf %132, %166 : vector<64x64xf32>
    %cst_57 = arith.constant dense<0.000000e+00> : vector<64x64xf32>
    %168 = tpu.matmul %130, %126, %cst_57 {dimension_numbers = #tpu.dot_dimension_numbers<[0], [0], [1], [1], [0, 1, 1, 1], [], []>} : vector<16x64xbf16>, vector<16x64xbf16>, vector<64x64xf32> -> vector<64x64xf32>
    %169 = arith.addf %167, %168 : vector<64x64xf32>
    %cst_58 = arith.constant dense<0.000000e+00> : vector<64x64xf32>
    %170 = tpu.matmul %153, %128, %cst_58 {dimension_numbers = #tpu.dot_dimension_numbers<[0], [0], [1], [1], [0, 1, 1, 1], [], []>} : vector<16x64xbf16>, vector<16x64xbf16>, vector<64x64xf32> -> vector<64x64xf32>
    %171 = arith.addf %169, %170 : vector<64x64xf32>
    %c1_59 = arith.constant 1 : index
    %c0_60 = arith.constant 0 : index
    %c0_61 = arith.constant 0 : index
    %172 = vector.load %arg10[%c1_59, %c0_60, %c0_61] : memref<2x64x64xf32, #tpu.memory_space<vmem>>, vector<1x64x64xf32>
    %173 = vector.shape_cast %172 : vector<1x64x64xf32> to vector<64x64xf32>
    %174 = vector.shape_cast %171 : vector<64x64xf32> to vector<1x64x64xf32>
    tpu.vector_store %arg10[%c1_59, %c0_60, %c0_61], %174 {strides = array<i32>} : memref<2x64x64xf32, #tpu.memory_space<vmem>>, vector<1x64x64xf32>,
    %175 = tpu.concatenate %106, %164 in 1 : vector<16x64xf32>, vector<16x64xf32> -> vector<16x128xf32>
    %176 = arith.truncf %175 : vector<16x128xf32> to vector<16x128xbf16>
    %c0_62 = arith.constant 0 : index
    %177 = arith.index_cast %15 : i32 to index
    %c0_63 = arith.constant 0 : index
    %178 = vector.load %arg9[%c0_62, %177, %c0_63] : memref<1x32x128xbf16, #tpu.memory_space<vmem>>, vector<1x16x128xbf16>
    %179 = vector.shape_cast %178 : vector<1x16x128xbf16> to vector<16x128xbf16>
    %180 = vector.shape_cast %176 : vector<16x128xbf16> to vector<1x16x128xbf16>
    tpu.vector_store %arg9[%c0_62, %177, %c0_63], %180 {strides = array<i32>} : memref<1x32x128xbf16, #tpu.memory_space<vmem>>, vector<1x16x128xbf16>,
    %c1_i32 = arith.constant 1 : i32
    %c16_i32_64 = arith.constant 16 : i32
    %181 = arith.muli %c1_i32, %c16_i32_64 : i32
    %182 = tpu.assume_multiple %181, 16 : i32
    %c0_65 = arith.constant 0 : index
    %183 = arith.index_cast %182 : i32 to index
    %c0_66 = arith.constant 0 : index
    %184 = vector.load %arg4[%c0_65, %183, %c0_66] : memref<1x32x128xbf16, #tpu.memory_space<vmem>>, vector<1x16x128xbf16>
    %185 = vector.shape_cast %184 : vector<1x16x128xbf16> to vector<16x128xbf16>
    %186 = arith.extf %185 : vector<16x128xbf16> to vector<16x128xf32>
    %c0_67 = arith.constant 0 : index
    %187 = arith.index_cast %182 : i32 to index
    %c0_68 = arith.constant 0 : index
    %188 = vector.load %arg3[%c0_67, %187, %c0_68] : memref<1x32x128xbf16, #tpu.memory_space<vmem>>, vector<1x16x128xbf16>
    %189 = vector.shape_cast %188 : vector<1x16x128xbf16> to vector<16x128xbf16>
    %190 = arith.extf %189 : vector<16x128xbf16> to vector<16x128xf32>
    %c0_69 = arith.constant 0 : index
    %191 = arith.index_cast %182 : i32 to index
    %c0_70 = arith.constant 0 : index
    %192 = vector.load %arg5[%c0_69, %191, %c0_70] : memref<1x32x128xbf16, #tpu.memory_space<vmem>>, vector<1x16x128xbf16>
    %193 = vector.shape_cast %192 : vector<1x16x128xbf16> to vector<16x128xbf16>
    %194 = arith.extf %193 : vector<16x128xbf16> to vector<16x128xf32>
    %c0_71 = arith.constant 0 : index
    %195 = arith.index_cast %182 : i32 to index
    %c0_72 = arith.constant 0 : index
    %196 = vector.load %arg6[%c0_71, %195, %c0_72] : memref<1x32x128xbf16, #tpu.memory_space<vmem>>, vector<1x16x128xbf16>
    %197 = vector.shape_cast %196 : vector<1x16x128xbf16> to vector<16x128xbf16>
    %198 = arith.extf %197 : vector<16x128xbf16> to vector<16x128xf32>
    %c0_73 = arith.constant 0 : index
    %199 = arith.index_cast %182 : i32 to index
    %c0_74 = arith.constant 0 : index
    %200 = vector.load %arg7[%c0_73, %199, %c0_74] : memref<1x32x128xbf16, #tpu.memory_space<vmem>>, vector<1x16x128xbf16>
    %201 = vector.shape_cast %200 : vector<1x16x128xbf16> to vector<16x128xbf16>
    %202 = arith.extf %201 : vector<16x128xbf16> to vector<16x128xf32>
    %c0_75 = arith.constant 0 : index
    %203 = arith.index_cast %182 : i32 to index
    %c0_76 = arith.constant 0 : index
    %204 = vector.load %arg8[%c0_75, %203, %c0_76] : memref<1x32x128xbf16, #tpu.memory_space<vmem>>, vector<1x16x128xbf16>
    %205 = vector.shape_cast %204 : vector<1x16x128xbf16> to vector<16x128xbf16>
    %206 = arith.extf %205 : vector<16x128xbf16> to vector<16x128xf32>
    %207 = math.exp %186 : vector<16x128xf32>
    %cst_77 = arith.constant 0.000000e+00 : f32
    %208 = vector.broadcast %cst_77 : f32 to vector<16x128xf32>
    %209 = arith.subf %208, %207 : vector<16x128xf32>
    %cst_78 = arith.constant dense<0.000000e+00> : vector<16x128xf32>
    %210 = tpu.matmul %7, %209, %cst_78 {dimension_numbers = #tpu.dot_dimension_numbers<[1], [0], [0], [1], [0, 0, 1, 1], [], []>} : vector<16x16xf32>, vector<16x128xf32>, vector<16x128xf32> -> vector<16x128xf32>
    %211 = math.exp %210 : vector<16x128xf32>
    %212 = arith.subf %210, %209 : vector<16x128xf32>
    %213 = math.exp %212 : vector<16x128xf32>
    %cst_79 = arith.constant 0.000000e+00 : f32
    %214 = vector.broadcast %cst_79 : f32 to vector<16x128xf32>
    %215 = arith.subf %214, %210 : vector<16x128xf32>
    %216 = math.exp %215 : vector<16x128xf32>
    %217 = vector.extract_strided_slice %211 {offsets = [15, 0], sizes = [1, 128], strides = [1, 1]} : vector<16x128xf32> to vector<1x128xf32>
    %218 = arith.mulf %190, %211 : vector<16x128xf32>
    %219 = arith.mulf %202, %213 : vector<16x128xf32>
    %220 = arith.mulf %194, %216 : vector<16x128xf32>
    %221 = arith.mulf %206, %216 : vector<16x128xf32>
    %222 = vector.broadcast %217 : vector<1x128xf32> to vector<16x128xf32>
    %223 = arith.mulf %220, %222 : vector<16x128xf32>
    %224 = vector.broadcast %217 : vector<1x128xf32> to vector<16x128xf32>
    %225 = arith.mulf %221, %224 : vector<16x128xf32>
    %226 = vector.extract_strided_slice %218 {offsets = [0, 0], sizes = [16, 64], strides = [1, 1]} : vector<16x128xf32> to vector<16x64xf32>
    %227 = arith.truncf %226 : vector<16x64xf32> to vector<16x64xbf16>
    %228 = vector.extract_strided_slice %219 {offsets = [0, 0], sizes = [16, 64], strides = [1, 1]} : vector<16x128xf32> to vector<16x64xf32>
    %229 = arith.truncf %228 : vector<16x64xf32> to vector<16x64xbf16>
    %230 = vector.extract_strided_slice %220 {offsets = [0, 0], sizes = [16, 64], strides = [1, 1]} : vector<16x128xf32> to vector<16x64xf32>
    %231 = arith.truncf %230 : vector<16x64xf32> to vector<16x64xbf16>
    %232 = vector.extract_strided_slice %221 {offsets = [0, 0], sizes = [16, 64], strides = [1, 1]} : vector<16x128xf32> to vector<16x64xf32>
    %233 = arith.truncf %232 : vector<16x64xf32> to vector<16x64xbf16>
    %234 = vector.extract_strided_slice %223 {offsets = [0, 0], sizes = [16, 64], strides = [1, 1]} : vector<16x128xf32> to vector<16x64xf32>
    %235 = arith.truncf %234 : vector<16x64xf32> to vector<16x64xbf16>
    %236 = vector.extract_strided_slice %225 {offsets = [0, 0], sizes = [16, 64], strides = [1, 1]} : vector<16x128xf32> to vector<16x64xf32>
    %237 = arith.truncf %236 : vector<16x64xf32> to vector<16x64xbf16>
    %238 = vector.extract_strided_slice %198 {offsets = [0, 0], sizes = [16, 64], strides = [1, 1]} : vector<16x128xf32> to vector<16x64xf32>
    %239 = arith.truncf %238 : vector<16x64xf32> to vector<16x64xbf16>
    %c0_80 = arith.constant 0 : index
    %c0_81 = arith.constant 0 : index
    %c0_82 = arith.constant 0 : index
    %240 = vector.load %arg10[%c0_80, %c0_81, %c0_82] : memref<2x64x64xf32, #tpu.memory_space<vmem>>, vector<1x64x64xf32>
    %241 = vector.shape_cast %240 : vector<1x64x64xf32> to vector<64x64xf32>
    %242 = arith.truncf %241 : vector<64x64xf32> to vector<64x64xbf16>
    %cst_83 = arith.constant dense<0.000000e+00> : vector<16x16xf32>
    %243 = tpu.matmul %229, %233, %cst_83 {dimension_numbers = #tpu.dot_dimension_numbers<[1], [1], [0], [0], [0, 0, 1, 0], [], []>} : vector<16x64xbf16>, vector<16x64xbf16>, vector<16x16xf32> -> vector<16x16xf32>
    %244 = arith.mulf %243, %4 : vector<16x16xf32>
    %cst_84 = arith.constant dense<0.000000e+00> : vector<16x16xf32>
    %245 = tpu.matmul %229, %231, %cst_84 {dimension_numbers = #tpu.dot_dimension_numbers<[1], [1], [0], [0], [0, 0, 1, 0], [], []>} : vector<16x64xbf16>, vector<16x64xbf16>, vector<16x16xf32> -> vector<16x16xf32>
    %246 = arith.mulf %245, %4 : vector<16x16xf32>
    %247 = arith.addf %10, %244 : vector<16x16xf32>
    %cst_85 = arith.constant dense<0.000000e+00> : vector<16x16xf32>
    %248 = tpu.matmul %244, %244, %cst_85 {dimension_numbers = #tpu.dot_dimension_numbers<[1], [0], [0], [1], [0, 0, 1, 1], [], []>} : vector<16x16xf32>, vector<16x16xf32>, vector<16x16xf32> -> vector<16x16xf32>
    %cst_86 = arith.constant dense<0.000000e+00> : vector<16x16xf32>
    %249 = tpu.matmul %248, %247, %cst_86 {dimension_numbers = #tpu.dot_dimension_numbers<[1], [0], [0], [1], [0, 0, 1, 1], [], []>} : vector<16x16xf32>, vector<16x16xf32>, vector<16x16xf32> -> vector<16x16xf32>
    %250 = arith.addf %247, %249 : vector<16x16xf32>
    %cst_87 = arith.constant dense<0.000000e+00> : vector<16x16xf32>
    %251 = tpu.matmul %248, %248, %cst_87 {dimension_numbers = #tpu.dot_dimension_numbers<[1], [0], [0], [1], [0, 0, 1, 1], [], []>} : vector<16x16xf32>, vector<16x16xf32>, vector<16x16xf32> -> vector<16x16xf32>
    %cst_88 = arith.constant dense<0.000000e+00> : vector<16x16xf32>
    %252 = tpu.matmul %251, %250, %cst_88 {dimension_numbers = #tpu.dot_dimension_numbers<[1], [0], [0], [1], [0, 0, 1, 1], [], []>} : vector<16x16xf32>, vector<16x16xf32>, vector<16x16xf32> -> vector<16x16xf32>
    %253 = arith.addf %250, %252 : vector<16x16xf32>
    %cst_89 = arith.constant dense<0.000000e+00> : vector<16x16xf32>
    %254 = tpu.matmul %251, %251, %cst_89 {dimension_numbers = #tpu.dot_dimension_numbers<[1], [0], [0], [1], [0, 0, 1, 1], [], []>} : vector<16x16xf32>, vector<16x16xf32>, vector<16x16xf32> -> vector<16x16xf32>
    %cst_90 = arith.constant dense<0.000000e+00> : vector<16x16xf32>
    %255 = tpu.matmul %254, %253, %cst_90 {dimension_numbers = #tpu.dot_dimension_numbers<[1], [0], [0], [1], [0, 0, 1, 1], [], []>} : vector<16x16xf32>, vector<16x16xf32>, vector<16x16xf32> -> vector<16x16xf32>
    %256 = arith.addf %253, %255 : vector<16x16xf32>
    %257 = arith.truncf %246 : vector<16x16xf32> to vector<16x16xbf16>
    %cst_91 = arith.constant dense<0.000000e+00> : vector<16x64xf32>
    %258 = tpu.matmul %257, %239, %cst_91 {dimension_numbers = #tpu.dot_dimension_numbers<[1], [0], [0], [1], [0, 0, 1, 1], [], []>} : vector<16x16xbf16>, vector<16x64xbf16>, vector<16x64xf32> -> vector<16x64xf32>
    %cst_92 = arith.constant dense<0.000000e+00> : vector<16x64xf32>
    %259 = tpu.matmul %229, %242, %cst_92 {dimension_numbers = #tpu.dot_dimension_numbers<[1], [1], [0], [0], [0, 0, 1, 0], [], []>} : vector<16x64xbf16>, vector<64x64xbf16>, vector<16x64xf32> -> vector<16x64xf32>
    %260 = arith.addf %258, %259 : vector<16x64xf32>
    %cst_93 = arith.constant dense<0.000000e+00> : vector<16x64xf32>
    %261 = tpu.matmul %256, %260, %cst_93 {dimension_numbers = #tpu.dot_dimension_numbers<[1], [0], [0], [1], [0, 0, 1, 1], [], []>} : vector<16x16xf32>, vector<16x64xf32>, vector<16x64xf32> -> vector<16x64xf32>
    %262 = arith.truncf %261 : vector<16x64xf32> to vector<16x64xbf16>
    %cst_94 = arith.constant dense<0.000000e+00> : vector<16x16xf32>
    %263 = tpu.matmul %227, %231, %cst_94 {dimension_numbers = #tpu.dot_dimension_numbers<[1], [1], [0], [0], [0, 0, 1, 0], [], []>} : vector<16x64xbf16>, vector<16x64xbf16>, vector<16x16xf32> -> vector<16x16xf32>
    %264 = arith.mulf %263, %7 : vector<16x16xf32>
    %cst_95 = arith.constant dense<0.000000e+00> : vector<16x16xf32>
    %265 = tpu.matmul %227, %233, %cst_95 {dimension_numbers = #tpu.dot_dimension_numbers<[1], [1], [0], [0], [0, 0, 1, 0], [], []>} : vector<16x64xbf16>, vector<16x64xbf16>, vector<16x16xf32> -> vector<16x16xf32>
    %266 = arith.mulf %265, %7 : vector<16x16xf32>
    %267 = arith.truncf %264 : vector<16x16xf32> to vector<16x16xbf16>
    %cst_96 = arith.constant dense<0.000000e+00> : vector<16x64xf32>
    %268 = tpu.matmul %267, %239, %cst_96 {dimension_numbers = #tpu.dot_dimension_numbers<[1], [0], [0], [1], [0, 0, 1, 1], [], []>} : vector<16x16xbf16>, vector<16x64xbf16>, vector<16x64xf32> -> vector<16x64xf32>
    %269 = arith.truncf %266 : vector<16x16xf32> to vector<16x16xbf16>
    %cst_97 = arith.constant dense<0.000000e+00> : vector<16x64xf32>
    %270 = tpu.matmul %269, %262, %cst_97 {dimension_numbers = #tpu.dot_dimension_numbers<[1], [0], [0], [1], [0, 0, 1, 1], [], []>} : vector<16x16xbf16>, vector<16x64xbf16>, vector<16x64xf32> -> vector<16x64xf32>
    %271 = arith.addf %268, %270 : vector<16x64xf32>
    %cst_98 = arith.constant dense<0.000000e+00> : vector<16x64xf32>
    %272 = tpu.matmul %227, %242, %cst_98 {dimension_numbers = #tpu.dot_dimension_numbers<[1], [1], [0], [0], [0, 0, 1, 0], [], []>} : vector<16x64xbf16>, vector<64x64xbf16>, vector<16x64xf32> -> vector<16x64xf32>
    %273 = arith.addf %271, %272 : vector<16x64xf32>
    %274 = vector.extract_strided_slice %217 {offsets = [0, 0], sizes = [1, 64], strides = [1, 1]} : vector<1x128xf32> to vector<1x64xf32>
    %275 = vector.broadcast %274 : vector<1x64xf32> to vector<64x64xf32>
    %276 = arith.mulf %241, %275 : vector<64x64xf32>
    %cst_99 = arith.constant dense<0.000000e+00> : vector<64x64xf32>
    %277 = tpu.matmul %239, %235, %cst_99 {dimension_numbers = #tpu.dot_dimension_numbers<[0], [0], [1], [1], [0, 1, 1, 1], [], []>} : vector<16x64xbf16>, vector<16x64xbf16>, vector<64x64xf32> -> vector<64x64xf32>
    %278 = arith.addf %276, %277 : vector<64x64xf32>
    %cst_100 = arith.constant dense<0.000000e+00> : vector<64x64xf32>
    %279 = tpu.matmul %262, %237, %cst_100 {dimension_numbers = #tpu.dot_dimension_numbers<[0], [0], [1], [1], [0, 1, 1, 1], [], []>} : vector<16x64xbf16>, vector<16x64xbf16>, vector<64x64xf32> -> vector<64x64xf32>
    %280 = arith.addf %278, %279 : vector<64x64xf32>
    %c0_101 = arith.constant 0 : index
    %c0_102 = arith.constant 0 : index
    %c0_103 = arith.constant 0 : index
    %281 = vector.load %arg10[%c0_101, %c0_102, %c0_103] : memref<2x64x64xf32, #tpu.memory_space<vmem>>, vector<1x64x64xf32>
    %282 = vector.shape_cast %281 : vector<1x64x64xf32> to vector<64x64xf32>
    %283 = vector.shape_cast %280 : vector<64x64xf32> to vector<1x64x64xf32>
    tpu.vector_store %arg10[%c0_101, %c0_102, %c0_103], %283 {strides = array<i32>} : memref<2x64x64xf32, #tpu.memory_space<vmem>>, vector<1x64x64xf32>,
    %284 = vector.extract_strided_slice %218 {offsets = [0, 64], sizes = [16, 64], strides = [1, 1]} : vector<16x128xf32> to vector<16x64xf32>
    %285 = arith.truncf %284 : vector<16x64xf32> to vector<16x64xbf16>
    %286 = vector.extract_strided_slice %219 {offsets = [0, 64], sizes = [16, 64], strides = [1, 1]} : vector<16x128xf32> to vector<16x64xf32>
    %287 = arith.truncf %286 : vector<16x64xf32> to vector<16x64xbf16>
    %288 = vector.extract_strided_slice %220 {offsets = [0, 64], sizes = [16, 64], strides = [1, 1]} : vector<16x128xf32> to vector<16x64xf32>
    %289 = arith.truncf %288 : vector<16x64xf32> to vector<16x64xbf16>
    %290 = vector.extract_strided_slice %221 {offsets = [0, 64], sizes = [16, 64], strides = [1, 1]} : vector<16x128xf32> to vector<16x64xf32>
    %291 = arith.truncf %290 : vector<16x64xf32> to vector<16x64xbf16>
    %292 = vector.extract_strided_slice %223 {offsets = [0, 64], sizes = [16, 64], strides = [1, 1]} : vector<16x128xf32> to vector<16x64xf32>
    %293 = arith.truncf %292 : vector<16x64xf32> to vector<16x64xbf16>
    %294 = vector.extract_strided_slice %225 {offsets = [0, 64], sizes = [16, 64], strides = [1, 1]} : vector<16x128xf32> to vector<16x64xf32>
    %295 = arith.truncf %294 : vector<16x64xf32> to vector<16x64xbf16>
    %296 = vector.extract_strided_slice %198 {offsets = [0, 64], sizes = [16, 64], strides = [1, 1]} : vector<16x128xf32> to vector<16x64xf32>
    %297 = arith.truncf %296 : vector<16x64xf32> to vector<16x64xbf16>
    %c1_104 = arith.constant 1 : index
    %c0_105 = arith.constant 0 : index
    %c0_106 = arith.constant 0 : index
    %298 = vector.load %arg10[%c1_104, %c0_105, %c0_106] : memref<2x64x64xf32, #tpu.memory_space<vmem>>, vector<1x64x64xf32>
    %299 = vector.shape_cast %298 : vector<1x64x64xf32> to vector<64x64xf32>
    %300 = arith.truncf %299 : vector<64x64xf32> to vector<64x64xbf16>
    %cst_107 = arith.constant dense<0.000000e+00> : vector<16x16xf32>
    %301 = tpu.matmul %287, %291, %cst_107 {dimension_numbers = #tpu.dot_dimension_numbers<[1], [1], [0], [0], [0, 0, 1, 0], [], []>} : vector<16x64xbf16>, vector<16x64xbf16>, vector<16x16xf32> -> vector<16x16xf32>
    %302 = arith.mulf %301, %4 : vector<16x16xf32>
    %cst_108 = arith.constant dense<0.000000e+00> : vector<16x16xf32>
    %303 = tpu.matmul %287, %289, %cst_108 {dimension_numbers = #tpu.dot_dimension_numbers<[1], [1], [0], [0], [0, 0, 1, 0], [], []>} : vector<16x64xbf16>, vector<16x64xbf16>, vector<16x16xf32> -> vector<16x16xf32>
    %304 = arith.mulf %303, %4 : vector<16x16xf32>
    %305 = arith.addf %10, %302 : vector<16x16xf32>
    %cst_109 = arith.constant dense<0.000000e+00> : vector<16x16xf32>
    %306 = tpu.matmul %302, %302, %cst_109 {dimension_numbers = #tpu.dot_dimension_numbers<[1], [0], [0], [1], [0, 0, 1, 1], [], []>} : vector<16x16xf32>, vector<16x16xf32>, vector<16x16xf32> -> vector<16x16xf32>
    %cst_110 = arith.constant dense<0.000000e+00> : vector<16x16xf32>
    %307 = tpu.matmul %306, %305, %cst_110 {dimension_numbers = #tpu.dot_dimension_numbers<[1], [0], [0], [1], [0, 0, 1, 1], [], []>} : vector<16x16xf32>, vector<16x16xf32>, vector<16x16xf32> -> vector<16x16xf32>
    %308 = arith.addf %305, %307 : vector<16x16xf32>
    %cst_111 = arith.constant dense<0.000000e+00> : vector<16x16xf32>
    %309 = tpu.matmul %306, %306, %cst_111 {dimension_numbers = #tpu.dot_dimension_numbers<[1], [0], [0], [1], [0, 0, 1, 1], [], []>} : vector<16x16xf32>, vector<16x16xf32>, vector<16x16xf32> -> vector<16x16xf32>
    %cst_112 = arith.constant dense<0.000000e+00> : vector<16x16xf32>
    %310 = tpu.matmul %309, %308, %cst_112 {dimension_numbers = #tpu.dot_dimension_numbers<[1], [0], [0], [1], [0, 0, 1, 1], [], []>} : vector<16x16xf32>, vector<16x16xf32>, vector<16x16xf32> -> vector<16x16xf32>
    %311 = arith.addf %308, %310 : vector<16x16xf32>
    %cst_113 = arith.constant dense<0.000000e+00> : vector<16x16xf32>
    %312 = tpu.matmul %309, %309, %cst_113 {dimension_numbers = #tpu.dot_dimension_numbers<[1], [0], [0], [1], [0, 0, 1, 1], [], []>} : vector<16x16xf32>, vector<16x16xf32>, vector<16x16xf32> -> vector<16x16xf32>
    %cst_114 = arith.constant dense<0.000000e+00> : vector<16x16xf32>
    %313 = tpu.matmul %312, %311, %cst_114 {dimension_numbers = #tpu.dot_dimension_numbers<[1], [0], [0], [1], [0, 0, 1, 1], [], []>} : vector<16x16xf32>, vector<16x16xf32>, vector<16x16xf32> -> vector<16x16xf32>
    %314 = arith.addf %311, %313 : vector<16x16xf32>
    %315 = arith.truncf %304 : vector<16x16xf32> to vector<16x16xbf16>
    %cst_115 = arith.constant dense<0.000000e+00> : vector<16x64xf32>
    %316 = tpu.matmul %315, %297, %cst_115 {dimension_numbers = #tpu.dot_dimension_numbers<[1], [0], [0], [1], [0, 0, 1, 1], [], []>} : vector<16x16xbf16>, vector<16x64xbf16>, vector<16x64xf32> -> vector<16x64xf32>
    %cst_116 = arith.constant dense<0.000000e+00> : vector<16x64xf32>
    %317 = tpu.matmul %287, %300, %cst_116 {dimension_numbers = #tpu.dot_dimension_numbers<[1], [1], [0], [0], [0, 0, 1, 0], [], []>} : vector<16x64xbf16>, vector<64x64xbf16>, vector<16x64xf32> -> vector<16x64xf32>
    %318 = arith.addf %316, %317 : vector<16x64xf32>
    %cst_117 = arith.constant dense<0.000000e+00> : vector<16x64xf32>
    %319 = tpu.matmul %314, %318, %cst_117 {dimension_numbers = #tpu.dot_dimension_numbers<[1], [0], [0], [1], [0, 0, 1, 1], [], []>} : vector<16x16xf32>, vector<16x64xf32>, vector<16x64xf32> -> vector<16x64xf32>
    %320 = arith.truncf %319 : vector<16x64xf32> to vector<16x64xbf16>
    %cst_118 = arith.constant dense<0.000000e+00> : vector<16x16xf32>
    %321 = tpu.matmul %285, %289, %cst_118 {dimension_numbers = #tpu.dot_dimension_numbers<[1], [1], [0], [0], [0, 0, 1, 0], [], []>} : vector<16x64xbf16>, vector<16x64xbf16>, vector<16x16xf32> -> vector<16x16xf32>
    %322 = arith.mulf %321, %7 : vector<16x16xf32>
    %cst_119 = arith.constant dense<0.000000e+00> : vector<16x16xf32>
    %323 = tpu.matmul %285, %291, %cst_119 {dimension_numbers = #tpu.dot_dimension_numbers<[1], [1], [0], [0], [0, 0, 1, 0], [], []>} : vector<16x64xbf16>, vector<16x64xbf16>, vector<16x16xf32> -> vector<16x16xf32>
    %324 = arith.mulf %323, %7 : vector<16x16xf32>
    %325 = arith.truncf %322 : vector<16x16xf32> to vector<16x16xbf16>
    %cst_120 = arith.constant dense<0.000000e+00> : vector<16x64xf32>
    %326 = tpu.matmul %325, %297, %cst_120 {dimension_numbers = #tpu.dot_dimension_numbers<[1], [0], [0], [1], [0, 0, 1, 1], [], []>} : vector<16x16xbf16>, vector<16x64xbf16>, vector<16x64xf32> -> vector<16x64xf32>
    %327 = arith.truncf %324 : vector<16x16xf32> to vector<16x16xbf16>
    %cst_121 = arith.constant dense<0.000000e+00> : vector<16x64xf32>
    %328 = tpu.matmul %327, %320, %cst_121 {dimension_numbers = #tpu.dot_dimension_numbers<[1], [0], [0], [1], [0, 0, 1, 1], [], []>} : vector<16x16xbf16>, vector<16x64xbf16>, vector<16x64xf32> -> vector<16x64xf32>
    %329 = arith.addf %326, %328 : vector<16x64xf32>
    %cst_122 = arith.constant dense<0.000000e+00> : vector<16x64xf32>
    %330 = tpu.matmul %285, %300, %cst_122 {dimension_numbers = #tpu.dot_dimension_numbers<[1], [1], [0], [0], [0, 0, 1, 0], [], []>} : vector<16x64xbf16>, vector<64x64xbf16>, vector<16x64xf32> -> vector<16x64xf32>
    %331 = arith.addf %329, %330 : vector<16x64xf32>
    %332 = vector.extract_strided_slice %217 {offsets = [0, 64], sizes = [1, 64], strides = [1, 1]} : vector<1x128xf32> to vector<1x64xf32>
    %333 = vector.broadcast %332 : vector<1x64xf32> to vector<64x64xf32>
    %334 = arith.mulf %299, %333 : vector<64x64xf32>
    %cst_123 = arith.constant dense<0.000000e+00> : vector<64x64xf32>
    %335 = tpu.matmul %297, %293, %cst_123 {dimension_numbers = #tpu.dot_dimension_numbers<[0], [0], [1], [1], [0, 1, 1, 1], [], []>} : vector<16x64xbf16>, vector<16x64xbf16>, vector<64x64xf32> -> vector<64x64xf32>
    %336 = arith.addf %334, %335 : vector<64x64xf32>
    %cst_124 = arith.constant dense<0.000000e+00> : vector<64x64xf32>
    %337 = tpu.matmul %320, %295, %cst_124 {dimension_numbers = #tpu.dot_dimension_numbers<[0], [0], [1], [1], [0, 1, 1, 1], [], []>} : vector<16x64xbf16>, vector<16x64xbf16>, vector<64x64xf32> -> vector<64x64xf32>
    %338 = arith.addf %336, %337 : vector<64x64xf32>
    %c1_125 = arith.constant 1 : index
    %c0_126 = arith.constant 0 : index
    %c0_127 = arith.constant 0 : index
    %339 = vector.load %arg10[%c1_125, %c0_126, %c0_127] : memref<2x64x64xf32, #tpu.memory_space<vmem>>, vector<1x64x64xf32>
    %340 = vector.shape_cast %339 : vector<1x64x64xf32> to vector<64x64xf32>
    %341 = vector.shape_cast %338 : vector<64x64xf32> to vector<1x64x64xf32>
    tpu.vector_store %arg10[%c1_125, %c0_126, %c0_127], %341 {strides = array<i32>} : memref<2x64x64xf32, #tpu.memory_space<vmem>>, vector<1x64x64xf32>,
    %342 = tpu.concatenate %273, %331 in 1 : vector<16x64xf32>, vector<16x64xf32> -> vector<16x128xf32>
    %343 = arith.truncf %342 : vector<16x128xf32> to vector<16x128xbf16>
    %c0_128 = arith.constant 0 : index
    %344 = arith.index_cast %182 : i32 to index
    %c0_129 = arith.constant 0 : index
    %345 = vector.load %arg9[%c0_128, %344, %c0_129] : memref<1x32x128xbf16, #tpu.memory_space<vmem>>, vector<1x16x128xbf16>
    %346 = vector.shape_cast %345 : vector<1x16x128xbf16> to vector<16x128xbf16>
    %347 = vector.shape_cast %343 : vector<16x128xbf16> to vector<1x16x128xbf16>
    tpu.vector_store %arg9[%c0_128, %344, %c0_129], %347 {strides = array<i32>} : memref<1x32x128xbf16, #tpu.memory_space<vmem>>, vector<1x16x128xbf16>,
    %c2_i32 = arith.constant 2 : i32
    return
  }
  func.func @transform_0(%arg0: i32, %arg1: i32, %arg2: i32) -> (i32, i32, i32) {
    %c0_i32 = arith.constant 0 : i32
    return %arg0, %arg2, %arg1 : i32, i32, i32
  }
  func.func @transform_1(%arg0: i32, %arg1: i32, %arg2: i32) -> (i32, i32, i32) {
    %c0_i32 = arith.constant 0 : i32
    return %arg0, %arg2, %arg1 : i32, i32, i32
  }
  func.func @transform_2(%arg0: i32, %arg1: i32, %arg2: i32) -> (i32, i32, i32) {
    %c0_i32 = arith.constant 0 : i32
    return %arg0, %arg2, %arg1 : i32, i32, i32
  }
  func.func @transform_3(%arg0: i32, %arg1: i32, %arg2: i32) -> (i32, i32, i32) {
    %c0_i32 = arith.constant 0 : i32
    return %arg0, %arg2, %arg1 : i32, i32, i32
  }
  func.func @transform_4(%arg0: i32, %arg1: i32, %arg2: i32) -> (i32, i32, i32) {
    %c0_i32 = arith.constant 0 : i32
    return %arg0, %arg2, %arg1 : i32, i32, i32
  }
  func.func @transform_5(%arg0: i32, %arg1: i32, %arg2: i32) -> (i32, i32, i32) {
    %c0_i32 = arith.constant 0 : i32
    return %arg0, %arg2, %arg1 : i32, i32, i32
  }
  func.func @transform_6(%arg0: i32, %arg1: i32, %arg2: i32) -> (i32, i32, i32) {
    %c0_i32 = arith.constant 0 : i32
    return %arg0, %arg2, %arg1 : i32, i32, i32
  }
}

module attributes {stable_mosaic.version = 11 : i64} {
  func.func @_matmul_kernel(%arg0: i32, %arg1: i32, %arg2: i32, %arg3: memref<64x128xbf16, #tpu.memory_space<vmem>>, %arg4: memref<128x128xbf16, #tpu.memory_space<vmem>>, %arg5: memref<64x128xf32, #tpu.memory_space<vmem>>, %arg6: memref<64x128xf32, #tpu.memory_space<vmem>>) attributes {dimension_semantics = [#tpu.dimension_semantics<parallel>, #tpu.dimension_semantics<parallel>, #tpu.dimension_semantics<arbitrary>], iteration_bounds = array<i64: 1, 1, 1>, scalar_prefetch = 0 : i64, scratch_operands = 1 : i64, tpu.core_type = #tpu.core_type<tc>, window_params = [{transform_indices = @transform_0, window_bounds = array<i64: 64, 128>}, {transform_indices = @transform_1, window_bounds = array<i64: 128, 128>}, {transform_indices = @transform_2, window_bounds = array<i64: 64, 128>}]} {
    %c0_i32 = arith.constant 0 : i32
    %0 = arith.cmpi eq, %arg2, %c0_i32 : i32
    %1 = arith.extui %0 : i1 to i32
    %c0_i32_0 = arith.constant 0 : i32
    %2 = arith.cmpi ne, %1, %c0_i32_0 : i32
    scf.if %2 {
      %cst_10 = arith.constant 0.000000e+00 : f32
      %12 = vector.broadcast %cst_10 : f32 to vector<64x128xf32>
      %c0_11 = arith.constant 0 : index
      %c0_12 = arith.constant 0 : index
      %13 = vector.load %arg6[%c0_11, %c0_12] : memref<64x128xf32, #tpu.memory_space<vmem>>, vector<64x128xf32>
      tpu.vector_store %arg6[%c0_11, %c0_12], %12 {strides = array<i32>} : memref<64x128xf32, #tpu.memory_space<vmem>>, vector<64x128xf32>,
    } else {
    }
    %c0 = arith.constant 0 : index
    %c0_1 = arith.constant 0 : index
    %3 = vector.load %arg6[%c0, %c0_1] : memref<64x128xf32, #tpu.memory_space<vmem>>, vector<64x128xf32>
    %c0_2 = arith.constant 0 : index
    %c0_3 = arith.constant 0 : index
    %4 = vector.load %arg3[%c0_2, %c0_3] : memref<64x128xbf16, #tpu.memory_space<vmem>>, vector<64x128xbf16>
    %c0_4 = arith.constant 0 : index
    %c0_5 = arith.constant 0 : index
    %5 = vector.load %arg4[%c0_4, %c0_5] : memref<128x128xbf16, #tpu.memory_space<vmem>>, vector<128x128xbf16>
    %cst = arith.constant dense<0.000000e+00> : vector<64x128xf32>
    %6 = tpu.matmul %4, %5, %cst {dimension_numbers = #tpu.dot_dimension_numbers<[1], [0], [0], [1], [0, 0, 1, 1], [], []>} : vector<64x128xbf16>, vector<128x128xbf16>, vector<64x128xf32> -> vector<64x128xf32>
    %7 = arith.addf %3, %6 : vector<64x128xf32>
    %c0_6 = arith.constant 0 : index
    %c0_7 = arith.constant 0 : index
    %8 = vector.load %arg6[%c0_6, %c0_7] : memref<64x128xf32, #tpu.memory_space<vmem>>, vector<64x128xf32>
    tpu.vector_store %arg6[%c0_6, %c0_7], %7 {strides = array<i32>} : memref<64x128xf32, #tpu.memory_space<vmem>>, vector<64x128xf32>,
    %c0_i32_8 = arith.constant 0 : i32
    %9 = arith.cmpi eq, %arg2, %c0_i32_8 : i32
    %10 = arith.extui %9 : i1 to i32
    %c0_i32_9 = arith.constant 0 : i32
    %11 = arith.cmpi ne, %10, %c0_i32_9 : i32
    scf.if %11 {
      %c0_10 = arith.constant 0 : index
      %c0_11 = arith.constant 0 : index
      %12 = vector.load %arg6[%c0_10, %c0_11] : memref<64x128xf32, #tpu.memory_space<vmem>>, vector<64x128xf32>
      %c0_12 = arith.constant 0 : index
      %c0_13 = arith.constant 0 : index
      %13 = vector.load %arg5[%c0_12, %c0_13] : memref<64x128xf32, #tpu.memory_space<vmem>>, vector<64x128xf32>
      tpu.vector_store %arg5[%c0_12, %c0_13], %12 {strides = array<i32>} : memref<64x128xf32, #tpu.memory_space<vmem>>, vector<64x128xf32>,
    } else {
    }
    return
  }
  func.func @transform_0(%arg0: i32, %arg1: i32, %arg2: i32) -> (i32, i32) {
    %c0_i32 = arith.constant 0 : i32
    return %arg0, %arg2 : i32, i32
  }
  func.func @transform_1(%arg0: i32, %arg1: i32, %arg2: i32) -> (i32, i32) {
    %c0_i32 = arith.constant 0 : i32
    return %arg2, %arg1 : i32, i32
  }
  func.func @transform_2(%arg0: i32, %arg1: i32, %arg2: i32) -> (i32, i32) {
    %c0_i32 = arith.constant 0 : i32
    return %arg0, %arg1 : i32, i32
  }
}

</mosaic_0001>

<bundles_post_ra>
// kernel: rwkv_tmix_x070_forward.3
= control target key start
LH: loop header
LB: loop body
LE: loop exit
PB: predicated region body
PF: predicated region fallthrough
CT: control target
= control target key end

     0   :  { %s1231_s5 = inlined_call_operand.vmem [shape: bf16[128,128], index: 5, kind: input, shape index: {}]   ;;  %s1232_s6 = inlined_call_operand.vmem [shape: bf16[128,128], index: 6, kind: input, shape index: {}]   ;;  %s1233_s0 = inlined_call_operand.vmem [shape: bf16[64,128], index: 0, kind: input, shape index: {}]   ;;  %s1234_s1 = inlined_call_operand.vmem [shape: bf16[64,128], index: 1, kind: input, shape index: {}]   ;;  %s1235_s2 = inlined_call_operand.vmem [shape: f32[1,128], index: 2, kind: input, shape index: {}]   ;;  %s1236_s3 = inlined_call_operand.vmem [shape: f32[1,128], index: 3, kind: input, shape index: {}]   ;;  %s1237_s7 = inlined_call_operand.vmem [shape: bf16[128,128], index: 7, kind: input, shape index: {}]   ;;  %s1238_s4 = inlined_call_operand.vmem [shape: f32[1,128], index: 4, kind: input, shape index: {}]   ;;  %s1239_s8 = inlined_call_operand.vmem [shape: f32[64,128], index: 8, kind: output, shape index: {0}]   ;;  %s1240_s9 = inlined_call_operand.vmem [shape: f32[64,128], index: 9, kind: output, shape index: {1}]   ;;  %s1241_s10 = inlined_call_operand.vmem [shape: f32[64,128], index: 10, kind: output, shape index: {2}]  }
   0x1   :  { %v885_v0 = vld [vmem:[%s1231_s5] sm:$0xff]   ;;  %v887_v2 = vld [vmem:[%s1231_s5 + $0x8] sm:$0xff]   ;;  %v889_v4 = vld [vmem:[%s1231_s5 + $0x10] sm:$0xff]  }
   0x2   :  { %v886_v1 = vld [vmem:[%s1232_s6] sm:$0xff]   ;;  %797 = vmatprep.subr.bf16.mxu0 %v885_v0  ;;  %v888_v3 = vld [vmem:[%s1232_s6 + $0x8] sm:$0xff]   ;;  %v890_v5 = vld [vmem:[%s1232_s6 + $0x10] sm:$0xff]  }
   0x3   :  { %821 = vmatprep.subr.bf16.mxu1 %v886_v1  ;;  %798 = vmatpush3.bf16.msra.mxu0 %v885_v0  ;;  %v891_v6 = vld [vmem:[%s1231_s5 + $0x18] sm:$0xff]   ;;  %v893_v8 = vld [vmem:[%s1231_s5 + $0x20] sm:$0xff]   ;;  %v895_v10 = vld [vmem:[%s1231_s5 + $0x28] sm:$0xff]  }
   0x4   :  { %822 = vmatpush3.bf16.msra.mxu1 %v886_v1  ;;  %799 = vmatprep.subr.bf16.mxu0 %v887_v2  ;;  %v892_v7 = vld [vmem:[%s1232_s6 + $0x18] sm:$0xff]   ;;  %v894_v9 = vld [vmem:[%s1232_s6 + $0x20] sm:$0xff]   ;;  %v896_v11 = vld [vmem:[%s1232_s6 + $0x28] sm:$0xff]  }
   0x5   :  { %823 = vmatprep.subr.bf16.mxu1 %v888_v3  ;;  %v724_v12 = vld [vmem:[%s1233_s0] sm:$0xff]   ;;  %v755_v20 = vld [vmem:[%s1233_s0 + $0x8] sm:$0xff]   ;;  %v897_v28 = vld [vmem:[%s1231_s5 + $0x30] sm:$0xff]  }
   0x6   :  { %v740_v13 = vld [vmem:[%s1234_s1] sm:$0xff]   ;;  %v1011_v15 = vunpack.c.l.bf16 %v724_v12  ;;  %v1013_v16 = vunpack.c.h.bf16 %v724_v12  ;;  %v758_v21 = vld [vmem:[%s1234_s1 + $0x8] sm:$0xff]   ;;  %v1045_v29 = vunpack.c.l.bf16 %v755_v20  ;;  %v1047_v30 = vunpack.c.h.bf16 %v755_v20  ;;  %v898_v33 = vld [vmem:[%s1232_s6 + $0x30] sm:$0xff]  }
   0x7   :  { %800 = vmatpush3.bf16.msra.mxu0 %v887_v2  ;;  %v1009_v14 = vld [vmem:[%s1235_s2] ss:$0 sm:$0xff]  ;;  %v1015_v17 = vunpack.c.l.bf16 %v740_v13  ;;  %v1017_v18 = vunpack.c.h.bf16 %v740_v13  ;;  %v1030_v22 = vunpack.c.l.bf16 %v758_v21  ;;  %v1032_v23 = vunpack.c.h.bf16 %v758_v21  ;;  %v756_v42 = vld [vmem:[%s1233_s0 + $0x10] sm:$0xff]   ;;  %v899_v44 = vld [vmem:[%s1231_s5 + $0x38] sm:$0xff]  }
   0x8   :  { %824 = vmatpush3.bf16.msra.mxu1 %v888_v3  ;;  %801 = vmatprep.subr.bf16.mxu0 %v889_v4  ;;  %v1022_v19 = vld [vmem:[%s1236_s3] ss:$0 sm:$0xff]  ;;  %v759_v43 = vld [vmem:[%s1234_s1 + $0x10] sm:$0xff]   ;;  %v900_v45 = vld [vmem:[%s1232_s6 + $0x38] sm:$0xff]   ;;  %v733_v48 = vunpack.c.l.bf16 %v756_v42  ;;  %v734_v49 = vunpack.c.h.bf16 %v756_v42 }
   0x9   :  { %825 = vmatprep.subr.bf16.mxu1 %v890_v5  ;;  %v108_v24 = vmul.f32 %v1015_v17, %v1009_v14  ;;  %v109_v25 = vmul.f32 %v1017_v18, %v1009_v14  ;;  %v288_v26 = vmul.f32 %v1015_v17, %v1022_v19  ;;  %v289_v27 = vmul.f32 %v1017_v18, %v1022_v19  ;;  %v760_v52 = vld [vmem:[%s1234_s1 + $0x18] sm:$0xff]   ;;  %v901_v63 = vld [vmem:[%s1237_s7] sm:$0xff]   ;;  %v902_v12 = vld [vmem:[%s1237_s7 + $0x8] sm:$0xff]  }
   0xa   :  { %v110_v31 = vmul.f32 %v1030_v22, %v1009_v14  ;;  %v111_v32 = vmul.f32 %v1032_v23, %v1009_v14  ;;  %v290_v38 = vmul.f32 %v1030_v22, %v1022_v19  ;;  %v291_v39 = vmul.f32 %v1032_v23, %v1022_v19  ;;  %v757_v55 = vld [vmem:[%s1233_s0 + $0x18] sm:$0xff]  }
   0xb   :  { %802 = vmatpush3.bf16.msra.mxu0 %v889_v4  ;;  %v116_v34 = vadd.f32 %v1011_v15, %v108_v24  ;;  %v117_v35 = vadd.f32 %v1013_v16, %v109_v25  ;;  %v296_v36 = vadd.f32 %v1011_v15, %v288_v26  ;;  %v297_v37 = vadd.f32 %v1013_v16, %v289_v27 }
   0xc   :  { %826 = vmatpush3.bf16.msra.mxu1 %v890_v5  ;;  %803 = vmatprep.subr.bf16.mxu0 %v891_v6  ;;  %v118_v46 = vadd.f32 %v1045_v29, %v110_v31  ;;  %v119_v47 = vadd.f32 %v1047_v30, %v111_v32  ;;  %v749_v50 = vunpack.c.l.bf16 %v759_v43  ;;  %v750_v51 = vunpack.c.h.bf16 %v759_v43 }
   0xd   :  { %827 = vmatprep.subr.bf16.mxu1 %v892_v7  ;;  %v124_v40 = vpack.c.bf16 %v117_v35, %v116_v34  ;;  %v304_v41 = vpack.c.bf16 %v297_v37, %v296_v36  ;;  %v298_v53 = vadd.f32 %v1045_v29, %v290_v38  ;;  %v299_v54 = vadd.f32 %v1047_v30, %v291_v39  ;;  %v904_v36 = vld [vmem:[%s1237_s7 + $0x18] sm:$0xff]   ;;  %v907_v39 = vld [vmem:[%s1237_s7 + $0x30] sm:$0xff]  }
   0xe   :  { %v1086_v56 = vunpack.c.l.bf16 %v760_v52  ;;  %v1088_v57 = vunpack.c.h.bf16 %v760_v52  ;;  %v112_v58 = vmul.f32 %v749_v50, %v1009_v14  ;;  %v113_v59 = vmul.f32 %v750_v51, %v1009_v14 }
   0xf   :  { %804 = vmatpush3.bf16.msra.mxu0 %v891_v6  ;;  %813 = vmatprep.mubr.bf16.mxu0 %v124_v40  ;;  %v292_v60 = vmul.f32 %v749_v50, %v1022_v19  ;;  %v293_v61 = vmul.f32 %v750_v51, %v1022_v19  ;;  %v125_v62 = vpack.c.bf16 %v119_v47, %v118_v46  ;;  %v1097_v2 = vunpack.c.l.bf16 %v757_v55 }
  0x10   :  { %828 = vmatpush3.bf16.msra.mxu1 %v892_v7  ;;  %805 = vmatprep.subr.bf16.mxu0 %v893_v8  ;;  %v120_v0 = vadd.f32 %v733_v48, %v112_v58  ;;  %v121_v1 = vadd.f32 %v734_v49, %v113_v59  ;;  %v114_v3 = vmul.f32 %v1086_v56, %v1009_v14  ;;  %v1101_v6 = vunpack.c.h.bf16 %v757_v55 }
  0x11   :  { %829 = vmatprep.subr.bf16.mxu1 %v894_v9  ;;  %837 = vmatprep.mubr.bf16.mxu1 %v304_v41  ;;  %v300_v4 = vadd.f32 %v733_v48, %v292_v60  ;;  %v301_v5 = vadd.f32 %v734_v49, %v293_v61  ;;  %v115_v7 = vmul.f32 %v1088_v57, %v1009_v14 }
  0x12   :  { %v126_v13 = vpack.c.bf16 %v121_v1, %v120_v0  ;;  %v122_v14 = vadd.f32 %v1097_v2, %v114_v3 }
  0x13   :  { %806 = vmatpush3.bf16.msra.mxu0 %v893_v8  ;;  %v1108_v8 = vld [vmem:[%s1238_s4] ss:$0 sm:$0xff]  ;;  %v306_v24 = vpack.c.bf16 %v301_v5, %v300_v4 }
  0x14   :  { %830 = vmatpush3.bf16.msra.mxu1 %v894_v9  ;;  %807 = vmatprep.subr.bf16.mxu0 %v895_v10  ;;  %v305_v9 = vpack.c.bf16 %v299_v54, %v298_v53  ;;  %v468_v20 = vmul.f32 %v1015_v17, %v1108_v8  ;;  %v469_v21 = vmul.f32 %v1017_v18, %v1108_v8  ;;  %v903_v17 = vld [vmem:[%s1237_s7 + $0x10] sm:$0xff]  }
  0x15   :  { %831 = vmatprep.subr.bf16.mxu1 %v896_v11  ;;  %v472_v25 = vmul.f32 %v749_v50, %v1108_v8  ;;  %v473_v26 = vmul.f32 %v750_v51, %v1108_v8  ;;  %v470_v40 = vmul.f32 %v1030_v22, %v1108_v8  ;;  %v471_v41 = vmul.f32 %v1032_v23, %v1108_v8 }
  0x16   :  { %v476_v18 = vadd.f32 %v1011_v15, %v468_v20  ;;  %v477_v31 = vadd.f32 %v1013_v16, %v469_v21  ;;  %v905_v15 = vld [vmem:[%s1237_s7 + $0x20] sm:$0xff]   ;;  %v906_v16 = vld [vmem:[%s1237_s7 + $0x28] sm:$0xff]   ;;  %v474_v42 = vmul.f32 %v1086_v56, %v1108_v8  ;;  %v475_v43 = vmul.f32 %v1088_v57, %v1108_v8 }
  0x17   :  { %808 = vmatpush3.bf16.msra.mxu0 %v895_v10  ;;  %v294_v10 = vmul.f32 %v1086_v56, %v1022_v19  ;;  %v481_v34 = vadd.f32 %v734_v49, %v473_v26  ;;  %v479_v22 = vadd.f32 %v1047_v30, %v471_v41 }
  0x18   :  { %832 = vmatpush3.bf16.msra.mxu1 %v896_v11  ;;  %809 = vmatprep.subr.bf16.mxu0 %v897_v28  ;;  %v295_v11 = vmul.f32 %v1088_v57, %v1022_v19  ;;  %v123_v19 = vadd.f32 %v1101_v6, %v115_v7  ;;  %v484_v37 = vpack.c.bf16 %v477_v31, %v476_v18 }
  0x19   :  { %833 = vmatprep.subr.bf16.mxu1 %v898_v33  ;;  %v302_v27 = vadd.f32 %v1097_v2, %v294_v10  ;;  %v482_v23 = vadd.f32 %v1097_v2, %v474_v42  ;;  %v483_v46 = vadd.f32 %v1101_v6, %v475_v43 }
  0x1a   :  { %v127_v32 = vpack.c.bf16 %v123_v19, %v122_v14 }
  0x1b   :  { %810 = vmatpush3.bf16.msra.mxu0 %v897_v28  ;;  %v303_v28 = vadd.f32 %v1101_v6, %v295_v11 }
  0x1c   :  { %834 = vmatpush3.bf16.msra.mxu1 %v898_v33  ;;  %811 = vmatprep.subr.bf16.mxu0 %v899_v44  ;;  %v480_v33 = vadd.f32 %v733_v48, %v472_v25  ;;  %v487_v48 = vpack.c.bf16 %v483_v46, %v482_v23 }
  0x1d   :  { %835 = vmatprep.subr.bf16.mxu1 %v900_v45  ;;  %v307_v35 = vpack.c.bf16 %v303_v28, %v302_v27 }
  0x1e   :  { %v486_v38 = vpack.c.bf16 %v481_v34, %v480_v33 }
  0x1f   :  { %812 = vmatpush3.bf16.msra.mxu0 %v899_v44  ;;  %v908_v44 = vld [vmem:[%s1237_s7 + $0x38] sm:$0xff]  }
  0x20   :  { %836 = vmatpush3.bf16.msra.mxu1 %v900_v45  ;;  %845 = vmatprep.subr.bf16.mxu0 %v901_v63  ;;  %v478_v45 = vadd.f32 %v1045_v29, %v470_v40 }
  0x21   :  { %869 = vmatprep.subr.bf16.mxu1 %v901_v63 }
  0x22   :  { %814 = vmatmul.mubr.bf16.vlgmr.msra.gmra.mrb[0].mxu0 %v125_v62  ;;  %v485_v47 = vpack.c.bf16 %v479_v22, %v478_v45 }
  0x23   :  { %838 = vmatmul.mubr.bf16.vlgmr.msra.gmra.mrb[0].mxu1 %v305_v9  ;;  %846 = vmatpush3.bf16.msra.mxu0 %v901_v63 }
  0x24   :  { %877 = vmatpush3.bf16.msra.mxu1 %v901_v63  ;;  %847 = vmatprep.subr.bf16.mxu0 %v902_v12 }
  0x25   :  { %870 = vmatprep.subr.bf16.mxu1 %v902_v12  ;;  %817 = vmatprep.mubr.bf16.mxu0 %v126_v13 }
  0x26   :  { %841 = vmatprep.mubr.bf16.mxu1 %v306_v24 }
  0x27   :  { %848 = vmatpush3.bf16.msra.mxu0 %v902_v12 }
  0x28   :  { %878 = vmatpush3.bf16.msra.mxu1 %v902_v12  ;;  %849 = vmatprep.subr.bf16.mxu0 %v903_v17 }
  0x29   :  { %871 = vmatprep.subr.bf16.mxu1 %v903_v17 }
  0x2a   :  { %818 = vmatmul.mubr.bf16.gmra.mrb[4].mxu0 %v127_v32 }
  0x2b   :  { %850 = vmatpush3.bf16.msra.mxu0 %v903_v17  ;;  %842 = vmatmul.mubr.bf16.gmra.mrb[4].mxu1 %v307_v35 }
  0x2c   :  { %879 = vmatpush3.bf16.msra.mxu1 %v903_v17  ;;  %851 = vmatprep.subr.bf16.mxu0 %v904_v36 }
  0x2d   :  { %872 = vmatprep.subr.bf16.mxu1 %v904_v36  ;;  %861 = vmatprep.mubr.bf16.mxu0 %v484_v37 }
  0x2e   :  { %865 = vmatprep.mubr.bf16.mxu1 %v486_v38 }
  0x2f   :  { %852 = vmatpush3.bf16.msra.mxu0 %v904_v36 }
  0x30   :  { %880 = vmatpush3.bf16.msra.mxu1 %v904_v36  ;;  %853 = vmatprep.subr.bf16.mxu0 %v905_v15 }
  0x31   :  { %873 = vmatprep.subr.bf16.mxu1 %v905_v15 }
  0x33   :  { %854 = vmatpush3.bf16.msra.mxu0 %v905_v15 }
  0x34   :  { %881 = vmatpush3.bf16.msra.mxu1 %v905_v15  ;;  %855 = vmatprep.subr.bf16.mxu0 %v906_v16 }
  0x35   :  { %874 = vmatprep.subr.bf16.mxu1 %v906_v16 }
  0x37   :  { %856 = vmatpush3.bf16.msra.mxu0 %v906_v16 }
  0x38   :  { %882 = vmatpush3.bf16.msra.mxu1 %v906_v16  ;;  %857 = vmatprep.subr.bf16.mxu0 %v907_v39 }
  0x39   :  { %875 = vmatprep.subr.bf16.mxu1 %v907_v39 }
  0x3b   :  { %858 = vmatpush3.bf16.msra.mxu0 %v907_v39 }
  0x3c   :  { %883 = vmatpush3.bf16.msra.mxu1 %v907_v39  ;;  %859 = vmatprep.subr.bf16.mxu0 %v908_v44 }
  0x3d   :  { %876 = vmatprep.subr.bf16.mxu1 %v908_v44 }
  0x3f   :  { %860 = vmatpush3.bf16.msra.mxu0 %v908_v44 }
  0x40   :  { %884 = vmatpush3.bf16.msra.mxu1 %v908_v44 }
  0x42   :  { %862 = vmatmul.mubr.bf16.vlgmr.msra.gmra.mrb[8].mxu0 %v485_v47 }
  0x43   :  { %866 = vmatmul.mubr.bf16.vlgmr.msra.gmra.mrb[8].mxu1 %v487_v48 }
  0xf5   :  { %v815_v49 = vpop.f32.mrb[0].mxu0 }
  0xf6   :  { %646 = vst [vmem:[%s1239_s8 + $0x10] sm:$0xff] %v815_v49  ;;  %v839_v29 = vpop.f32.mrb[0].mxu1  ;;  %v226_v30 = vpop.f32.mrb[1].mxu0 }
  0xf7   :  { %662 = vst [vmem:[%s1240_s9 + $0x10] sm:$0xff] %v839_v29  ;;  %644 = vst [vmem:[%s1239_s8] sm:$0xff] %v226_v30  ;;  %v406_v50 = vpop.f32.mrb[1].mxu1  ;;  %v816_v51 = vpop.f32.mrb[2].mxu0 }
  0xf8   :  { %660 = vst [vmem:[%s1240_s9] sm:$0xff] %v406_v50  ;;  %647 = vst [vmem:[%s1239_s8 + $0x18] sm:$0xff] %v816_v51  ;;  %v840_v52 = vpop.f32.mrb[2].mxu1  ;;  %v229_v53 = vpop.f32.mrb[3].mxu0 }
  0xf9   :  { %663 = vst [vmem:[%s1240_s9 + $0x18] sm:$0xff] %v840_v52  ;;  %645 = vst [vmem:[%s1239_s8 + $0x8] sm:$0xff] %v229_v53  ;;  %v409_v54 = vpop.f32.mrb[3].mxu1 }
  0xfa   :  { %661 = vst [vmem:[%s1240_s9 + $0x8] sm:$0xff] %v409_v54 }
  0xfd   :  { %v819_v55 = vpop.f32.mrb[4].mxu0 }
  0xfe   :  { %650 = vst [vmem:[%s1239_s8 + $0x30] sm:$0xff] %v819_v55  ;;  %v843_v56 = vpop.f32.mrb[4].mxu1  ;;  %v242_v57 = vpop.f32.mrb[5].mxu0 }
  0xff   :  { %666 = vst [vmem:[%s1240_s9 + $0x30] sm:$0xff] %v843_v56  ;;  %648 = vst [vmem:[%s1239_s8 + $0x20] sm:$0xff] %v242_v57  ;;  %v422_v58 = vpop.f32.mrb[5].mxu1  ;;  %v820_v59 = vpop.f32.mrb[6].mxu0 }
 0x100   :  { %664 = vst [vmem:[%s1240_s9 + $0x20] sm:$0xff] %v422_v58  ;;  %651 = vst [vmem:[%s1239_s8 + $0x38] sm:$0xff] %v820_v59  ;;  %v844_v60 = vpop.f32.mrb[6].mxu1  ;;  %v245_v61 = vpop.f32.mrb[7].mxu0 }
 0x101   :  { %667 = vst [vmem:[%s1240_s9 + $0x38] sm:$0xff] %v844_v60  ;;  %649 = vst [vmem:[%s1239_s8 + $0x28] sm:$0xff] %v245_v61  ;;  %v425_v62 = vpop.f32.mrb[7].mxu1 }
 0x102   :  { %665 = vst [vmem:[%s1240_s9 + $0x28] sm:$0xff] %v425_v62 }
 0x115   :  { %v863_v63 = vpop.f32.mrb[8].mxu0 }
 0x116   :  { %678 = vst [vmem:[%s1241_s10 + $0x10] sm:$0xff] %v863_v63  ;;  %v867_v0 = vpop.f32.mrb[8].mxu1  ;;  %v586_v1 = vpop.f32.mrb[9].mxu0 }
 0x117   :  { %682 = vst [vmem:[%s1241_s10 + $0x30] sm:$0xff] %v867_v0  ;;  %676 = vst [vmem:[%s1241_s10] sm:$0xff] %v586_v1  ;;  %v602_v2 = vpop.f32.mrb[9].mxu1  ;;  %v864_v3 = vpop.f32.mrb[10].mxu0 }
 0x118   :  { %680 = vst [vmem:[%s1241_s10 + $0x20] sm:$0xff] %v602_v2  ;;  %679 = vst [vmem:[%s1241_s10 + $0x18] sm:$0xff] %v864_v3  ;;  %v868_v4 = vpop.f32.mrb[10].mxu1  ;;  %v589_v5 = vpop.f32.mrb[11].mxu0 }
 0x119   :  { %683 = vst [vmem:[%s1241_s10 + $0x38] sm:$0xff] %v868_v4  ;;  %677 = vst [vmem:[%s1241_s10 + $0x8] sm:$0xff] %v589_v5  ;;  %v605_v6 = vpop.f32.mrb[11].mxu1 }
 0x11a   :  { %681 = vst [vmem:[%s1241_s10 + $0x28] sm:$0xff] %v605_v6 }

// kernel: rwkv_tmix_x070_forward.5
= control target key start
LH: loop header
LB: loop body
LE: loop exit
PB: predicated region body
PF: predicated region fallthrough
CT: control target
= control target key end

     0   :  { %s383_s1 = inlined_call_operand.vmem [shape: bf16[128,128], index: 1, kind: input, shape index: {}]   ;;  %s384_s0 = inlined_call_operand.vmem [shape: bf16[64,128], index: 0, kind: input, shape index: {}]   ;;  %s385_s2 = inlined_call_operand.vmem [shape: f32[64,128], index: 2, kind: output, shape index: {}]  }
   0x1   :  { %v296_v0 = vld [vmem:[%s383_s1] sm:$0xff]   ;;  %v297_v1 = vld [vmem:[%s383_s1 + $0x8] sm:$0xff]   ;;  %v298_v2 = vld [vmem:[%s383_s1 + $0x10] sm:$0xff]  }
   0x2   :  { %256 = vmatprep.subr.bf16.mxu0 %v296_v0  ;;  %280 = vmatprep.subr.bf16.mxu1 %v296_v0  ;;  %v299_v3 = vld [vmem:[%s383_s1 + $0x18] sm:$0xff]   ;;  %v304_v4 = vld [vmem:[%s384_s0] sm:$0xff]   ;;  %v305_v5 = vld [vmem:[%s384_s0 + $0x10] sm:$0xff]  }
   0x3   :  { %257 = vmatpush3.bf16.msra.mxu0 %v296_v0  ;;  %288 = vmatpush3.bf16.msra.mxu1 %v296_v0  ;;  %v300_v6 = vld [vmem:[%s383_s1 + $0x20] sm:$0xff]   ;;  %v301_v7 = vld [vmem:[%s383_s1 + $0x28] sm:$0xff]   ;;  %v302_v8 = vld [vmem:[%s383_s1 + $0x30] sm:$0xff]  }
   0x4   :  { %258 = vmatprep.subr.bf16.mxu0 %v297_v1  ;;  %281 = vmatprep.subr.bf16.mxu1 %v297_v1  ;;  %v303_v9 = vld [vmem:[%s383_s1 + $0x38] sm:$0xff]   ;;  %v306_v10 = vld [vmem:[%s384_s0 + $0x8] sm:$0xff]  }
   0x5   :  { %272 = vmatprep.mubr.bf16.mxu0 %v304_v4  ;;  %276 = vmatprep.mubr.bf16.mxu1 %v305_v5  ;;  %v307_v11 = vld [vmem:[%s384_s0 + $0x18] sm:$0xff]  }
   0x7   :  { %259 = vmatpush3.bf16.msra.mxu0 %v297_v1  ;;  %289 = vmatpush3.bf16.msra.mxu1 %v297_v1 }
   0x8   :  { %260 = vmatprep.subr.bf16.mxu0 %v298_v2  ;;  %282 = vmatprep.subr.bf16.mxu1 %v298_v2 }
   0xb   :  { %261 = vmatpush3.bf16.msra.mxu0 %v298_v2  ;;  %290 = vmatpush3.bf16.msra.mxu1 %v298_v2 }
   0xc   :  { %262 = vmatprep.subr.bf16.mxu0 %v299_v3  ;;  %283 = vmatprep.subr.bf16.mxu1 %v299_v3 }
   0xf   :  { %263 = vmatpush3.bf16.msra.mxu0 %v299_v3  ;;  %291 = vmatpush3.bf16.msra.mxu1 %v299_v3 }
  0x10   :  { %264 = vmatprep.subr.bf16.mxu0 %v300_v6  ;;  %284 = vmatprep.subr.bf16.mxu1 %v300_v6 }
  0x13   :  { %265 = vmatpush3.bf16.msra.mxu0 %v300_v6  ;;  %292 = vmatpush3.bf16.msra.mxu1 %v300_v6 }
  0x14   :  { %266 = vmatprep.subr.bf16.mxu0 %v301_v7  ;;  %285 = vmatprep.subr.bf16.mxu1 %v301_v7 }
  0x17   :  { %267 = vmatpush3.bf16.msra.mxu0 %v301_v7  ;;  %293 = vmatpush3.bf16.msra.mxu1 %v301_v7 }
  0x18   :  { %268 = vmatprep.subr.bf16.mxu0 %v302_v8  ;;  %286 = vmatprep.subr.bf16.mxu1 %v302_v8 }
  0x1b   :  { %269 = vmatpush3.bf16.msra.mxu0 %v302_v8  ;;  %294 = vmatpush3.bf16.msra.mxu1 %v302_v8 }
  0x1c   :  { %270 = vmatprep.subr.bf16.mxu0 %v303_v9  ;;  %287 = vmatprep.subr.bf16.mxu1 %v303_v9 }
  0x1f   :  { %271 = vmatpush3.bf16.msra.mxu0 %v303_v9  ;;  %295 = vmatpush3.bf16.msra.mxu1 %v303_v9 }
  0x22   :  { %273 = vmatmul.mubr.bf16.vlgmr.msra.gmra.mrb[0].mxu0 %v306_v10  ;;  %277 = vmatmul.mubr.bf16.vlgmr.msra.gmra.mrb[0].mxu1 %v307_v11 }
  0xf5   :  { %v274_v12 = vpop.f32.mrb[0].mxu0  ;;  %v278_v13 = vpop.f32.mrb[0].mxu1 }
  0xf6   :  { %222 = vst [vmem:[%s385_s2 + $0x10] sm:$0xff] %v274_v12  ;;  %226 = vst [vmem:[%s385_s2 + $0x30] sm:$0xff] %v278_v13  ;;  %v162_v14 = vpop.f32.mrb[1].mxu0  ;;  %v178_v15 = vpop.f32.mrb[1].mxu1 }
  0xf7   :  { %220 = vst [vmem:[%s385_s2] sm:$0xff] %v162_v14  ;;  %224 = vst [vmem:[%s385_s2 + $0x20] sm:$0xff] %v178_v15  ;;  %v275_v16 = vpop.f32.mrb[2].mxu0  ;;  %v279_v17 = vpop.f32.mrb[2].mxu1 }
  0xf8   :  { %223 = vst [vmem:[%s385_s2 + $0x18] sm:$0xff] %v275_v16  ;;  %227 = vst [vmem:[%s385_s2 + $0x38] sm:$0xff] %v279_v17  ;;  %v165_v18 = vpop.f32.mrb[3].mxu0  ;;  %v181_v19 = vpop.f32.mrb[3].mxu1 }
  0xf9   :  { %221 = vst [vmem:[%s385_s2 + $0x8] sm:$0xff] %v165_v18  ;;  %225 = vst [vmem:[%s385_s2 + $0x28] sm:$0xff] %v181_v19 }

// kernel: rwkv_tmix_x070_forward.4
= control target key start
LH: loop header
LB: loop body
LE: loop exit
PB: predicated region body
PF: predicated region fallthrough
CT: control target
= control target key end

     0   :  { %s7423_s21 = smov 0   ;;  %s7425_s22 = smov 0   ;;  %s8377_s0 = inlined_call_operand.vmem [shape: bf16[2,32,128], index: 0, kind: input, shape index: {}]   ;;  %s8378_s1 = inlined_call_operand.vmem [shape: bf16[2,32,128], index: 1, kind: input, shape index: {}]   ;;  %s8379_s2 = inlined_call_operand.vmem [shape: bf16[2,32,128], index: 2, kind: input, shape index: {}]   ;;  %s8380_s3 = inlined_call_operand.vmem [shape: bf16[2,32,128], index: 3, kind: input, shape index: {}]   ;;  %s8381_s4 = inlined_call_operand.vmem [shape: bf16[2,32,128], index: 4, kind: input, shape index: {}]   ;;  %s8382_s5 = inlined_call_operand.vmem [shape: bf16[2,32,128], index: 5, kind: input, shape index: {}]   ;;  %s8383_s6 = inlined_call_operand.vmem [shape: bf16[2,32,128], index: 6, kind: output, shape index: {}]  }
   0x1   :  { %s7427_s23 = smov 0  }
   0x2 LB: > { %s35_s24 = sadd.s32 1, %s7379_s22  ;;  %p6029_p0 = scmp.ge.s32.totalorder %s7383_s23, 1  ;;  %s7383_s23 = sphi %s7427_s23, %s16_s23   ;;  %s7379_s22 = sphi %s7425_s22, %s8385_s22   ;;  %s7375_s21 = sphi %s7423_s21, %s8384_s21  }
   0x3   : > { %p37_p1 = scmp.ge.s32.totalorder %s35_s24, 2  ;;  %p357_p2 = scmp.lt.s32.totalorder %s7383_s23, 3 }
   0x5   : > { %s8387_s24 = smov (%p37_p1, %s35_s24), 0  ;;  %p358_p3 = pnand %p6029_p0, %p357_p2 }
   0x6   : > { %p462_p4 = scmp.lt.s32.totalorder (!%p358_p3), %s7375_s21, 1  ;;  %v553_v0 = vlaneseq (!%p358_p3)  ;;  %v7385_v1 = vmov (!%p358_p3), 0.0   ;;  %vm627_vm0 = vcmask (!%p358_p3), 130048   ;;  %vm580_vm3 = vcmask (!%p358_p3), 523264   ;;  %s7387_s20 = smov (!%p358_p3), 64  }
   0x7   : > { %361 = sbr.rel (%p358_p3) target bundleno = 6375 (0x18e7), region = 44  ;;  %6510 = vmatprep.subr.bf16.mxu1 (!%p358_p3), %v7385_v1  ;;  %581 = vst.msk [vmem:[#allocation2] sm:$0xff] (!%p358_p3), %vm580_vm3, %v7385_v1  ;;  %582 = vst.msk [vmem:[#allocation2 + $0x8] sm:$0xff] (!%p358_p3), %vm580_vm3, %v7385_v1  ;;  %vm7386_vm4 = vmmov (!%p358_p3), 0  }
   0x8   : > { %v7442_v2 = vshrl.u32 (!%p358_p3), %v553_v0, 7  ;;  %v7444_v3 = vand.u32 (!%p358_p3), 127, %v553_v0  ;;  %583 = vst.msk [vmem:[#allocation2 + $0x10] sm:$0xff] (!%p358_p3), %vm580_vm3, %v7385_v1  ;;  %584 = vst.msk [vmem:[#allocation2 + $0x18] sm:$0xff] (!%p358_p3), %vm580_vm3, %v7385_v1  ;;  %6512 = vmatprep.mubr.msk.bf16.mxu1 (!%p358_p3), %vm7386_vm4, %v7385_v1 }
   0x9   : > { %585 = vst.msk [vmem:[#allocation2 + $0x20] sm:$0xff] (!%p358_p3), %vm580_vm3, %v7385_v1  ;;  %586 = vst.msk [vmem:[#allocation2 + $0x28] sm:$0xff] (!%p358_p3), %vm580_vm3, %v7385_v1 }
   0xa   : > { %vm564_vm1 = vcmp.ge.s32.totalorder (!%p358_p3), %v7442_v2, %v7444_v3  ;;  %v7463_v11 = vadd.s32 (!%p358_p3), 8, %v7442_v2  ;;  %587 = vst.msk [vmem:[#allocation2 + $0x30] sm:$0xff] (!%p358_p3), %vm580_vm3, %v7385_v1  ;;  %588 = vst.msk [vmem:[#allocation2 + $0x38] sm:$0xff] (!%p358_p3), %vm580_vm3, %v7385_v1  ;;  %v735_v38 = vsub.s32 (!%p358_p3), 7, %v7442_v2  ;;  %vm558_vm5 = vcmp.gt.s32.totalorder (!%p358_p3), %v7442_v2, %v7444_v3 }
   0xb   : > { %v7457_v4 = vsel (!%p358_p3), %vm564_vm1, 1.0, %v7385_v1  ;;  %589 = vst.msk [vmem:[#allocation2 + $0x40] sm:$0xff] (!%p358_p3), %vm580_vm3, %v7385_v1  ;;  %590 = vst.msk [vmem:[#allocation2 + $0x48] sm:$0xff] (!%p358_p3), %vm580_vm3, %v7385_v1  ;;  %vm570_vm7 = vcmp.eq.s32.totalorder (!%p358_p3), %v7442_v2, %v7444_v3 }
   0xc   : > { %6507 = vmatprep.mubr.msk.f32.mxu0 (!%p358_p3), %vm627_vm0, %v7457_v4  ;;  %vm565_vm2 = vcmp.ge.s32.totalorder (!%p358_p3), %v7463_v11, %v7444_v3  ;;  %591 = vst.msk [vmem:[#allocation2 + $0x50] sm:$0xff] (!%p358_p3), %vm580_vm3, %v7385_v1  ;;  %592 = vst.msk [vmem:[#allocation2 + $0x58] sm:$0xff] (!%p358_p3), %vm580_vm3, %v7385_v1  ;;  %vm559_vm6 = vcmp.gt.s32.totalorder (!%p358_p3), %v7463_v11, %v7444_v3  ;;  %vm571_vm8 = vcmp.eq.s32.totalorder (!%p358_p3), %v7463_v11, %v7444_v3 }
   0xd   : > { %v7468_v16 = vsel (!%p358_p3), %vm565_vm2, 1.0, %v7385_v1  ;;  %593 = vst.msk [vmem:[#allocation2 + $0x60] sm:$0xff] (!%p358_p3), %vm580_vm3, %v7385_v1  ;;  %594 = vst.msk [vmem:[#allocation2 + $0x68] sm:$0xff] (!%p358_p3), %vm580_vm3, %v7385_v1 }
   0xe   : > { %s8389_s21 = smov (!%p462_p4, %s7375_s21), 1  ;;  %595 = vst.msk [vmem:[#allocation2 + $0x70] sm:$0xff] %vm580_vm3, %v7385_v1  ;;  %596 = vst.msk [vmem:[#allocation2 + $0x78] sm:$0xff] %vm580_vm3, %v7385_v1 }
   0xf   : > { %s7446_s25 = sshll.u32 %s8389_s21, 4 }
  0x10   : > { %s7454_s28 = scalar_lea.vmem %s8378_s1, %s7446_s25  ;;  %s7477_s7 = scalar_lea.vmem %s8380_s3, %s7446_s25 }
  0x11   : > { %v6203_v5 = vld [vmem:[%s7454_s28] sm:$0xff]   ;;  %s7523_s10 = scalar_lea.vmem %s8377_s0, %s7446_s25  ;;  %s7529_s13 = scalar_lea.vmem %s8381_s4, %s7446_s25 }
  0x12   : > { %v6204_v6 = vunpack.c.l.bf16 %v6203_v5  ;;  %v6205_v7 = vunpack.c.h.bf16 %v6203_v5  ;;  %v7480_v17 = vld [vmem:[%s7477_s7] sm:$0xff]   ;;  %s7535_s16 = scalar_lea.vmem %s8382_s5, %s7446_s25  ;;  %s7541_s19 = scalar_lea.vmem %s8379_s2, %s7446_s25 }
  0x13   : > { %1748 = vxpose.xlu1.c.b16.start.end [1/1] (short) (narrow) %v7480_v17, 64  ;;  %v6207_v30 = vld [vmem:[%s7523_s10] sm:$0xff]   ;;  %s8339_s27 = scalar_lea.vmem %s8383_s6, %s7446_s25 }
  0x14   : > { %v621_v8 = vmul.f32 1.442695, %v6204_v6  ;;  %v623_v9 = vmul.f32 1.442695, %v6205_v7  ;;  %v6215_v31 = vld [vmem:[%s7529_s13] sm:$0xff]   ;;  %v6209_v34 = vunpack.c.h.bf16 %v6207_v30  ;;  %v6208_v35 = vunpack.c.l.bf16 %v6207_v30 }
  0x15   : > { %v6219_v32 = vld [vmem:[%s7535_s16] sm:$0xff]   ;;  %v6217_v36 = vunpack.c.h.bf16 %v6215_v31  ;;  %v6216_v42 = vunpack.c.l.bf16 %v6215_v31 }
  0x16   : > { %7329 = vpow2.f32 %v621_v8  ;;  %v6211_v33 = vld [vmem:[%s7541_s19] sm:$0xff]   ;;  %v6221_v39 = vunpack.c.h.bf16 %v6219_v32  ;;  %v6220_v45 = vunpack.c.l.bf16 %v6219_v32 }
  0x17   : > { %7331 = vpow2.f32 %v623_v9  ;;  %v6213_v40 = vunpack.c.h.bf16 %v6211_v33  ;;  %v6212_v46 = vunpack.c.l.bf16 %v6211_v33 }
  0x20   : > { %v7330_v10 = vpop.eup %7329 }
  0x21   : > { %v7332_v12 = vpop.eup %7331  ;;  %v625_v13 = vsub.f32 0.0, %v7330_v10 }
  0x22   : > { %v626_v14 = vsub.f32 0.0, %v7332_v12 }
  0x24   : > { %v7057_v15 = vpack.c.bf16 %v626_v14, %v625_v13 }
  0x26   : > { %7058 = vmatprep.subr.bf16.mxu0 %v7057_v15 }
  0x27   : > { %7060 = vmatpush3.bf16.msra.mxu0 %v7057_v15 }
  0x28   : > { %6516 = vmatprep.subr.bf16.mxu0 %v7385_v1 }
  0x2a   : > { %6508 = vmatmul.mubr.msk.f32.vlgmr.msra.gmra.mrb[0].mxu0 %vm627_vm0, %v7468_v16 }
  0x2b   : > { %6518 = vmatprep.mubr.msk.bf16.mxu0 %vm7386_vm4, %v7385_v1 }
  0x79   : > { %v7588_v10 = vpop.trf.xlu1 }
  0x7d   : > { %v7590_v12 = vpop.trf.xlu1 }
  0xfd   : > { %v6509_v18 = vpop.f32.mrb[0].mxu0 }
  0xfe   : > { %v711_v19 = vmul.f32 1.442695, %v6509_v18  ;;  %v714_v20 = vsub.f32 %v6509_v18, %v626_v14  ;;  %v720_v21 = vsub.f32 0.0, %v6509_v18  ;;  %v700_v22 = vpop.f32.mrb[1].mxu0 }
  0xff   : > { %v709_v23 = vmul.f32 1.442695, %v700_v22  ;;  %v713_v24 = vsub.f32 %v700_v22, %v625_v13  ;;  %v719_v25 = vsub.f32 0.0, %v700_v22  ;;  %v7592_v13 = vpop.trf.xlu1  ;;  %v7613_v22 = vsel %vm559_vm6, 1.0, %v7385_v1 }
 0x100   : > { %7333 = vpow2.f32 %v711_v19  ;;  %v717_v26 = vmul.f32 1.442695, %v714_v20  ;;  %v723_v27 = vmul.f32 1.442695, %v720_v21  ;;  %v7606_v19 = vsel %vm558_vm5, 1.0, %v7385_v1 }
 0x101   : > { %7335 = vpow2.f32 %v709_v23  ;;  %v715_v28 = vmul.f32 1.442695, %v713_v24  ;;  %v721_v29 = vmul.f32 1.442695, %v719_v25 }
 0x102   : > { %7337 = vpow2.f32 %v717_v26  ;;  %v7617_v26 = vsel %vm570_vm7, 1.0, %v7385_v1 }
 0x103   : > { %7339 = vpow2.f32 %v723_v27  ;;  %v7594_v14 = vpop.trf.xlu1  ;;  %v7620_v27 = vsel %vm571_vm8, 1.0, %v7385_v1 }
 0x104   : > { %7341 = vpow2.f32 %v715_v28 }
 0x105   : > { %7343 = vpow2.f32 %v721_v29 }
 0x10a   : > { %v7334_v37 = vpop.eup %7333 }
 0x10b   : > { %v7336_v41 = vpop.eup %7335  ;;  %v726_v43 = vmul.f32 %v7334_v37, %v6209_v34  ;;  %v7550_v51 = vrot.slane %v7334_v37, %v735_v38 }
 0x10c   : > { %v7338_v44 = vpop.eup %7337  ;;  %v725_v47 = vmul.f32 %v7336_v41, %v6208_v35 }
 0x10d   : > { %v7340_v48 = vpop.eup %7339  ;;  %v728_v49 = vmul.f32 %v7338_v44, %v6217_v36 }
 0x10e   : > { %v7342_v50 = vpop.eup %7341  ;;  %v732_v52 = vmul.f32 %v7340_v48, %v6221_v39  ;;  %v730_v53 = vmul.f32 %v7340_v48, %v6213_v40  ;;  %v7552_v54 = vpack.c.bf16 %v726_v43, %v725_v47 }
 0x10f   : > { %v7344_v55 = vpop.eup %7343  ;;  %v727_v56 = vmul.f32 %v7342_v50, %v6216_v42  ;;  %v7643_v50 = vld [vmem:[#allocation2] sm:$0xff] }
 0x110   : > { %v731_v57 = vmul.f32 %v7344_v55, %v6220_v45  ;;  %v740_v58 = vmul.f32 %v7550_v51, %v732_v52  ;;  %v729_v59 = vmul.f32 %v7344_v55, %v6212_v46  ;;  %v738_v60 = vmul.f32 %v7550_v51, %v730_v53 }
 0x111   : > { %v7556_v61 = vpack.c.bf16 %v728_v49, %v727_v56  ;;  %v7656_v56 = vld [vmem:[#allocation2 + $0x10] sm:$0xff] }
 0x112   : > { %v744_v62 = vpack.c.bf16 %v732_v52, %v731_v57  ;;  %v739_v63 = vmul.f32 %v7550_v51, %v731_v57  ;;  %v743_v0 = vpack.c.bf16 %v730_v53, %v729_v59  ;;  %v737_v5 = vmul.f32 %v7550_v51, %v729_v59  ;;  %v7645_v52 = vld [vmem:[#allocation2 + $0x8] sm:$0xff]  ;;  %v7658_v57 = vld [vmem:[#allocation2 + $0x18] sm:$0xff] }
 0x113   : > { %v756_v53 = vpack.c.bf16 %v7645_v52, %v7643_v50 }
 0x114   : > { %1975 = vrot.lane.b32.xlu0 %v744_v62, %s7387_s20  ;;  %2027 = vrot.lane.b32.xlu1 %v743_v0, %s7387_s20  ;;  %v7563_v6 = vsel %vm580_vm3, %v744_v62, 0  ;;  %v7566_v7 = vsel %vm580_vm3, %v743_v0, 0  ;;  %v7568_v8 = vpack.c.bf16 %v738_v60, %v737_v5  ;;  %v7570_v9 = vpack.c.bf16 %v740_v58, %v739_v63  ;;  %v7667_v60 = vld [vmem:[#allocation2 + $0x20] sm:$0xff]  ;;  %v7669_v62 = vld [vmem:[#allocation2 + $0x28] sm:$0xff]  ;;  %v7678_v5 = vld [vmem:[#allocation2 + $0x30] sm:$0xff] }
 0x115   : > { %6511 = vmatpush3.bf16.xpose.msra.mxu1 %v7563_v6  ;;  %6517 = vmatpush3.bf16.xpose.msra.mxu0 %v7566_v7  ;;  %v7653_v55 = vsel %vm580_vm3, %v756_v53, 0  ;;  %v757_v58 = vpack.c.bf16 %v7658_v57, %v7656_v56  ;;  %v758_v63 = vpack.c.bf16 %v7669_v62, %v7667_v60 }
 0x117   : > { %v7664_v59 = vsel %vm580_vm3, %v757_v58, 0  ;;  %v7675_v0 = vsel %vm580_vm3, %v758_v63, 0 }
 0x118   : > { %2612 = vrot.lane.b32.xlu1 %v7480_v17, %s7387_s20  ;;  %1972 = vrot.lane.b32.xlu0 %v7556_v61, %s7387_s20 }
 0x11c   : > { %6513 = vmatmul.mubr.msk.bf16.vlgmr.msra.gmra.mrb[0].mxu1 %vm580_vm3, %v7556_v61  ;;  %6519 = vmatmul.mubr.msk.bf16.vlgmr.msra.gmra.mrb[4].mxu0 %vm580_vm3, %v7556_v61 }
 0x11d   : > { %2742 = vrot.lane.b32.xlu1 %v7552_v54, %s7387_s20 }
 0x121   : > { %2995 = vrot.lane.b32.xlu1 %v7568_v8, %s7387_s20 }
 0x125   : > { %3100 = vrot.lane.b32.xlu1 %v7570_v9, %s7387_s20 }
 0x186   : > { %v7596_v15 = vpop.permute.xlu1 %2027 }
 0x18a   : > { %v7598_v18 = vpop.permute.xlu1 %2612 }
 0x18b   : > { %2978 = vxpose.xlu1.c.b16.start.end [1/1] (short) (narrow) %v7598_v18, 64 }
 0x1ef   : > { %v801_v20 = vpop.f32.mrb[0].mxu1  ;;  %v847_v21 = vpop.f32.mrb[4].mxu0 }
 0x1f0   : > { %v808_v23 = vmul.f32 %v7606_v19, %v801_v20  ;;  %v6514_v24 = vpop.f32.mrb[1].mxu1  ;;  %v6520_v25 = vpop.f32.mrb[5].mxu0  ;;  %v7623_v30 = vmul.f32 %v7606_v19, %v847_v21  ;;  %v7680_v20 = vld [vmem:[#allocation2 + $0x38] sm:$0xff] }
 0x1f1   : > { %v804_v28 = vpop.f32.mrb[2].mxu1  ;;  %v850_v29 = vpop.f32.mrb[6].mxu0  ;;  %v759_v21 = vpack.c.bf16 %v7680_v20, %v7678_v5 }
 0x1f2   : > { %v809_v3 = vmul.f32 %v7613_v22, %v804_v28  ;;  %v7627_v11 = vmul.f32 %v7613_v22, %v850_v29  ;;  %v6515_v31 = vpop.f32.mrb[3].mxu1  ;;  %v6521_v32 = vpop.f32.mrb[7].mxu0  ;;  %6526 = vmatprep.mubr.msk.f32.mxu1 %vm627_vm0, %v808_v23  ;;  %v856_v33 = vadd.f32 %v7617_v26, %v808_v23 }
 0x1f4   : > { %v857_v34 = vadd.f32 %v7620_v27, %v809_v3  ;;  %v1338_v35 = vpack.c.bf16 %v7627_v11, %v7623_v30  ;;  %v7061_v36 = vpack.c.bf16 %v809_v3, %v808_v23  ;;  %v7686_v23 = vsel %vm580_vm3, %v759_v21, 0 }
 0x1f6   : > { %7062 = vmatprep.subr.bf16.mxu1 %v7061_v36  ;;  %v7065_v37 = vpack.c.bf16 %v857_v34, %v856_v33 }
 0x1f7   : > { %7064 = vmatpush3.bf16.msra.mxu1 %v7061_v36 }
 0x1f8   : > { %7066 = vmatprep.subr.bf16.mxu0 %v7065_v37 }
 0x1f9   : > { %7068 = vmatpush3.bf16.msra.mxu0 %v7065_v37 }
 0x1fa   : > { %6527 = vmatmul.mubr.msk.f32.vlgmr.msra.gmra.mrb[4].mxu1 %vm627_vm0, %v809_v3 }
 0x2cd   : > { %v6528_v39 = vpop.f32.mrb[4].mxu1 }
 0x2ce   : > { %v930_v40 = vpop.f32.mrb[5].mxu1 }
 0x2cf   : > { %v7069_v41 = vpack.c.bf16 %v6528_v39, %v930_v40  ;;  %6533 = vmatprep.mubr.msk.f32.mxu0 %vm627_vm0, %v930_v40  ;;  %6540 = vmatprep.mubr.msk.f32.mxu1 %vm627_vm0, %v930_v40 }
 0x2d0   : > { %6534 = vmatmul.mubr.msk.f32.vlgmr.msra.gmra.mrb[2].mxu0 %vm627_vm0, %v6528_v39 }
 0x2d1   : > { %7070 = vmatprep.subr.bf16.mxu1 %v7069_v41 }
 0x2d2   : > { %7072 = vmatpush3.bf16.msra.mxu1 %v7069_v41 }
 0x2d5   : > { %6541 = vmatmul.mubr.msk.f32.vlgmr.msra.gmra.mrb[6].mxu1 %vm627_vm0, %v6528_v39 }
 0x3a3   : > { %v6535_v42 = vpop.f32.mrb[2].mxu0 }
 0x3a4   : > { %v1021_v43 = vadd.f32 %v6535_v42, %v857_v34  ;;  %v1011_v44 = vpop.f32.mrb[3].mxu0 }
 0x3a5   : > { %v1020_v45 = vadd.f32 %v1011_v44, %v856_v33 }
 0x3a7   : > { %v7073_v46 = vpack.c.bf16 %v1021_v43, %v1020_v45 }
 0x3a8   : > { %v6542_v47 = vpop.f32.mrb[6].mxu1 }
 0x3a9   : > { %v1088_v48 = vpop.f32.mrb[7].mxu1  ;;  %7074 = vmatprep.subr.bf16.mxu0 %v7073_v46 }
 0x3aa   : > { %v7077_v49 = vpack.c.bf16 %v6542_v47, %v1088_v48  ;;  %7076 = vmatpush3.bf16.msra.mxu0 %v7073_v46  ;;  %6547 = vmatprep.mubr.msk.f32.mxu0 %vm627_vm0, %v1088_v48 }
 0x3ab   : > { %6554 = vmatprep.mubr.msk.f32.mxu1 %vm627_vm0, %v1088_v48 }
 0x3ac   : > { %7078 = vmatprep.subr.bf16.mxu1 %v7077_v49 }
 0x3ad   : > { %6548 = vmatmul.mubr.msk.f32.vlgmr.msra.gmra.mrb[8].mxu0 %vm627_vm0, %v6542_v47  ;;  %7080 = vmatpush3.bf16.msra.mxu1 %v7077_v49 }
 0x3ae   : > { %6564 = vmatprep.subr.bf16.mxu1 %v7385_v1 }
 0x3b0   : > { %6555 = vmatmul.mubr.msk.f32.vlgmr.msra.gmra.mrb[8].mxu1 %vm627_vm0, %v6542_v47 }
 0x3b1   : > { %6572 = vmatprep.mubr.msk.bf16.mxu1 %vm7386_vm4, %v7385_v1 }
 0x3b6   : > { %6565 = vmatpush3.bf16.xpose.msra.mxu1 %v7653_v55 }
 0x3b7   : > { %6566 = vmatprep.subr.bf16.mxu1 %v7385_v1 }
 0x3be   : > { %6567 = vmatpush3.bf16.xpose.msra.mxu1 %v7664_v59 }
 0x3bf   : > { %6568 = vmatprep.subr.bf16.mxu1 %v7385_v1 }
 0x3c6   : > { %6569 = vmatpush3.bf16.xpose.msra.mxu1 %v7675_v0 }
 0x3c7   : > { %6570 = vmatprep.subr.bf16.mxu1 %v7385_v1 }
 0x3ce   : > { %6571 = vmatpush3.bf16.xpose.msra.mxu1 %v7686_v23 }
 0x3cf   : > { %6576 = vmatprep.subr.bf16.mxu1 %v7385_v1 }
 0x3d5   : > { %6573 = vmatmul.mubr.msk.bf16.vlgmr.msra.gmra.mrb[12].mxu1 %vm580_vm3, %v7556_v61 }
 0x3d6   : > { %6577 = vmatpush3.bf16.msra.mxu1 %v7480_v17  ;;  %6578 = vmatprep.mubr.msk.bf16.mxu1 %vm7386_vm4, %v7385_v1 }
 0x3d7   : > { %6625 = vmatprep.subr.bf16.mxu1 %v7568_v8 }
 0x3e1   : > { %6579 = vmatmul.mubr.msk.bf16.vlgmr.msra.gmra.mrb[12].mxu1 %vm627_vm0, %v1338_v35 }
 0x3e2   : > { %6626 = vmatpush3.bf16.msra.mxu1 %v7568_v8  ;;  %6627 = vmatprep.mubr.msk.bf16.mxu1 %vm627_vm0, %v7588_v10 }
 0x3e3   : > { %6635 = vmatprep.subr.bf16.mxu1 %v7570_v9 }
 0x3e9   : > { %6628 = vmatmul.mubr.msk.bf16.vlgmr.msra.gmra.mrb[16].mxu1 %vm627_vm0, %v7590_v12 }
 0x3ea   : > { %6636 = vmatpush3.bf16.msra.mxu1 %v7570_v9  ;;  %6631 = vmatprep.mubr.msk.bf16.mxu1 %vm627_vm0, %v7592_v13 }
 0x3eb   : > { %6651 = vmatprep.subr.bf16.mxu1 %v7385_v1 }
 0x3f1   : > { %6632 = vmatmul.mubr.msk.bf16.gmra.mrb[20].mxu1 %vm627_vm0, %v7594_v14 }
 0x480   : > { %v6549_v61 = vpop.f32.mrb[8].mxu0 }
 0x481   : > { %v1179_v8 = vadd.f32 %v6549_v61, %v1021_v43  ;;  %v1169_v24 = vpop.f32.mrb[9].mxu0 }
 0x482   : > { %v1178_v25 = vadd.f32 %v1169_v24, %v1020_v45 }
 0x483   : > { %v6556_v10 = vpop.f32.mrb[8].mxu1 }
 0x484   : > { %v7081_v28 = vpack.c.bf16 %v1179_v8, %v1178_v25  ;;  %v1246_v29 = vpop.f32.mrb[9].mxu1 }
 0x485   : > { %6561 = vmatprep.mubr.msk.f32.mxu0 %vm627_vm0, %v1246_v29 }
 0x486   : > { %7082 = vmatprep.subr.bf16.mxu0 %v7081_v28 }
 0x487   : > { %7084 = vmatpush3.bf16.msra.mxu0 %v7081_v28 }
 0x48a   : > { %6562 = vmatmul.mubr.msk.f32.vlgmr.msra.gmra.mrb[10].mxu0 %vm627_vm0, %v6556_v10 }
 0x4b4   : > { %v1429_v9 = vpop.f32.mrb[12].mxu1 }
 0x4b5   : > { %v6580_v12 = vpop.f32.mrb[13].mxu1 }
 0x4b6   : > { %v1432_v13 = vpop.f32.mrb[14].mxu1 }
 0x4b7   : > { %v7085_v30 = vpack.c.bf16 %v1432_v13, %v1429_v9  ;;  %v6581_v3 = vpop.f32.mrb[15].mxu1 }
 0x4b9   : > { %7086 = vmatprep.subr.bf16.mxu0 %v7085_v30 }
 0x4ba   : > { %7088 = vmatpush3.bf16.msra.mxu0 %v7085_v30  ;;  %v1742_v30 = vmul.f32 %v7656_v56, %v7550_v51 }
 0x4bb   : > { %6589 = vmatprep.subr.bf16.mxu0 %v7385_v1 }
 0x55d   : > { %v6563_v14 = vpop.f32.mrb[10].mxu0 }
 0x55e   : > { %v1327_v11 = vpop.f32.mrb[11].mxu0  ;;  %v1337_v32 = vadd.f32 %v6563_v14, %v1179_v8  ;;  %v1740_v14 = vmul.f32 %v7643_v50, %v7550_v51  ;;  %v1746_v50 = vmul.f32 %v7678_v5, %v7550_v51 }
 0x55f   : > { %v1336_v31 = vadd.f32 %v1327_v11, %v1178_v25 }
 0x561   : > { %6586 = vmatprep.mubr.msk.f32.mxu0 %vm627_vm0, %v1336_v31 }
 0x562   : > { %6587 = vmatmul.mubr.msk.f32.vlgmr.msra.gmra.mrb[12].mxu0 %vm627_vm0, %v1337_v32  ;;  %v1743_v32 = vmul.f32 %v7658_v57, %v7550_v51 }
 0x563   : > { %6590 = vmatpush3.bf16.xpose.msra.mxu0 %v7566_v7  ;;  %6591 = vmatprep.mubr.msk.bf16.mxu0 %vm7386_vm4, %v7385_v1 }
 0x564   : > { %6595 = vmatprep.subr.bf16.mxu0 %v7385_v1 }
 0x56a   : > { %6592 = vmatmul.mubr.msk.bf16.vlgmr.msra.gmra.mrb[16].mxu0 %vm580_vm3, %v7552_v54 }
 0x56b   : > { %6596 = vmatpush3.bf16.xpose.msra.mxu0 %v7563_v6  ;;  %6597 = vmatprep.mubr.msk.bf16.mxu0 %vm7386_vm4, %v7385_v1 }
 0x56c   : > { %6601 = vmatprep.subr.bf16.mxu0 %v7385_v1 }
 0x572   : > { %6598 = vmatmul.mubr.msk.bf16.vlgmr.msra.gmra.mrb[20].mxu0 %vm580_vm3, %v7552_v54 }
 0x573   : > { %6603 = vmatprep.mubr.msk.bf16.mxu0 %vm7386_vm4, %v7385_v1 }
 0x635   : > { %v6588_v7 = vpop.f32.mrb[12].mxu0 }
 0x636   : > { %v1508_v33 = vpop.f32.mrb[13].mxu0 }
 0x637   : > { %v1517_v34 = vpack.c.bf16 %v6588_v7, %v1508_v33 }
 0x639   : > { %1849 = vxpose.xlu0.c.b16.start.end [1/1] (short) (narrow) %v1517_v34, 64  ;;  %6602 = vmatpush3.bf16.msra.mxu0 %v1517_v34  ;;  %v1741_v34 = vmul.f32 %v7645_v52, %v7550_v51 }
 0x63a   : > { %6607 = vmatprep.subr.bf16.mxu0 %v7385_v1 }
 0x63d   : > { %v1555_v35 = vpop.f32.mrb[16].mxu0 }
 0x63e   : > { %v6593_v6 = vpop.f32.mrb[17].mxu0  ;;  %v1562_v37 = vmul.f32 %v7457_v4, %v1555_v35 }
 0x63f   : > { %v1558_v36 = vpop.f32.mrb[18].mxu0 }
 0x640   : > { %v1563_v39 = vmul.f32 %v7468_v16, %v1558_v36  ;;  %v6594_v40 = vpop.f32.mrb[19].mxu0  ;;  %v1744_v36 = vmul.f32 %v7667_v60, %v7550_v51 }
 0x642   : > { %v1607_v41 = vpack.c.bf16 %v1563_v39, %v1562_v37  ;;  %v1747_v39 = vmul.f32 %v7680_v20, %v7550_v51 }
 0x645   : > { %v1598_v42 = vpop.f32.mrb[20].mxu0 }
 0x646   : > { %v6599_v43 = vpop.f32.mrb[21].mxu0  ;;  %v1605_v45 = vmul.f32 %v7457_v4, %v1598_v42  ;;  %v1745_v42 = vmul.f32 %v7669_v62, %v7550_v51 }
 0x647   : > { %v1601_v44 = vpop.f32.mrb[22].mxu0 }
 0x648   : > { %v1606_v46 = vmul.f32 %v7468_v16, %v1601_v44  ;;  %v6600_v47 = vpop.f32.mrb[23].mxu0 }
 0x64a   : > { %v1608_v48 = vpack.c.bf16 %v1606_v46, %v1605_v45 }
 0x64c   : > { %6604 = vmatmul.mubr.msk.bf16.vlgmr.msra.gmra.mrb[24].mxu0 %vm627_vm0, %v1608_v48 }
 0x64d   : > { %6608 = vmatpush3.bf16.msra.mxu0 %v7480_v17  ;;  %6609 = vmatprep.mubr.msk.bf16.mxu0 %vm7386_vm4, %v7385_v1  ;;  %v1976_v17 = vpop.permute.xlu0 %1975 }
 0x64e   : > { %6613 = vmatprep.subr.bf16.mxu0 %v7385_v1  ;;  %v7753_v49 = vsel %vm580_vm3, %v1976_v17, 0 }
 0x651   : > { %v7760_v53 = vpop.permute.xlu0 %1972 }
 0x658   : > { %6610 = vmatmul.mubr.msk.bf16.vlgmr.msra.gmra.mrb[24].mxu0 %vm627_vm0, %v1607_v41 }
 0x659   : > { %6614 = vmatpush3.bf16.xpose.msra.mxu0 %v7653_v55  ;;  %6621 = vmatprep.mubr.msk.bf16.mxu0 %vm7386_vm4, %v7385_v1 }
 0x65a   : > { %6615 = vmatprep.subr.bf16.mxu0 %v7385_v1 }
 0x661   : > { %6616 = vmatpush3.bf16.xpose.msra.mxu0 %v7664_v59  ;;  %v7767_v59 = vsel %vm580_vm3, %v7596_v15, 0 }
 0x662   : > { %6617 = vmatprep.subr.bf16.mxu0 %v7385_v1 }
 0x669   : > { %6618 = vmatpush3.bf16.xpose.msra.mxu0 %v7675_v0 }
 0x66a   : > { %6619 = vmatprep.subr.bf16.mxu0 %v7385_v1 }
 0x671   : > { %6620 = vmatpush3.bf16.xpose.msra.mxu0 %v7686_v23 }
 0x672   : > { %6645 = vmatprep.subr.bf16.mxu0 %v7385_v1 }
 0x678   : > { %6622 = vmatmul.mubr.msk.bf16.vlgmr.msra.gmra.mrb[24].mxu0 %vm580_vm3, %v7552_v54 }
 0x679   : > { %6646 = vmatpush3.bf16.xpose.msra.mxu0 %v7753_v49  ;;  %6647 = vmatprep.mubr.msk.bf16.mxu0 %vm7386_vm4, %v7385_v1 }
 0x680   : > { %6648 = vmatmul.mubr.msk.bf16.vlgmr.msra.gmra.mrb[28].mxu0 %vm580_vm3, %v7760_v53 }
 0x69f   : > { %v1857_v55 = vpop.trf.xlu0 }
 0x6a0   : > { %6637 = vmatprep.mubr.msk.bf16.mxu1 %vm627_vm0, %v1857_v55 }
 0x6a3   : > { %v1858_v58 = vpop.trf.xlu0 }
 0x6a4   : > { %6638 = vmatmul.mubr.msk.bf16.vlgmr.msra.gmra.mrb[16].mxu1 %vm627_vm0, %v1858_v58 }
 0x6a5   : > { %6652 = vmatpush3.bf16.xpose.msra.mxu1 %v7767_v59 }
 0x6a7   : > { %v1859_v54 = vpop.trf.xlu0 }
 0x6a8   : > { %6641 = vmatprep.mubr.msk.bf16.mxu1 %vm627_vm0, %v1859_v54 }
 0x6ab   : > { %v1860_v63 = vpop.trf.xlu0 }
 0x6ac   : > { %6642 = vmatmul.mubr.msk.bf16.gmra.mrb[20].mxu1 %vm627_vm0, %v1860_v63 }
 0x6ad   : > { %6653 = vmatprep.mubr.msk.bf16.mxu1 %vm7386_vm4, %v7385_v1 }
 0x6b4   : > { %6654 = vmatmul.mubr.msk.bf16.vlgmr.msra.gmra.mrb[24].mxu1 %vm580_vm3, %v7760_v53 }
 0x74b   : > { %v7777_v0 = vpop.f32.mrb[24].mxu0 }
 0x74c   : > { %v6623_v15 = vpop.f32.mrb[25].mxu0 }
 0x74d   : > { %v7779_v21 = vpop.f32.mrb[26].mxu0 }
 0x74e   : > { %v6624_v23 = vpop.f32.mrb[27].mxu0 }
 0x753   : > { %v2017_v61 = vpop.f32.mrb[28].mxu0 }
 0x754   : > { %v2024_v8 = vmul.f32 %v7606_v19, %v2017_v61  ;;  %v6649_v24 = vpop.f32.mrb[29].mxu0 }
 0x755   : > { %v2020_v25 = vpop.f32.mrb[30].mxu0 }
 0x756   : > { %v2025_v10 = vmul.f32 %v7613_v22, %v2020_v25  ;;  %v6650_v28 = vpop.f32.mrb[31].mxu0  ;;  %6661 = vmatprep.mubr.msk.f32.mxu0 %vm627_vm0, %v2024_v8  ;;  %v2075_v29 = vadd.f32 %v7617_v26, %v2024_v8 }
 0x757   : > { %v7827_v28 = vld [vmem:[#allocation2 + $0x48] sm:$0xff] }
 0x758   : > { %v2076_v9 = vadd.f32 %v7620_v27, %v2025_v10  ;;  %v7089_v12 = vpack.c.bf16 %v2025_v10, %v2024_v8 }
 0x75a   : > { %7090 = vmatprep.subr.bf16.mxu0 %v7089_v12  ;;  %v7093_v13 = vpack.c.bf16 %v2076_v9, %v2075_v29 }
 0x75b   : > { %7092 = vmatpush3.bf16.msra.mxu0 %v7089_v12  ;;  %v7839_v12 = vld [vmem:[#allocation2 + $0x50] sm:$0xff] }
 0x75c   : > { %7094 = vmatprep.subr.bf16.mxu1 %v7093_v13 }
 0x75d   : > { %7096 = vmatpush3.bf16.msra.mxu1 %v7093_v13  ;;  %v7841_v13 = vld [vmem:[#allocation2 + $0x58] sm:$0xff] }
 0x75e   : > { %6662 = vmatmul.mubr.msk.f32.vlgmr.msra.gmra.mrb[14].mxu0 %vm627_vm0, %v2025_v10  ;;  %v7825_v10 = vld [vmem:[#allocation2 + $0x40] sm:$0xff] }
 0x777   : > { %v6639_v3 = vpop.f32.mrb[16].mxu1 }
 0x778   : > { %v7177_v11 = vadd.f32 %v6639_v3, %v1742_v30  ;;  %v1911_v31 = vpop.f32.mrb[17].mxu1  ;;  %v1968_v30 = vpack.c.bf16 %v7841_v13, %v7839_v12 }
 0x779   : > { %v7178_v7 = vadd.f32 %v1911_v31, %v1740_v14  ;;  %v6640_v33 = vpop.f32.mrb[18].mxu1  ;;  %v7850_v14 = vld [vmem:[#allocation2 + $0x60] sm:$0xff] }
 0x77a   : > { %1952 = vst.msk [vmem:[#allocation2 + $0x10] sm:$0xff] %vm580_vm3, %v7177_v11  ;;  %v7179_v35 = vadd.f32 %v6640_v33, %v1743_v32  ;;  %v1914_v6 = vpop.f32.mrb[19].mxu1  ;;  %v7848_v3 = vsel %vm580_vm3, %v1968_v30, 0  ;;  %v7852_v11 = vld [vmem:[#allocation2 + $0x68] sm:$0xff]  ;;  %v7863_v33 = vld [vmem:[#allocation2 + $0x78] sm:$0xff] }
 0x77b   : > { %1950 = vst.msk [vmem:[#allocation2] sm:$0xff] %vm580_vm3, %v7178_v7  ;;  %v7180_v56 = vadd.f32 %v1914_v6, %v1741_v34  ;;  %v1969_v31 = vpack.c.bf16 %v7852_v11, %v7850_v14  ;;  %v7861_v7 = vld [vmem:[#allocation2 + $0x70] sm:$0xff]  ;;  %v7874_v6 = vpop.permute.xlu1 %2742 }
 0x77c   : > { %1953 = vst.msk [vmem:[#allocation2 + $0x18] sm:$0xff] %vm580_vm3, %v7179_v35  ;;  %v1970_v34 = vpack.c.bf16 %v7863_v33, %v7861_v7 }
 0x77d   : > { %1951 = vst.msk [vmem:[#allocation2 + $0x8] sm:$0xff] %vm580_vm3, %v7180_v56  ;;  %v7859_v32 = vsel %vm580_vm3, %v1969_v31, 0 }
 0x77e   : > { %v7870_v35 = vsel %vm580_vm3, %v1970_v34, 0 }
 0x77f   : > { %v6643_v57 = vpop.f32.mrb[20].mxu1  ;;  %v2996_v56 = vpop.permute.xlu1 %2995 }
 0x780   : > { %v7181_v37 = vadd.f32 %v6643_v57, %v1746_v50  ;;  %v1927_v52 = vpop.f32.mrb[21].mxu1 }
 0x781   : > { %v7182_v40 = vadd.f32 %v1927_v52, %v1744_v36  ;;  %v6644_v41 = vpop.f32.mrb[22].mxu1 }
 0x782   : > { %1956 = vst.msk [vmem:[#allocation2 + $0x30] sm:$0xff] %vm580_vm3, %v7181_v37  ;;  %v7183_v43 = vadd.f32 %v6644_v41, %v1747_v39  ;;  %v1930_v44 = vpop.f32.mrb[23].mxu1 }
 0x783   : > { %1954 = vst.msk [vmem:[#allocation2 + $0x20] sm:$0xff] %vm580_vm3, %v7182_v40  ;;  %v7184_v5 = vadd.f32 %v1930_v44, %v1745_v42  ;;  %v3101_v50 = vpop.permute.xlu1 %3100 }
 0x784   : > { %1957 = vst.msk [vmem:[#allocation2 + $0x38] sm:$0xff] %vm580_vm3, %v7183_v43 }
 0x785   : > { %1955 = vst.msk [vmem:[#allocation2 + $0x28] sm:$0xff] %vm580_vm3, %v7184_v5 }
 0x787   : > { %v2066_v60 = vpop.f32.mrb[24].mxu1  ;;  %v2986_v57 = vpop.trf.xlu1 }
 0x788   : > { %v6655_v45 = vpop.f32.mrb[25].mxu1  ;;  %v7812_v20 = vmul.f32 %v7606_v19, %v2066_v60 }
 0x789   : > { %v2069_v46 = vpop.f32.mrb[26].mxu1 }
 0x78a   : > { %v7815_v47 = vmul.f32 %v7613_v22, %v2069_v46  ;;  %v6656_v62 = vpop.f32.mrb[27].mxu1 }
 0x78b   : > { %v2987_v36 = vpop.trf.xlu1 }
 0x78c   : > { %v2557_v48 = vpack.c.bf16 %v7815_v47, %v7812_v20 }
 0x831   : > { %v6663_v17 = vpop.f32.mrb[14].mxu0 }
 0x832   : > { %v2149_v55 = vpop.f32.mrb[15].mxu0 }
 0x833   : > { %v7097_v58 = vpack.c.bf16 %v6663_v17, %v2149_v55  ;;  %6668 = vmatprep.mubr.msk.f32.mxu1 %vm627_vm0, %v2149_v55  ;;  %6675 = vmatprep.mubr.msk.f32.mxu0 %vm627_vm0, %v2149_v55 }
 0x834   : > { %6669 = vmatmul.mubr.msk.f32.vlgmr.msra.gmra.mrb[10].mxu1 %vm627_vm0, %v6663_v17 }
 0x835   : > { %7098 = vmatprep.subr.bf16.mxu0 %v7097_v58 }
 0x836   : > { %7100 = vmatpush3.bf16.msra.mxu0 %v7097_v58 }
 0x839   : > { %6676 = vmatmul.mubr.msk.f32.vlgmr.msra.gmra.mrb[32].mxu0 %vm627_vm0, %v6663_v17 }
 0x907   : > { %v6670_v54 = vpop.f32.mrb[10].mxu1 }
 0x908   : > { %v2240_v63 = vadd.f32 %v6670_v54, %v2076_v9  ;;  %v2230_v15 = vpop.f32.mrb[11].mxu1 }
 0x909   : > { %v2239_v23 = vadd.f32 %v2230_v15, %v2075_v29  ;;  %v1967_v29 = vpack.c.bf16 %v7827_v28, %v7825_v10 }
 0x90b   : > { %v7101_v61 = vpack.c.bf16 %v2240_v63, %v2239_v23  ;;  %v7837_v9 = vsel %vm580_vm3, %v1967_v29, 0 }
 0x90c   : > { %v6677_v8 = vpop.f32.mrb[32].mxu0 }
 0x90d   : > { %v2307_v24 = vpop.f32.mrb[33].mxu0  ;;  %7102 = vmatprep.subr.bf16.mxu1 %v7101_v61 }
 0x90e   : > { %v7105_v25 = vpack.c.bf16 %v6677_v8, %v2307_v24  ;;  %7104 = vmatpush3.bf16.msra.mxu1 %v7101_v61  ;;  %6682 = vmatprep.mubr.msk.f32.mxu1 %vm627_vm0, %v2307_v24 }
 0x90f   : > { %6689 = vmatprep.mubr.msk.f32.mxu0 %vm627_vm0, %v2307_v24 }
 0x910   : > { %7106 = vmatprep.subr.bf16.mxu0 %v7105_v25 }
 0x911   : > { %6683 = vmatmul.mubr.msk.f32.vlgmr.msra.gmra.mrb[28].mxu1 %vm627_vm0, %v6677_v8  ;;  %7108 = vmatpush3.bf16.msra.mxu0 %v7105_v25 }
 0x912   : > { %6699 = vmatprep.subr.bf16.mxu0 %v7385_v1 }
 0x914   : > { %6690 = vmatmul.mubr.msk.f32.vlgmr.msra.gmra.mrb[34].mxu0 %vm627_vm0, %v6677_v8 }
 0x915   : > { %6707 = vmatprep.mubr.msk.bf16.mxu0 %vm7386_vm4, %v7385_v1 }
 0x91a   : > { %6700 = vmatpush3.bf16.xpose.msra.mxu0 %v7837_v9 }
 0x91b   : > { %6701 = vmatprep.subr.bf16.mxu0 %v7385_v1 }
 0x922   : > { %6702 = vmatpush3.bf16.xpose.msra.mxu0 %v7848_v3 }
 0x923   : > { %6703 = vmatprep.subr.bf16.mxu0 %v7385_v1 }
 0x92a   : > { %6704 = vmatpush3.bf16.xpose.msra.mxu0 %v7859_v32 }
 0x92b   : > { %6705 = vmatprep.subr.bf16.mxu0 %v7385_v1 }
 0x932   : > { %6706 = vmatpush3.bf16.xpose.msra.mxu0 %v7870_v35 }
 0x933   : > { %6711 = vmatprep.subr.bf16.mxu0 %v7385_v1 }
 0x939   : > { %6708 = vmatmul.mubr.msk.bf16.vlgmr.msra.gmra.mrb[36].mxu0 %vm580_vm3, %v7760_v53 }
 0x93a   : > { %6712 = vmatpush3.bf16.msra.mxu0 %v7598_v18  ;;  %6713 = vmatprep.mubr.msk.bf16.mxu0 %vm7386_vm4, %v7385_v1 }
 0x93b   : > { %6760 = vmatprep.subr.bf16.mxu0 %v2996_v56 }
 0x945   : > { %6714 = vmatmul.mubr.msk.bf16.vlgmr.msra.gmra.mrb[36].mxu0 %vm627_vm0, %v2557_v48 }
 0x946   : > { %6761 = vmatpush3.bf16.msra.mxu0 %v2996_v56  ;;  %6762 = vmatprep.mubr.msk.bf16.mxu0 %vm627_vm0, %v2986_v57 }
 0x947   : > { %6770 = vmatprep.subr.bf16.mxu0 %v3101_v50 }
 0x94d   : > { %6763 = vmatmul.mubr.msk.bf16.vlgmr.msra.gmra.mrb[40].mxu0 %vm627_vm0, %v2987_v36 }
 0x94e   : > { %6771 = vmatpush3.bf16.msra.mxu0 %v3101_v50  ;;  %v6242_v50 = vld [vmem:[%s7454_s28 + $0x8] sm:$0xff]  }
 0x94f   : > { %6787 = vmatprep.subr.bf16.mxu0 %v7385_v1  ;;  %v6224_v57 = vunpack.c.l.bf16 %v6242_v50  ;;  %v6225_v36 = vunpack.c.h.bf16 %v6242_v50 }
 0x9e4   : > { %v6684_v53 = vpop.f32.mrb[28].mxu1 }
 0x9e5   : > { %v2398_v37 = vadd.f32 %v6684_v53, %v2240_v63  ;;  %v2388_v52 = vpop.f32.mrb[29].mxu1  ;;  %v3238_v53 = vmul.f32 1.442695, %v6224_v57 }
 0x9e6   : > { %v2397_v39 = vadd.f32 %v2388_v52, %v2239_v23 }
 0x9e7   : > { %v6691_v40 = vpop.f32.mrb[34].mxu0  ;;  %7345 = vpow2.f32 %v3238_v53 }
 0x9e8   : > { %v7109_v41 = vpack.c.bf16 %v2398_v37, %v2397_v39  ;;  %v2465_v42 = vpop.f32.mrb[35].mxu0 }
 0x9e9   : > { %6696 = vmatprep.mubr.msk.f32.mxu1 %vm627_vm0, %v2465_v42 }
 0x9ea   : > { %7110 = vmatprep.subr.bf16.mxu1 %v7109_v41 }
 0x9eb   : > { %7112 = vmatpush3.bf16.msra.mxu1 %v7109_v41 }
 0x9ee   : > { %6697 = vmatmul.mubr.msk.f32.vlgmr.msra.gmra.mrb[30].mxu1 %vm627_vm0, %v6691_v40 }
 0xa18   : > { %v2652_v43 = vpop.f32.mrb[36].mxu0 }
 0xa19   : > { %v6715_v44 = vpop.f32.mrb[37].mxu0 }
 0xa1a   : > { %v2655_v5 = vpop.f32.mrb[38].mxu0 }
 0xa1b   : > { %v7113_v60 = vpack.c.bf16 %v2655_v5, %v2652_v43  ;;  %v6716_v45 = vpop.f32.mrb[39].mxu0 }
 0xa1d   : > { %7114 = vmatprep.subr.bf16.mxu1 %v7113_v60 }
 0xa1e   : > { %7116 = vmatpush3.bf16.msra.mxu1 %v7113_v60 }
 0xa1f   : > { %6724 = vmatprep.subr.bf16.mxu1 %v7385_v1 }
 0xac1   : > { %v6698_v46 = vpop.f32.mrb[30].mxu1 }
 0xac2   : > { %v2546_v20 = vpop.f32.mrb[31].mxu1  ;;  %v2556_v62 = vadd.f32 %v6698_v46, %v2398_v37  ;;  %v3240_v37 = vmul.f32 1.442695, %v6225_v36 }
 0xac3   : > { %v2555_v47 = vadd.f32 %v2546_v20, %v2397_v39 }
 0xac4   : > { %7347 = vpow2.f32 %v3240_v37 }
 0xac5   : > { %6721 = vmatprep.mubr.msk.f32.mxu1 %vm627_vm0, %v2555_v47 }
 0xac6   : > { %6722 = vmatmul.mubr.msk.f32.vlgmr.msra.gmra.mrb[32].mxu1 %vm627_vm0, %v2556_v62 }
 0xac7   : > { %6725 = vmatpush3.bf16.xpose.msra.mxu1 %v7767_v59  ;;  %6726 = vmatprep.mubr.msk.bf16.mxu1 %vm7386_vm4, %v7385_v1  ;;  %v2988_v59 = vpop.trf.xlu1 }
 0xac8   : > { %6730 = vmatprep.subr.bf16.mxu1 %v7385_v1  ;;  %6766 = vmatprep.mubr.msk.bf16.mxu0 %vm627_vm0, %v2988_v59 }
 0xacb   : > { %v2989_v48 = vpop.trf.xlu1 }
 0xacc   : > { %6767 = vmatmul.mubr.msk.bf16.gmra.mrb[44].mxu0 %vm627_vm0, %v2989_v48 }
 0xace   : > { %6727 = vmatmul.mubr.msk.bf16.vlgmr.msra.gmra.mrb[36].mxu1 %vm580_vm3, %v7874_v6 }
 0xacf   : > { %6731 = vmatpush3.bf16.xpose.msra.mxu1 %v7753_v49  ;;  %6732 = vmatprep.mubr.msk.bf16.mxu1 %vm7386_vm4, %v7385_v1 }
 0xad0   : > { %6736 = vmatprep.subr.bf16.mxu1 %v7385_v1 }
 0xad6   : > { %6733 = vmatmul.mubr.msk.bf16.vlgmr.msra.gmra.mrb[40].mxu1 %vm580_vm3, %v7874_v6 }
 0xad7   : > { %6738 = vmatprep.mubr.msk.bf16.mxu1 %vm7386_vm4, %v7385_v1 }
 0xb99   : > { %v6723_v17 = vpop.f32.mrb[32].mxu1 }
 0xb9a   : > { %v2731_v55 = vpop.f32.mrb[33].mxu1 }
 0xb9b   : > { %v2740_v49 = vpack.c.bf16 %v6723_v17, %v2731_v55 }
 0xb9d   : > { %3083 = vxpose.xlu0.c.b16.start.end [1/1] (short) (narrow) %v2740_v49, 64  ;;  %6737 = vmatpush3.bf16.msra.mxu1 %v2740_v49 }
 0xb9e   : > { %6742 = vmatprep.subr.bf16.mxu1 %v7385_v1 }
 0xba1   : > { %v2781_v58 = vpop.f32.mrb[36].mxu1 }
 0xba2   : > { %v6728_v54 = vpop.f32.mrb[37].mxu1  ;;  %v2788_v15 = vmul.f32 %v7457_v4, %v2781_v58 }
 0xba3   : > { %v2784_v63 = vpop.f32.mrb[38].mxu1  ;;  %v6243_v54 = vld [vmem:[%s7523_s10 + $0x8] sm:$0xff]  }
 0xba4   : > { %v2789_v23 = vmul.f32 %v7468_v16, %v2784_v63  ;;  %v6729_v61 = vpop.f32.mrb[39].mxu1  ;;  %v6245_v63 = vld [vmem:[%s7529_s13 + $0x8] sm:$0xff]  }
 0xba5   : > { %v6244_v61 = vld [vmem:[%s7541_s19 + $0x8] sm:$0xff]  }
 0xba6   : > { %v2833_v8 = vpack.c.bf16 %v2789_v23, %v2788_v15  ;;  %v6246_v15 = vld [vmem:[%s7535_s16 + $0x8] sm:$0xff]   ;;  %v6229_v23 = vunpack.c.h.bf16 %v6243_v54  ;;  %v6232_v36 = vunpack.c.l.bf16 %v6244_v61 }
 0xba7   : > { %v6240_v57 = vunpack.c.l.bf16 %v6246_v15 }
 0xba9   : > { %v2824_v24 = vpop.f32.mrb[40].mxu1 }
 0xbaa   : > { %v6734_v25 = vpop.f32.mrb[41].mxu1  ;;  %v2831_v30 = vmul.f32 %v7457_v4, %v2824_v24  ;;  %v6237_v24 = vunpack.c.h.bf16 %v6245_v63 }
 0xbab   : > { %v2827_v29 = vpop.f32.mrb[42].mxu1 }
 0xbac   : > { %v2832_v31 = vmul.f32 %v7468_v16, %v2827_v29  ;;  %v6735_v34 = vpop.f32.mrb[43].mxu1  ;;  %v6241_v29 = vunpack.c.h.bf16 %v6246_v15  ;;  %v7985_v15 = vld [vmem:[%s7477_s7 + $0x8] sm:$0xff]  }
 0xbad   : > { %v6236_v34 = vunpack.c.l.bf16 %v6245_v63 }
 0xbae   : > { %v2834_v56 = vpack.c.bf16 %v2832_v31, %v2831_v30  ;;  %v6233_v30 = vunpack.c.h.bf16 %v6244_v61 }
 0xbb0   : > { %6739 = vmatmul.mubr.msk.bf16.vlgmr.msra.gmra.mrb[44].mxu1 %vm627_vm0, %v2834_v56 }
 0xbb1   : > { %6743 = vmatpush3.bf16.msra.mxu1 %v7598_v18  ;;  %6744 = vmatprep.mubr.msk.bf16.mxu1 %vm7386_vm4, %v7385_v1  ;;  %v7346_v18 = vpop.eup %7345 }
 0xbb2   : > { %6748 = vmatprep.subr.bf16.mxu1 %v7385_v1  ;;  %v7348_v52 = vpop.eup %7347  ;;  %v3242_v39 = vsub.f32 0.0, %v7346_v18 }
 0xbbc   : > { %6745 = vmatmul.mubr.msk.bf16.vlgmr.msra.gmra.mrb[44].mxu1 %vm627_vm0, %v2833_v8  ;;  %v6228_v8 = vunpack.c.l.bf16 %v6243_v54 }
 0xbbd   : > { %6749 = vmatpush3.bf16.xpose.msra.mxu1 %v7837_v9  ;;  %6756 = vmatprep.mubr.msk.bf16.mxu1 %vm7386_vm4, %v7385_v1  ;;  %v3243_v9 = vsub.f32 0.0, %v7348_v52 }
 0xbbe   : > { %6750 = vmatprep.subr.bf16.mxu1 %v7385_v1 }
 0xbbf   : > { %v7117_v40 = vpack.c.bf16 %v3243_v9, %v3242_v39 }
 0xbc5   : > { %6751 = vmatpush3.bf16.xpose.msra.mxu1 %v7848_v3 }
 0xbc6   : > { %6752 = vmatprep.subr.bf16.mxu1 %v7385_v1 }
 0xbcd   : > { %6753 = vmatpush3.bf16.xpose.msra.mxu1 %v7859_v32 }
 0xbce   : > { %6754 = vmatprep.subr.bf16.mxu1 %v7385_v1 }
 0xbd5   : > { %6755 = vmatpush3.bf16.xpose.msra.mxu1 %v7870_v35 }
 0xbd6   : > { %7118 = vmatprep.subr.bf16.mxu1 %v7117_v40 }
 0xbdc   : > { %6757 = vmatmul.mubr.msk.bf16.vlgmr.msra.gmra.mrb[44].mxu1 %vm580_vm3, %v7874_v6 }
 0xbdd   : > { %7120 = vmatpush3.bf16.msra.mxu1 %v7117_v40  ;;  %6784 = vmatprep.mubr.msk.f32.mxu1 %vm627_vm0, %v7457_v4 }
 0xbde   : > { %6793 = vmatprep.subr.bf16.mxu1 %v7385_v1 }
 0xbe4   : > { %6785 = vmatmul.mubr.msk.f32.vlgmr.msra.gmra.mrb[34].mxu1 %vm627_vm0, %v7468_v16 }
 0xbe5   : > { %6795 = vmatprep.mubr.msk.bf16.mxu1 %vm7386_vm4, %v7385_v1 }
 0xc03   : > { %v3091_v3 = vpop.trf.xlu0 }
 0xc04   : > { %6772 = vmatprep.mubr.msk.bf16.mxu0 %vm627_vm0, %v3091_v3 }
 0xc07   : > { %v3092_v32 = vpop.trf.xlu0 }
 0xc08   : > { %6773 = vmatmul.mubr.msk.bf16.vlgmr.msra.gmra.mrb[40].mxu0 %vm627_vm0, %v3092_v32 }
 0xc0b   : > { %v3093_v35 = vpop.trf.xlu0 }
 0xc0c   : > { %6776 = vmatprep.mubr.msk.bf16.mxu0 %vm627_vm0, %v3093_v35 }
 0xc0f   : > { %v3094_v6 = vpop.trf.xlu0 }
 0xc10   : > { %6777 = vmatmul.mubr.msk.bf16.gmra.mrb[44].mxu0 %vm627_vm0, %v3094_v6 }
 0xc11   : > { %6789 = vmatprep.mubr.msk.bf16.mxu0 %vm7386_vm4, %v7385_v1 }
 0xcaf   : > { %v7942_v41 = vpop.f32.mrb[44].mxu1 }
 0xcb0   : > { %v6758_v42 = vpop.f32.mrb[45].mxu1 }
 0xcb1   : > { %v7944_v43 = vpop.f32.mrb[46].mxu1 }
 0xcb2   : > { %v7317_v44 = vpack.i.bf16 %v7944_v43, %v7942_v41  ;;  %v6759_v5 = vpop.f32.mrb[47].mxu1 }
 0xcb7   : > { %v6786_v60 = vpop.f32.mrb[34].mxu1 }
 0xcb8   : > { %v3321_v45 = vmul.f32 1.442695, %v6786_v60  ;;  %v3324_v46 = vsub.f32 %v6786_v60, %v3243_v9  ;;  %v3330_v20 = vsub.f32 0.0, %v6786_v60  ;;  %v3310_v47 = vpop.f32.mrb[35].mxu1 }
 0xcb9   : > { %v3319_v62 = vmul.f32 1.442695, %v3310_v47  ;;  %v3323_v59 = vsub.f32 %v3310_v47, %v3242_v39  ;;  %v3329_v48 = vsub.f32 0.0, %v3310_v47 }
 0xcba   : > { %7349 = vpow2.f32 %v3321_v45  ;;  %v3327_v17 = vmul.f32 1.442695, %v3324_v46  ;;  %v3333_v55 = vmul.f32 1.442695, %v3330_v20 }
 0xcbb   : > { %7351 = vpow2.f32 %v3319_v62  ;;  %v3325_v49 = vmul.f32 1.442695, %v3323_v59  ;;  %v3331_v58 = vmul.f32 1.442695, %v3329_v48 }
 0xcbc   : > { %7353 = vpow2.f32 %v3327_v17 }
 0xcbd   : > { %7355 = vpow2.f32 %v3333_v55 }
 0xcbe   : > { %7357 = vpow2.f32 %v3325_v49 }
 0xcbf   : > { %7359 = vpow2.f32 %v3331_v58 }
 0xcc4   : > { %v7350_v25 = vpop.eup %7349 }
 0xcc5   : > { %v7352_v31 = vpop.eup %7351  ;;  %v3336_v56 = vmul.f32 %v7350_v25, %v6229_v23  ;;  %v7954_v39 = vrot.slane %v7350_v25, %v735_v38 }
 0xcc6   : > { %v7354_v50 = vpop.eup %7353  ;;  %v3335_v53 = vmul.f32 %v7352_v31, %v6228_v8 }
 0xcc7   : > { %v7356_v37 = vpop.eup %7355  ;;  %v3338_v18 = vmul.f32 %v7354_v50, %v6237_v24 }
 0xcc8   : > { %v7358_v52 = vpop.eup %7357  ;;  %v3342_v9 = vmul.f32 %v7356_v37, %v6241_v29  ;;  %v3340_v40 = vmul.f32 %v7356_v37, %v6233_v30  ;;  %v7956_v3 = vpack.c.bf16 %v3336_v56, %v3335_v53 }
 0xcc9   : > { %v7360_v32 = vpop.eup %7359  ;;  %v3337_v35 = vmul.f32 %v7358_v52, %v6236_v34 }
 0xcca   : > { %v3341_v6 = vmul.f32 %v7360_v32, %v6240_v57  ;;  %v3339_v42 = vmul.f32 %v7360_v32, %v6232_v36  ;;  %v3348_v5 = vmul.f32 %v7954_v39, %v3340_v40  ;;  %v3350_v60 = vmul.f32 %v7954_v39, %v3342_v9 }
 0xccb   : > { %v7960_v45 = vpack.c.bf16 %v3338_v18, %v3337_v35 }
 0xccc   : > { %v3354_v46 = vpack.c.bf16 %v3342_v9, %v3341_v6  ;;  %v3353_v20 = vpack.c.bf16 %v3340_v40, %v3339_v42  ;;  %v3347_v2 = vmul.f32 %v7954_v39, %v3339_v42  ;;  %v3349_v38 = vmul.f32 %v7954_v39, %v3341_v6 }
 0xccd   : > { %4580 = vrot.lane.b32.xlu1 %v7960_v45, %s7387_s20 }
 0xcce   : > { %4583 = vrot.lane.b32.xlu0 %v3354_v46, %s7387_s20  ;;  %v7968_v47 = vsel %vm580_vm3, %v3354_v46, 0  ;;  %v7971_v62 = vsel %vm580_vm3, %v3353_v20, 0  ;;  %v7973_v59 = vpack.c.bf16 %v3348_v5, %v3347_v2  ;;  %v7975_v48 = vpack.c.bf16 %v3350_v60, %v3349_v38 }
 0xccf   : > { %6788 = vmatpush3.bf16.xpose.msra.mxu0 %v7968_v47  ;;  %6794 = vmatpush3.bf16.xpose.msra.mxu1 %v7971_v62 }
 0xcd1   : > { %4635 = vrot.lane.b32.xlu1 %v3353_v20, %s7387_s20 }
 0xcd6   : > { %6790 = vmatmul.mubr.msk.bf16.vlgmr.msra.gmra.mrb[48].mxu0 %vm580_vm3, %v7960_v45  ;;  %6796 = vmatmul.mubr.msk.bf16.vlgmr.msra.gmra.mrb[48].mxu1 %vm580_vm3, %v7960_v45 }
 0xcdb   : > { %v6774_v17 = vpop.f32.mrb[40].mxu0 }
 0xcdc   : > { %v3149_v55 = vpop.f32.mrb[41].mxu0 }
 0xcdd   : > { %v6775_v49 = vpop.f32.mrb[42].mxu0 }
 0xcde   : > { %v3152_v58 = vpop.f32.mrb[43].mxu0 }
 0xce3   : > { %v6778_v54 = vpop.f32.mrb[44].mxu0 }
 0xce4   : > { %v3165_v63 = vpop.f32.mrb[45].mxu0 }
 0xce5   : > { %v6779_v23 = vpop.f32.mrb[46].mxu0 }
 0xce6   : > { %v3168_v61 = vpop.f32.mrb[47].mxu0 }
 0xcec   : > { %4357 = vxpose.xlu0.c.b16.start.end [1/1] (short) (narrow) %v7985_v15, 64 }
 0xd01   : > { %2967 = vrot.lane.b32.xlu0 %v7550_v51, %s7387_s20 }
 0xd05   : > { %5220 = vrot.lane.b32.xlu0 %v7985_v15, %s7387_s20 }
 0xd09   : > { %5603 = vrot.lane.b32.xlu0 %v7973_v59, %s7387_s20 }
 0xd0d   : > { %5708 = vrot.lane.b32.xlu0 %v7975_v48, %s7387_s20 }
 0xd40   : > { %v7996_v8 = vpop.permute.xlu0 %4583 }
 0xd52   : > { %v7998_v24 = vpop.trf.xlu0 }
 0xd56   : > { %v8000_v25 = vpop.trf.xlu0 }
 0xd5a   : > { %v8002_v29 = vpop.trf.xlu0 }
 0xd5e   : > { %v8004_v30 = vpop.trf.xlu0 }
 0xd73   : > { %v2968_v51 = vpop.permute.xlu0 %2967 }
 0xd74   : > { %v2970_v31 = vmul.f32 %v2968_v51, %v7825_v10  ;;  %v2971_v34 = vmul.f32 %v2968_v51, %v7827_v28  ;;  %v2972_v56 = vmul.f32 %v2968_v51, %v7839_v12  ;;  %v2973_v50 = vmul.f32 %v2968_v51, %v7841_v13 }
 0xd75   : > { %v2974_v57 = vmul.f32 %v2968_v51, %v7850_v14  ;;  %v2976_v36 = vmul.f32 %v2968_v51, %v7861_v7  ;;  %v2977_v53 = vmul.f32 %v2968_v51, %v7863_v33  ;;  %v2975_v37 = vmul.f32 %v2968_v51, %v7852_v11 }
 0xd76   : > { %v7186_v18 = vadd.f32 %v3149_v55, %v2970_v31  ;;  %v7188_v52 = vadd.f32 %v3152_v58, %v2971_v34  ;;  %v7185_v9 = vadd.f32 %v6774_v17, %v2972_v56  ;;  %v7187_v40 = vadd.f32 %v6775_v49, %v2973_v50 }
 0xd77   : > { %v7190_v32 = vadd.f32 %v3165_v63, %v2974_v57  ;;  %v7189_v10 = vadd.f32 %v6778_v54, %v2976_v36  ;;  %v7191_v35 = vadd.f32 %v6779_v23, %v2977_v53  ;;  %v7192_v28 = vadd.f32 %v3168_v61, %v2975_v37  ;;  %v8014_v6 = vpop.permute.xlu0 %5220  ;;  %v8049_v53 = vld [vmem:[#allocation2 + $0x8] sm:$0xff]  ;;  %v8052_v37 = vld [vmem:[#allocation2] sm:$0xff] }
 0xd78   : > { %3188 = vst.msk [vmem:[#allocation2 + $0x40] sm:$0xff] %vm580_vm3, %v7186_v18  ;;  %3189 = vst.msk [vmem:[#allocation2 + $0x48] sm:$0xff] %vm580_vm3, %v7188_v52  ;;  %5586 = vxpose.xlu0.c.b16.start.end [1/1] (short) (narrow) %v8014_v6, 64  ;;  %v3366_v18 = vpack.c.bf16 %v8049_v53, %v8052_v37 }
 0xd79   : > { %3190 = vst.msk [vmem:[#allocation2 + $0x50] sm:$0xff] %vm580_vm3, %v7185_v9  ;;  %3191 = vst.msk [vmem:[#allocation2 + $0x58] sm:$0xff] %vm580_vm3, %v7187_v40  ;;  %v8062_v9 = vld [vmem:[#allocation2 + $0x18] sm:$0xff]  ;;  %v8065_v40 = vld [vmem:[#allocation2 + $0x10] sm:$0xff] }
 0xd7a   : > { %3192 = vst.msk [vmem:[#allocation2 + $0x60] sm:$0xff] %vm580_vm3, %v7190_v32  ;;  %3194 = vst.msk [vmem:[#allocation2 + $0x70] sm:$0xff] %vm580_vm3, %v7189_v10  ;;  %v8059_v52 = vsel %vm580_vm3, %v3366_v18, 0  ;;  %v3367_v32 = vpack.c.bf16 %v8062_v9, %v8065_v40 }
 0xd7b   : > { %3195 = vst.msk [vmem:[#allocation2 + $0x78] sm:$0xff] %vm580_vm3, %v7191_v35  ;;  %3193 = vst.msk [vmem:[#allocation2 + $0x68] sm:$0xff] %vm580_vm3, %v7192_v28  ;;  %v8073_v35 = vld [vmem:[#allocation2 + $0x28] sm:$0xff]  ;;  %v8076_v28 = vld [vmem:[#allocation2 + $0x20] sm:$0xff] }
 0xd7c   : > { %v8070_v10 = vsel %vm580_vm3, %v3367_v32, 0 }
 0xd8d   : > { %5575 = vrot.lane.b32.xlu0 %v7954_v39, %s7387_s20 }
 0xda9   : > { %v3410_v12 = vpop.f32.mrb[48].mxu0  ;;  %v3456_v13 = vpop.f32.mrb[48].mxu1 }
 0xdaa   : > { %v3417_v14 = vmul.f32 %v7606_v19, %v3410_v12  ;;  %v6791_v11 = vpop.f32.mrb[49].mxu0  ;;  %v6797_v7 = vpop.f32.mrb[49].mxu1  ;;  %v8029_v5 = vmul.f32 %v7606_v19, %v3456_v13  ;;  %v3368_v12 = vpack.c.bf16 %v8073_v35, %v8076_v28 }
 0xdab   : > { %v3413_v33 = vpop.f32.mrb[50].mxu0  ;;  %v3459_v42 = vpop.f32.mrb[50].mxu1  ;;  %v8087_v11 = vld [vmem:[#allocation2 + $0x30] sm:$0xff] }
 0xdac   : > { %v3418_v60 = vmul.f32 %v7613_v22, %v3413_v33  ;;  %v8033_v46 = vmul.f32 %v7613_v22, %v3459_v42  ;;  %v6792_v20 = vpop.f32.mrb[51].mxu0  ;;  %v6798_v2 = vpop.f32.mrb[51].mxu1  ;;  %6803 = vmatprep.mubr.msk.f32.mxu0 %vm627_vm0, %v3417_v14  ;;  %v3465_v38 = vadd.f32 %v7617_v26, %v3417_v14  ;;  %v8081_v13 = vsel %vm580_vm3, %v3368_v12, 0 }
 0xdae   : > { %v3466_v17 = vadd.f32 %v7620_v27, %v3418_v60  ;;  %v3947_v55 = vpack.c.bf16 %v8033_v46, %v8029_v5  ;;  %v7121_v49 = vpack.c.bf16 %v3418_v60, %v3417_v14  ;;  %v8084_v14 = vld [vmem:[#allocation2 + $0x38] sm:$0xff] }
 0xdaf   : > { %v3369_v7 = vpack.c.bf16 %v8084_v14, %v8087_v11 }
 0xdb0   : > { %7122 = vmatprep.subr.bf16.mxu0 %v7121_v49  ;;  %v7125_v58 = vpack.c.bf16 %v3466_v17, %v3465_v38 }
 0xdb1   : > { %7124 = vmatpush3.bf16.msra.mxu0 %v7121_v49  ;;  %v8092_v33 = vsel %vm580_vm3, %v3369_v7, 0 }
 0xdb2   : > { %7126 = vmatprep.subr.bf16.mxu0 %v7125_v58 }
 0xdb4   : > { %6804 = vmatmul.mubr.msk.f32.vlgmr.msra.gmra.mrb[52].mxu0 %vm627_vm0, %v3418_v60 }
 0xdb5   : > { %7128 = vmatpush3.bf16.msra.mxu0 %v7125_v58 }
 0xe87   : > { %v6805_v54 = vpop.f32.mrb[52].mxu0 }
 0xe88   : > { %v3539_v63 = vpop.f32.mrb[53].mxu0 }
 0xe89   : > { %v7129_v23 = vpack.c.bf16 %v6805_v54, %v3539_v63  ;;  %6810 = vmatprep.mubr.msk.f32.mxu0 %vm627_vm0, %v3539_v63  ;;  %6817 = vmatprep.mubr.msk.f32.mxu1 %vm627_vm0, %v3539_v63 }
 0xe8a   : > { %6811 = vmatmul.mubr.msk.f32.vlgmr.msra.gmra.mrb[54].mxu0 %vm627_vm0, %v6805_v54 }
 0xe8b   : > { %7130 = vmatprep.subr.bf16.mxu1 %v7129_v23 }
 0xe8c   : > { %7132 = vmatpush3.bf16.msra.mxu1 %v7129_v23 }
 0xe8f   : > { %6818 = vmatmul.mubr.msk.f32.vlgmr.msra.gmra.mrb[52].mxu1 %vm627_vm0, %v6805_v54 }
 0xf5d   : > { %v6812_v61 = vpop.f32.mrb[54].mxu0 }
 0xf5e   : > { %v3630_v51 = vadd.f32 %v6812_v61, %v3466_v17  ;;  %v3620_v31 = vpop.f32.mrb[55].mxu0 }
 0xf5f   : > { %v3629_v34 = vadd.f32 %v3620_v31, %v3465_v38 }
 0xf61   : > { %v7133_v56 = vpack.c.bf16 %v3630_v51, %v3629_v34 }
 0xf62   : > { %v6819_v50 = vpop.f32.mrb[52].mxu1 }
 0xf63   : > { %v3697_v57 = vpop.f32.mrb[53].mxu1  ;;  %7134 = vmatprep.subr.bf16.mxu0 %v7133_v56 }
 0xf64   : > { %v7137_v36 = vpack.c.bf16 %v6819_v50, %v3697_v57  ;;  %7136 = vmatpush3.bf16.msra.mxu0 %v7133_v56  ;;  %6824 = vmatprep.mubr.msk.f32.mxu0 %vm627_vm0, %v3697_v57 }
 0xf65   : > { %6831 = vmatprep.mubr.msk.f32.mxu1 %vm627_vm0, %v3697_v57 }
 0xf66   : > { %7138 = vmatprep.subr.bf16.mxu1 %v7137_v36 }
 0xf67   : > { %6825 = vmatmul.mubr.msk.f32.vlgmr.msra.gmra.mrb[56].mxu0 %vm627_vm0, %v6819_v50  ;;  %7140 = vmatpush3.bf16.msra.mxu1 %v7137_v36 }
 0xf68   : > { %6841 = vmatprep.subr.bf16.mxu1 %v7385_v1 }
 0xf6a   : > { %6832 = vmatmul.mubr.msk.f32.vlgmr.msra.gmra.mrb[54].mxu1 %vm627_vm0, %v6819_v50 }
 0xf6b   : > { %6849 = vmatprep.mubr.msk.bf16.mxu1 %vm7386_vm4, %v7385_v1 }
 0xf70   : > { %6842 = vmatpush3.bf16.xpose.msra.mxu1 %v8059_v52 }
 0xf71   : > { %6843 = vmatprep.subr.bf16.mxu1 %v7385_v1 }
 0xf78   : > { %6844 = vmatpush3.bf16.xpose.msra.mxu1 %v8070_v10 }
 0xf79   : > { %6845 = vmatprep.subr.bf16.mxu1 %v7385_v1 }
 0xf80   : > { %6846 = vmatpush3.bf16.xpose.msra.mxu1 %v8081_v13 }
 0xf81   : > { %6847 = vmatprep.subr.bf16.mxu1 %v7385_v1 }
 0xf88   : > { %6848 = vmatpush3.bf16.xpose.msra.mxu1 %v8092_v33 }
 0xf89   : > { %6853 = vmatprep.subr.bf16.mxu1 %v7385_v1 }
 0xf8f   : > { %6850 = vmatmul.mubr.msk.bf16.vlgmr.msra.gmra.mrb[56].mxu1 %vm580_vm3, %v7960_v45 }
 0xf90   : > { %6854 = vmatpush3.bf16.msra.mxu1 %v7985_v15  ;;  %6855 = vmatprep.mubr.msk.bf16.mxu1 %vm7386_vm4, %v7385_v1 }
 0xf91   : > { %6902 = vmatprep.subr.bf16.mxu1 %v7973_v59 }
 0xf9b   : > { %6856 = vmatmul.mubr.msk.bf16.vlgmr.msra.gmra.mrb[56].mxu1 %vm627_vm0, %v3947_v55 }
 0xf9c   : > { %6903 = vmatpush3.bf16.msra.mxu1 %v7973_v59  ;;  %6904 = vmatprep.mubr.msk.bf16.mxu1 %vm627_vm0, %v7998_v24 }
 0xf9d   : > { %6912 = vmatprep.subr.bf16.mxu1 %v7975_v48 }
 0xfa3   : > { %6905 = vmatmul.mubr.msk.bf16.vlgmr.msra.gmra.mrb[60].mxu1 %vm627_vm0, %v8000_v25 }
 0xfa4   : > { %6913 = vmatpush3.bf16.msra.mxu1 %v7975_v48  ;;  %6908 = vmatprep.mubr.msk.bf16.mxu1 %vm627_vm0, %v8002_v29 }
 0xfa5   : > { %6928 = vmatprep.subr.bf16.mxu1 %v7385_v1 }
 0xfab   : > { %6909 = vmatmul.mubr.msk.bf16.gmra.mrb[64].mxu1 %vm627_vm0, %v8004_v30 }
0x103a   : > { %v6826_v45 = vpop.f32.mrb[56].mxu0 }
0x103b   : > { %v3788_v59 = vadd.f32 %v6826_v45, %v3630_v51  ;;  %v3778_v42 = vpop.f32.mrb[57].mxu0 }
0x103c   : > { %v3787_v5 = vadd.f32 %v3778_v42, %v3629_v34 }
0x103d   : > { %v6833_v24 = vpop.f32.mrb[54].mxu1 }
0x103e   : > { %v7141_v60 = vpack.c.bf16 %v3788_v59, %v3787_v5  ;;  %v3855_v46 = vpop.f32.mrb[55].mxu1 }
0x103f   : > { %6838 = vmatprep.mubr.msk.f32.mxu0 %vm627_vm0, %v3855_v46 }
0x1040   : > { %7142 = vmatprep.subr.bf16.mxu0 %v7141_v60 }
0x1041   : > { %7144 = vmatpush3.bf16.msra.mxu0 %v7141_v60 }
0x1044   : > { %6839 = vmatmul.mubr.msk.f32.vlgmr.msra.gmra.mrb[58].mxu0 %vm627_vm0, %v6833_v24 }
0x106e   : > { %v4038_v48 = vpop.f32.mrb[56].mxu1 }
0x106f   : > { %v6857_v25 = vpop.f32.mrb[57].mxu1 }
0x1070   : > { %v4041_v29 = vpop.f32.mrb[58].mxu1 }
0x1071   : > { %v7145_v20 = vpack.c.bf16 %v4041_v29, %v4038_v48  ;;  %v6858_v2 = vpop.f32.mrb[59].mxu1 }
0x1073   : > { %7146 = vmatprep.subr.bf16.mxu0 %v7145_v20 }
0x1074   : > { %7148 = vmatpush3.bf16.msra.mxu0 %v7145_v20 }
0x1075   : > { %6866 = vmatprep.subr.bf16.mxu0 %v7385_v1 }
0x1117   : > { %v6840_v30 = vpop.f32.mrb[58].mxu0 }
0x1118   : > { %v3936_v38 = vpop.f32.mrb[59].mxu0  ;;  %v3946_v55 = vadd.f32 %v6840_v30, %v3788_v59 }
0x1119   : > { %v3945_v17 = vadd.f32 %v3936_v38, %v3787_v5  ;;  %v4351_v38 = vmul.f32 %v8065_v40, %v7954_v39 }
0x111b   : > { %6863 = vmatprep.mubr.msk.f32.mxu0 %vm627_vm0, %v3945_v17 }
0x111c   : > { %6864 = vmatmul.mubr.msk.f32.vlgmr.msra.gmra.mrb[60].mxu0 %vm627_vm0, %v3946_v55  ;;  %v4349_v55 = vmul.f32 %v8052_v37, %v7954_v39  ;;  %v4355_v37 = vmul.f32 %v8087_v11, %v7954_v39 }
0x111d   : > { %6867 = vmatpush3.bf16.xpose.msra.mxu0 %v7971_v62  ;;  %6868 = vmatprep.mubr.msk.bf16.mxu0 %vm7386_vm4, %v7385_v1 }
0x111e   : > { %6872 = vmatprep.subr.bf16.mxu0 %v7385_v1 }
0x1124   : > { %6869 = vmatmul.mubr.msk.bf16.vlgmr.msra.gmra.mrb[64].mxu0 %vm580_vm3, %v7956_v3 }
0x1125   : > { %6873 = vmatpush3.bf16.xpose.msra.mxu0 %v7968_v47  ;;  %6874 = vmatprep.mubr.msk.bf16.mxu0 %vm7386_vm4, %v7385_v1 }
0x1126   : > { %6878 = vmatprep.subr.bf16.mxu0 %v7385_v1 }
0x112c   : > { %6875 = vmatmul.mubr.msk.bf16.vlgmr.msra.gmra.mrb[68].mxu0 %vm580_vm3, %v7956_v3 }
0x112d   : > { %6880 = vmatprep.mubr.msk.bf16.mxu0 %vm7386_vm4, %v7385_v1 }
0x11ef   : > { %v6865_v62 = vpop.f32.mrb[60].mxu0 }
0x11f0   : > { %v4117_v49 = vpop.f32.mrb[61].mxu0 }
0x11f1   : > { %v4126_v58 = vpack.c.bf16 %v6865_v62, %v4117_v49 }
0x11f3   : > { %4458 = vxpose.xlu1.c.b16.start.end [1/1] (short) (narrow) %v4126_v58, 64  ;;  %6879 = vmatpush3.bf16.msra.mxu0 %v4126_v58 }
0x11f4   : > { %6884 = vmatprep.subr.bf16.mxu0 %v7385_v1 }
0x11f7   : > { %v4164_v54 = vpop.f32.mrb[64].mxu0 }
0x11f8   : > { %v6870_v47 = vpop.f32.mrb[65].mxu0  ;;  %v4171_v23 = vmul.f32 %v7457_v4, %v4164_v54  ;;  %v4350_v54 = vmul.f32 %v8049_v53, %v7954_v39 }
0x11f9   : > { %v4167_v63 = vpop.f32.mrb[66].mxu0 }
0x11fa   : > { %v4172_v61 = vmul.f32 %v7468_v16, %v4167_v63  ;;  %v6871_v51 = vpop.f32.mrb[67].mxu0 }
0x11fb   : > { %v4356_v51 = vmul.f32 %v8084_v14, %v7954_v39 }
0x11fc   : > { %v4216_v31 = vpack.c.bf16 %v4172_v61, %v4171_v23  ;;  %v4353_v23 = vmul.f32 %v8076_v28, %v7954_v39 }
0x11ff   : > { %v4207_v34 = vpop.f32.mrb[68].mxu0 }
0x1200   : > { %v6876_v56 = vpop.f32.mrb[69].mxu0  ;;  %v4214_v57 = vmul.f32 %v7457_v4, %v4207_v34 }
0x1201   : > { %v4210_v50 = vpop.f32.mrb[70].mxu0  ;;  %v4354_v56 = vmul.f32 %v8073_v35, %v7954_v39 }
0x1202   : > { %v4215_v36 = vmul.f32 %v7468_v16, %v4210_v50  ;;  %v6877_v18 = vpop.f32.mrb[71].mxu0 }
0x1203   : > { %5350 = vrot.lane.b32.xlu1 %v7956_v3, %s7387_s20 }
0x1204   : > { %v4217_v32 = vpack.c.bf16 %v4215_v36, %v4214_v57 }
0x1206   : > { %6881 = vmatmul.mubr.msk.bf16.vlgmr.msra.gmra.mrb[72].mxu0 %vm627_vm0, %v4217_v32 }
0x1207   : > { %6885 = vmatpush3.bf16.msra.mxu0 %v7985_v15  ;;  %6886 = vmatprep.mubr.msk.bf16.mxu0 %vm7386_vm4, %v7385_v1  ;;  %v8162_v15 = vsel %vm580_vm3, %v7996_v8, 0 }
0x1208   : > { %6890 = vmatprep.subr.bf16.mxu0 %v7385_v1 }
0x1212   : > { %6887 = vmatmul.mubr.msk.bf16.vlgmr.msra.gmra.mrb[72].mxu0 %vm627_vm0, %v4216_v31 }
0x1213   : > { %6891 = vmatpush3.bf16.xpose.msra.mxu0 %v8059_v52  ;;  %6898 = vmatprep.mubr.msk.bf16.mxu0 %vm7386_vm4, %v7385_v1  ;;  %v8169_v52 = vpop.permute.xlu1 %4580 }
0x1214   : > { %6892 = vmatprep.subr.bf16.mxu0 %v7385_v1 }
0x121b   : > { %6893 = vmatpush3.bf16.xpose.msra.mxu0 %v8070_v10  ;;  %v4636_v10 = vpop.permute.xlu1 %4635 }
0x121c   : > { %6894 = vmatprep.subr.bf16.mxu0 %v7385_v1  ;;  %v8175_v8 = vsel %vm580_vm3, %v4636_v10, 0 }
0x1223   : > { %6895 = vmatpush3.bf16.xpose.msra.mxu0 %v8081_v13 }
0x1224   : > { %6896 = vmatprep.subr.bf16.mxu0 %v7385_v1 }
0x122b   : > { %6897 = vmatpush3.bf16.xpose.msra.mxu0 %v8092_v33 }
0x122c   : > { %6922 = vmatprep.subr.bf16.mxu0 %v7385_v1 }
0x1232   : > { %6899 = vmatmul.mubr.msk.bf16.vlgmr.msra.gmra.mrb[72].mxu0 %vm580_vm3, %v7956_v3 }
0x1233   : > { %6923 = vmatpush3.bf16.xpose.msra.mxu0 %v8162_v15  ;;  %6924 = vmatprep.mubr.msk.bf16.mxu0 %vm7386_vm4, %v7385_v1 }
0x123a   : > { %6925 = vmatmul.mubr.msk.bf16.vlgmr.msra.gmra.mrb[76].mxu0 %vm580_vm3, %v8169_v52 }
0x1259   : > { %v4466_v12 = vpop.trf.xlu1 }
0x125a   : > { %6914 = vmatprep.mubr.msk.bf16.mxu1 %vm627_vm0, %v4466_v12 }
0x125d   : > { %v4467_v13 = vpop.trf.xlu1 }
0x125e   : > { %6915 = vmatmul.mubr.msk.bf16.vlgmr.msra.gmra.mrb[60].mxu1 %vm627_vm0, %v4467_v13 }
0x125f   : > { %6929 = vmatpush3.bf16.xpose.msra.mxu1 %v8175_v8 }
0x1261   : > { %v4468_v3 = vpop.trf.xlu1 }
0x1262   : > { %6918 = vmatprep.mubr.msk.bf16.mxu1 %vm627_vm0, %v4468_v3 }
0x1265   : > { %v4469_v7 = vpop.trf.xlu1 }
0x1266   : > { %6919 = vmatmul.mubr.msk.bf16.gmra.mrb[64].mxu1 %vm627_vm0, %v4469_v7 }
0x1267   : > { %6930 = vmatprep.mubr.msk.bf16.mxu1 %vm7386_vm4, %v7385_v1 }
0x126e   : > { %6931 = vmatmul.mubr.msk.bf16.vlgmr.msra.gmra.mrb[68].mxu1 %vm580_vm3, %v8169_v52 }
0x1305   : > { %v8185_v33 = vpop.f32.mrb[72].mxu0 }
0x1306   : > { %v6900_v45 = vpop.f32.mrb[73].mxu0 }
0x1307   : > { %v8187_v59 = vpop.f32.mrb[74].mxu0 }
0x1308   : > { %v6901_v42 = vpop.f32.mrb[75].mxu0 }
0x130d   : > { %v4625_v5 = vpop.f32.mrb[76].mxu0 }
0x130e   : > { %v4632_v24 = vmul.f32 %v7606_v19, %v4625_v5  ;;  %v6926_v60 = vpop.f32.mrb[77].mxu0 }
0x130f   : > { %v4628_v46 = vpop.f32.mrb[78].mxu0  ;;  %v8232_v60 = vld [vmem:[#allocation2 + $0x40] sm:$0xff] }
0x1310   : > { %v4633_v48 = vmul.f32 %v7613_v22, %v4628_v46  ;;  %v6927_v25 = vpop.f32.mrb[79].mxu0  ;;  %6938 = vmatprep.mubr.msk.f32.mxu0 %vm627_vm0, %v4632_v24  ;;  %v4683_v29 = vadd.f32 %v7617_v26, %v4632_v24  ;;  %v4352_v26 = vmul.f32 %v8062_v9, %v7954_v39  ;;  %v8234_v46 = vld [vmem:[#allocation2 + $0x48] sm:$0xff] }
0x1312   : > { %v4684_v20 = vadd.f32 %v7620_v27, %v4633_v48  ;;  %v7149_v2 = vpack.c.bf16 %v4633_v48, %v4632_v24 }
0x1314   : > { %7150 = vmatprep.subr.bf16.mxu0 %v7149_v2  ;;  %v7153_v30 = vpack.c.bf16 %v4684_v20, %v4683_v29 }
0x1315   : > { %7152 = vmatpush3.bf16.msra.mxu0 %v7149_v2 }
0x1316   : > { %7154 = vmatprep.subr.bf16.mxu1 %v7153_v30 }
0x1317   : > { %7156 = vmatpush3.bf16.msra.mxu1 %v7153_v30 }
0x1318   : > { %6939 = vmatmul.mubr.msk.f32.vlgmr.msra.gmra.mrb[62].mxu0 %vm627_vm0, %v4633_v48  ;;  %v4575_v48 = vpack.c.bf16 %v8234_v46, %v8232_v60 }
0x131a   : > { %v8242_v25 = vsel %vm580_vm3, %v4575_v48, 0 }
0x1331   : > { %v6916_v17 = vpop.f32.mrb[60].mxu1 }
0x1332   : > { %v7193_v62 = vadd.f32 %v6916_v17, %v4351_v38  ;;  %v4520_v49 = vpop.f32.mrb[61].mxu1  ;;  %v8256_v38 = vld [vmem:[#allocation2 + $0x60] sm:$0xff]  ;;  %v8258_v17 = vld [vmem:[#allocation2 + $0x68] sm:$0xff] }
0x1333   : > { %v7194_v27 = vadd.f32 %v4520_v49, %v4349_v55  ;;  %v6917_v58 = vpop.f32.mrb[62].mxu1  ;;  %v4577_v55 = vpack.c.bf16 %v8258_v17, %v8256_v38  ;;  %v8267_v49 = vld [vmem:[#allocation2 + $0x70] sm:$0xff] }
0x1334   : > { %4561 = vst.msk [vmem:[#allocation2 + $0x10] sm:$0xff] %vm580_vm3, %v7193_v62  ;;  %v7195_v47 = vadd.f32 %v6917_v58, %v4352_v26  ;;  %v4523_v63 = vpop.f32.mrb[63].mxu1  ;;  %v8269_v26 = vld [vmem:[#allocation2 + $0x78] sm:$0xff] }
0x1335   : > { %4559 = vst.msk [vmem:[#allocation2] sm:$0xff] %vm580_vm3, %v7194_v27  ;;  %v7196_v40 = vadd.f32 %v4523_v63, %v4350_v54  ;;  %v8264_v62 = vsel %vm580_vm3, %v4577_v55, 0  ;;  %v4578_v27 = vpack.c.bf16 %v8269_v26, %v8267_v49  ;;  %v5604_v54 = vpop.permute.xlu0 %5603 }
0x1336   : > { %4562 = vst.msk [vmem:[#allocation2 + $0x18] sm:$0xff] %vm580_vm3, %v7195_v47 }
0x1337   : > { %4560 = vst.msk [vmem:[#allocation2 + $0x8] sm:$0xff] %vm580_vm3, %v7196_v40  ;;  %v8275_v58 = vsel %vm580_vm3, %v4578_v27, 0 }
0x1339   : > { %v6920_v9 = vpop.f32.mrb[64].mxu1  ;;  %v5709_v47 = vpop.permute.xlu0 %5708 }
0x133a   : > { %v7197_v61 = vadd.f32 %v6920_v9, %v4355_v37  ;;  %v4536_v53 = vpop.f32.mrb[65].mxu1 }
0x133b   : > { %v7198_v31 = vadd.f32 %v4536_v53, %v4353_v23  ;;  %v6921_v34 = vpop.f32.mrb[66].mxu1 }
0x133c   : > { %4565 = vst.msk [vmem:[#allocation2 + $0x30] sm:$0xff] %vm580_vm3, %v7197_v61  ;;  %v7199_v50 = vadd.f32 %v6921_v34, %v4356_v51  ;;  %v4539_v57 = vpop.f32.mrb[67].mxu1 }
0x133d   : > { %4563 = vst.msk [vmem:[#allocation2 + $0x20] sm:$0xff] %vm580_vm3, %v7198_v31  ;;  %v7200_v11 = vadd.f32 %v4539_v57, %v4354_v56  ;;  %v5594_v63 = vpop.trf.xlu0 }
0x133e   : > { %4566 = vst.msk [vmem:[#allocation2 + $0x38] sm:$0xff] %vm580_vm3, %v7199_v50 }
0x133f   : > { %4564 = vst.msk [vmem:[#allocation2 + $0x28] sm:$0xff] %vm580_vm3, %v7200_v11 }
0x1341   : > { %v4674_v28 = vpop.f32.mrb[68].mxu1  ;;  %v5595_v40 = vpop.trf.xlu0 }
0x1342   : > { %v6932_v36 = vpop.f32.mrb[69].mxu1  ;;  %v8220_v14 = vmul.f32 %v7606_v19, %v4674_v28 }
0x1343   : > { %v4677_v18 = vpop.f32.mrb[70].mxu1 }
0x1344   : > { %v4682_v32 = vmul.f32 %v7613_v22, %v4677_v18  ;;  %v6933_v39 = vpop.f32.mrb[71].mxu1 }
0x1345   : > { %v5596_v37 = vpop.trf.xlu0  ;;  %v5351_v39 = vpop.permute.xlu1 %5350 }
0x1346   : > { %v5165_v35 = vpack.c.bf16 %v4682_v32, %v8220_v14 }
0x13eb   : > { %v6940_v10 = vpop.f32.mrb[62].mxu0 }
0x13ec   : > { %v4757_v12 = vpop.f32.mrb[63].mxu0 }
0x13ed   : > { %v7157_v13 = vpack.c.bf16 %v6940_v10, %v4757_v12  ;;  %6945 = vmatprep.mubr.msk.f32.mxu1 %vm627_vm0, %v4757_v12  ;;  %6952 = vmatprep.mubr.msk.f32.mxu0 %vm627_vm0, %v4757_v12 }
0x13ee   : > { %6946 = vmatmul.mubr.msk.f32.vlgmr.msra.gmra.mrb[72].mxu1 %vm627_vm0, %v6940_v10 }
0x13ef   : > { %7158 = vmatprep.subr.bf16.mxu0 %v7157_v13 }
0x13f0   : > { %7160 = vmatpush3.bf16.msra.mxu0 %v7157_v13 }
0x13f3   : > { %6953 = vmatmul.mubr.msk.f32.vlgmr.msra.gmra.mrb[80].mxu0 %vm627_vm0, %v6940_v10 }
0x14c1   : > { %v6947_v19 = vpop.f32.mrb[72].mxu1 }
0x14c2   : > { %v4848_v3 = vadd.f32 %v6947_v19, %v4684_v20  ;;  %v4838_v7 = vpop.f32.mrb[73].mxu1  ;;  %v8247_v20 = vld [vmem:[#allocation2 + $0x58] sm:$0xff] }
0x14c3   : > { %v4847_v22 = vadd.f32 %v4838_v7, %v4683_v29  ;;  %v8245_v29 = vld [vmem:[#allocation2 + $0x50] sm:$0xff] }
0x14c4   : > { %v4576_v2 = vpack.c.bf16 %v8247_v20, %v8245_v29 }
0x14c5   : > { %v7161_v45 = vpack.c.bf16 %v4848_v3, %v4847_v22 }
0x14c6   : > { %v6954_v42 = vpop.f32.mrb[80].mxu0  ;;  %v8253_v30 = vsel %vm580_vm3, %v4576_v2, 0 }
0x14c7   : > { %v4915_v5 = vpop.f32.mrb[81].mxu0  ;;  %7162 = vmatprep.subr.bf16.mxu1 %v7161_v45 }
0x14c8   : > { %v7165_v24 = vpack.c.bf16 %v6954_v42, %v4915_v5  ;;  %7164 = vmatpush3.bf16.msra.mxu1 %v7161_v45  ;;  %6959 = vmatprep.mubr.msk.f32.mxu1 %vm627_vm0, %v4915_v5 }
0x14c9   : > { %6966 = vmatprep.mubr.msk.f32.mxu0 %vm627_vm0, %v4915_v5 }
0x14ca   : > { %7166 = vmatprep.subr.bf16.mxu0 %v7165_v24 }
0x14cb   : > { %6960 = vmatmul.mubr.msk.f32.vlgmr.msra.gmra.mrb[74].mxu1 %vm627_vm0, %v6954_v42  ;;  %7168 = vmatpush3.bf16.msra.mxu0 %v7165_v24 }
0x14cc   : > { %6976 = vmatprep.subr.bf16.mxu0 %v7385_v1 }
0x14ce   : > { %6967 = vmatmul.mubr.msk.f32.vlgmr.msra.gmra.mrb[82].mxu0 %vm627_vm0, %v6954_v42 }
0x14cf   : > { %6984 = vmatprep.mubr.msk.bf16.mxu0 %vm7386_vm4, %v7385_v1 }
0x14d4   : > { %6977 = vmatpush3.bf16.xpose.msra.mxu0 %v8242_v25 }
0x14d5   : > { %6978 = vmatprep.subr.bf16.mxu0 %v7385_v1 }
0x14dc   : > { %6979 = vmatpush3.bf16.xpose.msra.mxu0 %v8253_v30 }
0x14dd   : > { %6980 = vmatprep.subr.bf16.mxu0 %v7385_v1 }
0x14e4   : > { %6981 = vmatpush3.bf16.xpose.msra.mxu0 %v8264_v62 }
0x14e5   : > { %6982 = vmatprep.subr.bf16.mxu0 %v7385_v1 }
0x14ec   : > { %6983 = vmatpush3.bf16.xpose.msra.mxu0 %v8275_v58 }
0x14ed   : > { %6988 = vmatprep.subr.bf16.mxu0 %v7385_v1 }
0x14f3   : > { %6985 = vmatmul.mubr.msk.bf16.vlgmr.msra.gmra.mrb[84].mxu0 %vm580_vm3, %v8169_v52  ;;  %v5597_v52 = vpop.trf.xlu0 }
0x14f4   : > { %6989 = vmatpush3.bf16.msra.mxu0 %v8014_v6  ;;  %6990 = vmatprep.mubr.msk.bf16.mxu0 %vm7386_vm4, %v7385_v1 }
0x14f5   : > { %7037 = vmatprep.subr.bf16.mxu0 %v5604_v54 }
0x14ff   : > { %6991 = vmatmul.mubr.msk.bf16.vlgmr.msra.gmra.mrb[84].mxu0 %vm627_vm0, %v5165_v35 }
0x1500   : > { %7038 = vmatpush3.bf16.msra.mxu0 %v5604_v54  ;;  %7039 = vmatprep.mubr.msk.bf16.mxu0 %vm627_vm0, %v5594_v63 }
0x1501   : > { %7047 = vmatprep.subr.bf16.mxu0 %v5709_v47 }
0x1507   : > { %7040 = vmatmul.mubr.msk.bf16.vlgmr.msra.gmra.mrb[88].mxu0 %vm627_vm0, %v5595_v40  ;;  %v5576_v40 = vpop.permute.xlu0 %5575 }
0x1508   : > { %7048 = vmatpush3.bf16.msra.mxu0 %v5709_v47  ;;  %7043 = vmatprep.mubr.msk.bf16.mxu0 %vm627_vm0, %v5596_v37  ;;  %v5580_v37 = vmul.f32 %v5576_v40, %v8245_v29 }
0x150f   : > { %7044 = vmatmul.mubr.msk.bf16.gmra.mrb[92].mxu0 %vm627_vm0, %v5597_v52 }
0x159e   : > { %v6961_v9 = vpop.f32.mrb[74].mxu1 }
0x159f   : > { %v5006_v23 = vadd.f32 %v6961_v9, %v4848_v3  ;;  %v4996_v61 = vpop.f32.mrb[75].mxu1  ;;  %v5578_v9 = vmul.f32 %v5576_v40, %v8232_v60  ;;  %v5584_v60 = vmul.f32 %v5576_v40, %v8267_v49 }
0x15a0   : > { %v5005_v53 = vadd.f32 %v4996_v61, %v4847_v22  ;;  %v5581_v61 = vmul.f32 %v5576_v40, %v8247_v20  ;;  %v5582_v20 = vmul.f32 %v5576_v40, %v8256_v38 }
0x15a1   : > { %v6968_v51 = vpop.f32.mrb[82].mxu0 }
0x15a2   : > { %v7169_v31 = vpack.c.bf16 %v5006_v23, %v5005_v53  ;;  %v5073_v34 = vpop.f32.mrb[83].mxu0 }
0x15a3   : > { %6973 = vmatprep.mubr.msk.f32.mxu1 %vm627_vm0, %v5073_v34 }
0x15a4   : > { %7170 = vmatprep.subr.bf16.mxu1 %v7169_v31 }
0x15a5   : > { %7172 = vmatpush3.bf16.msra.mxu1 %v7169_v31 }
0x15a8   : > { %6974 = vmatmul.mubr.msk.f32.vlgmr.msra.gmra.mrb[76].mxu1 %vm627_vm0, %v6968_v51  ;;  %v5579_v51 = vmul.f32 %v5576_v40, %v8234_v46  ;;  %v5585_v46 = vmul.f32 %v5576_v40, %v8269_v26 }
0x15d2   : > { %v5260_v56 = vpop.f32.mrb[84].mxu0 }
0x15d3   : > { %v6992_v50 = vpop.f32.mrb[85].mxu0 }
0x15d4   : > { %v5263_v57 = vpop.f32.mrb[86].mxu0 }
0x15d5   : > { %v7173_v11 = vpack.c.bf16 %v5263_v57, %v5260_v56  ;;  %v6993_v28 = vpop.f32.mrb[87].mxu0 }
0x15d7   : > { %7174 = vmatprep.subr.bf16.mxu1 %v7173_v11 }
0x15d8   : > { %7176 = vmatpush3.bf16.msra.mxu1 %v7173_v11 }
0x15d9   : > { %7001 = vmatprep.subr.bf16.mxu1 %v7385_v1 }
0x167b   : > { %v6975_v36 = vpop.f32.mrb[76].mxu1 }
0x167c   : > { %v5154_v18 = vpop.f32.mrb[77].mxu1  ;;  %v5164_v32 = vadd.f32 %v6975_v36, %v5006_v23  ;;  %v5583_v36 = vmul.f32 %v5576_v40, %v8258_v17 }
0x167d   : > { %v5163_v14 = vadd.f32 %v5154_v18, %v5005_v53 }
0x167f   : > { %6998 = vmatprep.mubr.msk.f32.mxu1 %vm627_vm0, %v5163_v14 }
0x1680   : > { %6999 = vmatmul.mubr.msk.f32.vlgmr.msra.gmra.mrb[78].mxu1 %vm627_vm0, %v5164_v32 }
0x1681   : > { %7002 = vmatpush3.bf16.xpose.msra.mxu1 %v8175_v8  ;;  %7003 = vmatprep.mubr.msk.bf16.mxu1 %vm7386_vm4, %v7385_v1 }
0x1682   : > { %7007 = vmatprep.subr.bf16.mxu1 %v7385_v1 }
0x1688   : > { %7004 = vmatmul.mubr.msk.bf16.vlgmr.msra.gmra.mrb[80].mxu1 %vm580_vm3, %v5351_v39 }
0x1689   : > { %7008 = vmatpush3.bf16.xpose.msra.mxu1 %v8162_v15  ;;  %7009 = vmatprep.mubr.msk.bf16.mxu1 %vm7386_vm4, %v7385_v1 }
0x168a   : > { %7013 = vmatprep.subr.bf16.mxu1 %v7385_v1 }
0x1690   : > { %7010 = vmatmul.mubr.msk.bf16.vlgmr.msra.gmra.mrb[84].mxu1 %vm580_vm3, %v5351_v39 }
0x1691   : > { %7015 = vmatprep.mubr.msk.bf16.mxu1 %vm7386_vm4, %v7385_v1 }
0x1753   : > { %v7000_v8 = vpop.f32.mrb[78].mxu1 }
0x1754   : > { %v5339_v35 = vpop.f32.mrb[79].mxu1 }
0x1755   : > { %v5348_v10 = vpack.c.bf16 %v7000_v8, %v5339_v35 }
0x1757   : > { %5691 = vxpose.xlu1.c.b16.start.end [1/1] (short) (narrow) %v5348_v10, 64  ;;  %7014 = vmatpush3.bf16.msra.mxu1 %v5348_v10 }
0x1758   : > { %7019 = vmatprep.subr.bf16.mxu1 %v7385_v1 }
0x175b   : > { %v5389_v12 = vpop.f32.mrb[80].mxu1 }
0x175c   : > { %v7005_v13 = vpop.f32.mrb[81].mxu1  ;;  %v5396_v19 = vmul.f32 %v7457_v4, %v5389_v12 }
0x175d   : > { %v5392_v15 = vpop.f32.mrb[82].mxu1 }
0x175e   : > { %v5397_v3 = vmul.f32 %v7468_v16, %v5392_v15  ;;  %v7006_v7 = vpop.f32.mrb[83].mxu1 }
0x1760   : > { %v5441_v22 = vpack.c.bf16 %v5397_v3, %v5396_v19 }
0x1763   : > { %v5432_v45 = vpop.f32.mrb[84].mxu1 }
0x1764   : > { %v7011_v42 = vpop.f32.mrb[85].mxu1  ;;  %v5439_v24 = vmul.f32 %v7457_v4, %v5432_v45 }
0x1765   : > { %v5435_v5 = vpop.f32.mrb[86].mxu1 }
0x1766   : > { %v5440_v48 = vmul.f32 %v7468_v16, %v5435_v5  ;;  %v7012_v2 = vpop.f32.mrb[87].mxu1 }
0x1767   : > { %7318 = vrot.lane.b32.xlu1 %v7317_v44, %s7387_s20 }
0x1768   : > { %v5442_v55 = vpack.c.bf16 %v5440_v48, %v5439_v24 }
0x176a   : > { %7016 = vmatmul.mubr.msk.bf16.vlgmr.msra.gmra.mrb[88].mxu1 %vm627_vm0, %v5442_v55 }
0x176b   : > { %7020 = vmatpush3.bf16.msra.mxu1 %v8014_v6  ;;  %7021 = vmatprep.mubr.msk.bf16.mxu1 %vm7386_vm4, %v7385_v1 }
0x176c   : > { %7025 = vmatprep.subr.bf16.mxu1 %v7385_v1 }
0x1776   : > { %7022 = vmatmul.mubr.msk.bf16.vlgmr.msra.gmra.mrb[88].mxu1 %vm627_vm0, %v5441_v22 }
0x1777   : > { %7026 = vmatpush3.bf16.xpose.msra.mxu1 %v8242_v25  ;;  %7033 = vmatprep.mubr.msk.bf16.mxu1 %vm7386_vm4, %v7385_v1 }
0x1778   : > { %7027 = vmatprep.subr.bf16.mxu1 %v7385_v1 }
0x177f   : > { %7028 = vmatpush3.bf16.xpose.msra.mxu1 %v8253_v30 }
0x1780   : > { %7029 = vmatprep.subr.bf16.mxu1 %v7385_v1 }
0x1787   : > { %7030 = vmatpush3.bf16.xpose.msra.mxu1 %v8264_v62 }
0x1788   : > { %7031 = vmatprep.subr.bf16.mxu1 %v7385_v1 }
0x178f   : > { %7032 = vmatpush3.bf16.xpose.msra.mxu1 %v8275_v58 }
0x1796   : > { %7034 = vmatmul.mubr.msk.bf16.vlgmr.msra.gmra.mrb[88].mxu1 %vm580_vm3, %v5351_v39 }
0x17bd   : > { %v5699_v4 = vpop.trf.xlu1 }
0x17be   : > { %7049 = vmatprep.mubr.msk.bf16.mxu0 %vm627_vm0, %v5699_v4 }
0x17c1   : > { %v5700_v16 = vpop.trf.xlu1 }
0x17c2   : > { %7050 = vmatmul.mubr.msk.bf16.vlgmr.msra.gmra.mrb[88].mxu0 %vm627_vm0, %v5700_v16 }
0x17c5   : > { %v5701_v41 = vpop.trf.xlu1 }
0x17c6   : > { %7053 = vmatprep.mubr.msk.bf16.mxu0 %vm627_vm0, %v5701_v41 }
0x17c9   : > { %v5702_v43 = vpop.trf.xlu1 }
0x17ca   : > { %7054 = vmatmul.mubr.msk.bf16.gmra.mrb[92].mxu0 %vm627_vm0, %v5702_v43 }
0x17d9   : > { %v7319_v44 = vpop.permute.xlu1 %7318 }
0x17da   : > { %v7321_v6 = vunpack.i.h.bf16 %v7319_v44  ;;  %v7320_v25 = vunpack.i.l.bf16 %v7319_v44 }
0x17dc   : > { %v3205_v1 = vsel %vm580_vm3, %v7779_v21, %v7321_v6  ;;  %v3204_v30 = vsel %vm580_vm3, %v7777_v0, %v7320_v25 }
0x17dd   : > { %v3206_v62 = vpack.c.bf16 %v3205_v1, %v3204_v30 }
0x17df   : > { %3207 = vst [vmem:[%s8339_s27] sm:$0xff] %v3206_v62 }
0x1869   : > { %v5565_v27 = vpop.f32.mrb[88].mxu1 }
0x186a   : > { %v7035_v58 = vpop.f32.mrb[89].mxu1 }
0x186b   : > { %v5568_v54 = vpop.f32.mrb[90].mxu1 }
0x186c   : > { %v7322_v47 = vpack.i.bf16 %v5568_v54, %v5565_v27  ;;  %v7036_v63 = vpop.f32.mrb[91].mxu1 }
0x186e   : > { %7323 = vrot.lane.b32.xlu0 %v7322_v47, %s7387_s20 }
0x1895   : > { %v7051_v52 = vpop.f32.mrb[88].mxu0 }
0x1896   : > { %v7201_v23 = vadd.f32 %v7051_v52, %v5580_v37  ;;  %v5757_v21 = vpop.f32.mrb[89].mxu0 }
0x1897   : > { %v7202_v0 = vadd.f32 %v5757_v21, %v5578_v9  ;;  %v7052_v53 = vpop.f32.mrb[90].mxu0 }
0x1898   : > { %5798 = vst.msk [vmem:[#allocation2 + $0x50] sm:$0xff] %vm580_vm3, %v7201_v23  ;;  %v7203_v31 = vadd.f32 %v7052_v53, %v5581_v61  ;;  %v5760_v34 = vpop.f32.mrb[91].mxu0 }
0x1899   : > { %5796 = vst.msk [vmem:[#allocation2 + $0x40] sm:$0xff] %vm580_vm3, %v7202_v0  ;;  %v7204_v56 = vadd.f32 %v5760_v34, %v5579_v51 }
0x189a   : > { %5799 = vst.msk [vmem:[#allocation2 + $0x58] sm:$0xff] %vm580_vm3, %v7203_v31 }
0x189b   : > { %5797 = vst.msk [vmem:[#allocation2 + $0x48] sm:$0xff] %vm580_vm3, %v7204_v56 }
0x189d   : > { %v7055_v29 = vpop.f32.mrb[92].mxu0 }
0x189e   : > { %v7205_v50 = vadd.f32 %v7055_v29, %v5584_v60  ;;  %v5773_v57 = vpop.f32.mrb[93].mxu0 }
0x189f   : > { %v7206_v11 = vadd.f32 %v5773_v57, %v5582_v20  ;;  %v7056_v28 = vpop.f32.mrb[94].mxu0 }
0x18a0   : > { %5802 = vst.msk [vmem:[#allocation2 + $0x70] sm:$0xff] %vm580_vm3, %v7205_v50  ;;  %v7207_v18 = vadd.f32 %v7056_v28, %v5585_v46  ;;  %v5776_v14 = vpop.f32.mrb[95].mxu0 }
0x18a1   : > { %5800 = vst.msk [vmem:[#allocation2 + $0x60] sm:$0xff] %vm580_vm3, %v7206_v11  ;;  %v7208_v32 = vadd.f32 %v5776_v14, %v5583_v36 }
0x18a2   : > { %5803 = vst.msk [vmem:[#allocation2 + $0x78] sm:$0xff] %vm580_vm3, %v7207_v18 }
0x18a3   : > { %5801 = vst.msk [vmem:[#allocation2 + $0x68] sm:$0xff] %vm580_vm3, %v7208_v32 }
0x18e0   : > { %v7324_v38 = vpop.permute.xlu0 %7323 }
0x18e1   : > { %v7326_v49 = vunpack.i.h.bf16 %v7324_v38  ;;  %v7325_v39 = vunpack.i.l.bf16 %v7324_v38 }
0x18e3   : > { %v5813_v26 = vsel %vm580_vm3, %v8187_v59, %v7326_v49  ;;  %v5812_v17 = vsel %vm580_vm3, %v8185_v33, %v7325_v39 }
0x18e4   : > { %v5814_v8 = vpack.c.bf16 %v5813_v26, %v5812_v17 }
0x18e6   : > { %6192 = vst [vmem:[%s8339_s27 + $0x8] sm:$0xff] %v5814_v8 }
0x18e7 PF: > { %s16_s23 = sadd.s32 1, %s7383_s23   ;;  %s8384_s21 = smov %s7379_s22 }
0x18e8   : > { %p13_p5 = scmp.ge.s32.totalorder %s16_s23, 4   ;;  %s8385_s22 = smov %s8387_s24 }
0x18ea   :  { %15 = sbr.rel (!%p13_p5) target bundleno = 2 (0x2), region = 101 }

</bundles_post_ra>
